<compile_context>
chip_gen: v6e
topology: v6e:2x2x1
jax: 0.10.0
libtpu: 0.0.40
codegen_flags: <defaults>
</compile_context>

<pallas_src>
import functools

import jax
import jax.numpy as jnp
from jax.experimental import pallas as pl
from jax.experimental.pallas import tpu as pltpu


# ----------------------------------------------------------------------------- #
# Pallas kernel: tiled matmul + bias + (optional) PReLU                          #
# ----------------------------------------------------------------------------- #
def _round_up(x, m):
    return (x + m - 1) // m * m


def _matmul_bias_act_kernel(slope_ref, x_ref, w_ref, b_ref, o_ref, acc_ref, *,
                            apply_act):
    k = pl.program_id(2)

    @pl.when(k == 0)
    def _():
        acc_ref[...] = jnp.zeros_like(acc_ref)

    # bf16 x bf16 -> f32 accumulation on the MXU.
    acc_ref[...] += jnp.dot(x_ref[...], w_ref[...],
                            preferred_element_type=jnp.float32)

    @pl.when(k == pl.num_programs(2) - 1)
    def _():
        y = acc_ref[...] + b_ref[...]          # bias broadcast over rows (f32)
        if apply_act:                          # PReLU (single shared slope)
            a = slope_ref[0]
            y = jnp.where(y >= 0.0, y, a * y)
        o_ref[...] = y.astype(o_ref.dtype)


def matmul_bias_act(x, w, b, slope, apply_act):
    """y = PReLU(x @ w + b) if apply_act else (x @ w + b).  x:(M,K) w:(K,N) b:(N,)."""
    M, K = x.shape
    K2, N = w.shape
    assert K == K2

    x = x.astype(jnp.bfloat16)
    w = w.astype(jnp.bfloat16)

    # Adaptive tiles: big M/K tiles to approach the HBM roofline and amortize the
    # per-grid-step overhead; TN stays 128 (real Cout is small).
    TM = min(512, _round_up(M, 128))
    TN = 128
    TK = min(1024, _round_up(K, 128))
    Mp, Kp, Np = _round_up(M, TM), _round_up(K, TK), _round_up(N, TN)

    if (Mp, Kp) != (M, K):
        x = jnp.pad(x, ((0, Mp - M), (0, Kp - K)))
    if (Kp, Np) != (K, N):
        w = jnp.pad(w, ((0, Kp - K), (0, Np - N)))
    bp = b.astype(jnp.float32)
    if Np != N:
        bp = jnp.pad(bp, (0, Np - N))
    bp = bp.reshape(1, Np)
    sl = jnp.reshape(jnp.asarray(slope, jnp.float32), (1,))

    out = pl.pallas_call(
        functools.partial(_matmul_bias_act_kernel, apply_act=apply_act),
        out_shape=jax.ShapeDtypeStruct((Mp, Np), jnp.float32),
        grid_spec=pltpu.PrefetchScalarGridSpec(
            num_scalar_prefetch=0,
            grid=(Mp // TM, Np // TN, Kp // TK),
            in_specs=[
                pl.BlockSpec(memory_space=pltpu.MemorySpace.SMEM),    # PReLU slope
                pl.BlockSpec((TM, TK), lambda i, j, k: (i, k)),       # x tile (bf16)
                pl.BlockSpec((TK, TN), lambda i, j, k: (k, j)),       # w tile (bf16)
                pl.BlockSpec((1, TN), lambda i, j, k: (0, j)),        # bias tile (f32)
            ],
            out_specs=pl.BlockSpec((TM, TN), lambda i, j, k: (i, j)),
            scratch_shapes=[pltpu.VMEM((TM, TN), jnp.float32)],
        ),
        compiler_params=pltpu.CompilerParams(
            dimension_semantics=("parallel", "parallel", "arbitrary"),
            vmem_limit_bytes=32 * 1024 * 1024),
    )(sl, x, w, bp)
    if (Mp, Np) != (M, N):
        out = out[:M, :N]
    return out


# ----------------------------------------------------------------------------- #
# Conv / transposed-conv built on the Pallas matmul                              #
# ----------------------------------------------------------------------------- #
def _conv2d(x, w, b, stride, padding, slope, act):
    """x: (N,H,W,Cin) NHWC, w: (KH,KW,Cin,Cout). Returns (N,OH,OW,Cout) f32."""
    N, H, W, Cin = x.shape
    KH, KW, _, Cout = w.shape
    x = x.astype(jnp.bfloat16)               # halve im2col / DMA bytes
    if padding:
        x = jnp.pad(x, ((0, 0), (padding, padding), (padding, padding), (0, 0)))
    OH = (H + 2 * padding - KH) // stride + 1
    OW = (W + 2 * padding - KW) // stride + 1
    cols = []
    for i in range(KH):
        for j in range(KW):
            cols.append(x[:, i:i + stride * (OH - 1) + 1:stride,
                            j:j + stride * (OW - 1) + 1:stride, :])
    patches = cols[0] if len(cols) == 1 else jnp.concatenate(cols, axis=-1)
    patches = patches.reshape(N * OH * OW, KH * KW * Cin)
    y = matmul_bias_act(patches, w.reshape(KH * KW * Cin, Cout), b, slope, act)
    return y.reshape(N, OH, OW, Cout)


def _deconv2d(x, w, b, stride, padding, slope, act):
    """ConvTranspose2d: out[ih*s-p+kh, iw*s-p+kw] += x[ih,iw] @ w[kh,kw].

    Sub-pixel phase decomposition (no zero-insertion): for the D-DBPN configs
    (kernel - stride - 2*padding == 0, so OH == H*stride) every output phase
    (py,px) only touches a small union window of input taps.  We build one
    combined weight of shape (T,T,Cin, s*s*Cout) (T=3 for all DBPN configs),
    run a single stride-1 conv, and pixel-shuffle the s*s phases back out.
    """
    N, H, W, Cin = x.shape
    KH, KW, _, Cout = w.shape
    s, p = stride, padding
    if KH != KW or (KH - s - 2 * p) != 0:
        # Fallback: zero-insertion + flipped-kernel conv (not hit for DBPN configs).
        xd = jnp.zeros((N, (H - 1) * s + 1, (W - 1) * s + 1, Cin), x.dtype)
        xd = xd.at[:, ::s, ::s, :].set(x)
        return _conv2d(xd, w[::-1, ::-1, :, :], b, 1, KH - 1 - p, slope, act)

    d_max = (KH - 1 - p) // s
    d_lo = (s - 1 + p) // s
    assert d_max == d_lo, "asymmetric tap window unsupported"
    T = d_max + d_lo + 1

    # Combined weight: entry [t, phase] = w[(d_max-t)*s + phase + p] (0 if OOB).
    t_idx = jnp.arange(T)
    ph_idx = jnp.arange(s)
    k_idx = (d_max - t_idx)[:, None] * s + ph_idx[None, :] + p     # (T, s)
    valid = (k_idx >= 0) & (k_idx < KH)
    k_c = jnp.clip(k_idx, 0, KH - 1)
    wg = w[k_c[:, :, None, None], k_c[None, None, :, :], :, :]     # (T,s,T,s,Cin,Cout)
    mask = (valid[:, :, None, None] & valid[None, None, :, :]).astype(w.dtype)
    wg = wg * mask[:, :, :, :, None, None]
    w_comb = jnp.transpose(wg, (0, 2, 4, 1, 3, 5)).reshape(T, T, Cin, s * s * Cout)
    b_comb = jnp.tile(b, s * s)

    y = _conv2d(x, w_comb, b_comb, 1, d_max, slope, act)           # (N,H,W,s*s*Cout)
    y = y.reshape(N, H, W, s, s, Cout)
    y = jnp.transpose(y, (0, 1, 3, 2, 4, 5)).reshape(N, H * s, W * s, Cout)
    return y


def conv_block(x, prm, stride, padding, act=True):
    return _conv2d(x, prm['w'], prm['b'], stride, padding, prm['slope'], act)


def deconv_block(x, prm, stride, padding, act=True):
    return _deconv2d(x, prm['w'], prm['b'], stride, padding, prm['slope'], act)


# ----------------------------------------------------------------------------- #
# D-DBPN building blocks                                                         #
# ----------------------------------------------------------------------------- #
def _upproj(x, p, stride, padding):
    h0 = deconv_block(x, p['deconv1'], stride, padding)
    l0 = conv_block(h0, p['conv1'], stride, padding)
    h1 = deconv_block(l0 - x, p['deconv2'], stride, padding)
    return h0 + h1


def _downproj(x, p, stride, padding):
    l0 = conv_block(x, p['conv1'], stride, padding)
    h0 = deconv_block(l0, p['deconv1'], stride, padding)
    l1 = conv_block(h0 - x, p['conv2'], stride, padding)
    return l0 + l1


def _bp_units(x, up_p, down_p, bp_stages, stride, padding):
    highs, lows = [], []
    H = _upproj(x, up_p[0], stride, padding)
    highs.append(H)
    L = _downproj(H, down_p[0], stride, padding)
    lows.append(L)
    for index in range(bp_stages - 1):
        if index < 1:
            H = _upproj(L, up_p[1], stride, padding)
            highs.append(H)
            L = _downproj(H, down_p[1], stride, padding)
            lows.append(L)
        else:
            h_in = conv_block(jnp.concatenate(lows, axis=-1),
                              up_p[index + 1]['conv'], 1, 0)
            H = _upproj(h_in, up_p[index + 1]['proj'], stride, padding)
            highs.append(H)
            l_in = conv_block(jnp.concatenate(highs, axis=-1),
                              down_p[index + 1]['conv'], 1, 0)
            L = _downproj(l_in, down_p[index + 1]['proj'], stride, padding)
            lows.append(L)
    return jnp.concatenate(highs, axis=-1)


def d_dbpn_forward(x_nchw, params, *, bp_stages, stride, padding):
    x = jnp.transpose(x_nchw, (0, 2, 3, 1))                  # NCHW -> NHWC
    x = conv_block(x, params['fe1'], 1, 1)                   # Conv3x3 + PReLU
    x = conv_block(x, params['fe2'], 1, 0)                   # Conv1x1 + PReLU
    x = _bp_units(x, params['up'], params['down'], bp_stages, stride, padding)
    x = conv_block(x, params['conv_hr'], 1, 1, act=False)    # Conv3x3, no act
    return jnp.transpose(x, (0, 3, 1, 2))                    # NHWC -> NCHW


# ----------------------------------------------------------------------------- #
# Deterministic parameter initialization                                         #
# ----------------------------------------------------------------------------- #
class _KeyGen:
    def __init__(self, key):
        self._key = key

    def __call__(self):
        self._key, sub = jax.random.split(self._key)
        return sub


def _conv_params(kg, kh, kw, cin, cout):
    scale = 1.0 / float(kh * kw * cin) ** 0.5
    return {
        'w': jax.random.normal(kg(), (kh, kw, cin, cout), jnp.float32) * scale,
        'b': jax.random.normal(kg(), (cout,), jnp.float32) * 0.01,
        'slope': jnp.float32(0.25),   # PReLU init (single shared parameter)
    }


def _upproj_params(kg, cin, nf, pf):
    return {'deconv1': _conv_params(kg, pf, pf, cin, nf),
            'conv1': _conv_params(kg, pf, pf, nf, nf),
            'deconv2': _conv_params(kg, pf, pf, nf, nf)}


def _downproj_params(kg, cin, nf, pf):
    return {'conv1': _conv_params(kg, pf, pf, cin, nf),
            'deconv1': _conv_params(kg, pf, pf, nf, nf),
            'conv2': _conv_params(kg, pf, pf, nf, nf)}


def _init_params(key, in_ch, out_ch, nf, bp_stages, pf):
    kg = _KeyGen(key)
    params = {
        'fe1': _conv_params(kg, 3, 3, in_ch, 256),
        'fe2': _conv_params(kg, 1, 1, 256, nf),
        'up': [], 'down': [],
    }
    params['up'].append(_upproj_params(kg, nf, nf, pf))
    params['down'].append(_downproj_params(kg, nf, nf, pf))
    for index in range(bp_stages - 1):
        if index < 1:
            params['up'].append(_upproj_params(kg, nf, nf, pf))
            params['down'].append(_downproj_params(kg, nf, nf, pf))
        else:
            params['up'].append({
                'conv': _conv_params(kg, 1, 1, nf * (index + 1), nf),
                'proj': _upproj_params(kg, nf, nf, pf)})
            params['down'].append({
                'conv': _conv_params(kg, 1, 1, nf * (index + 2), nf),
                'proj': _downproj_params(kg, nf, nf, pf)})
    params['conv_hr'] = _conv_params(kg, 3, 3, nf * bp_stages, out_ch)
    return params


# ----------------------------------------------------------------------------- #
if __name__ == "__main__":
    # Small config: in_channels=4, out_channels=4, num_features=16, bp_stages=3,
    # upscale_factor=4  -> stride=4, padding=2, projection_filter=8.
    in_ch, out_ch, nf, bp_stages = 4, 4, 16, 3
    upscale = 4
    stride, padding, proj_filter = 4, 2, 8

    key = jax.random.PRNGKey(0)
    k_x, k_p = jax.random.split(key)
    x = jax.random.normal(k_x, (2, in_ch, 8, 8), jnp.float32)   # NCHW input
    params = _init_params(k_p, in_ch, out_ch, nf, bp_stages, proj_filter)

    fwd = jax.jit(functools.partial(d_dbpn_forward, bp_stages=bp_stages,
                                    stride=stride, padding=padding))
    y = fwd(x, params)
    y = jax.block_until_ready(y)

    expected = (2, out_ch, 8 * upscale, 8 * upscale)
    assert y.shape == expected, (y.shape, expected)
    assert bool(jnp.all(jnp.isfinite(y)))
    print("KERNEL_OK")
</pallas_src>

<mosaic_0001>
module attributes {stable_mosaic.version = 11 : i64} {
  func.func @_matmul_bias_act_kernel(%arg0: i32, %arg1: i32, %arg2: i32, %arg3: memref<1xf32, #tpu.memory_space<smem>>, %arg4: memref<128x128xbf16, #tpu.memory_space<vmem>>, %arg5: memref<128x128xbf16, #tpu.memory_space<vmem>>, %arg6: memref<1x128xf32, #tpu.memory_space<vmem>>, %arg7: memref<128x128xf32, #tpu.memory_space<vmem>>, %arg8: memref<128x128xf32, #tpu.memory_space<vmem>>) attributes {dimension_semantics = [#tpu.dimension_semantics<parallel>, #tpu.dimension_semantics<parallel>, #tpu.dimension_semantics<arbitrary>], iteration_bounds = array<i64: 1, 2, 1>, scalar_prefetch = 0 : i64, scratch_operands = 1 : i64, tpu.core_type = #tpu.core_type<tc>, window_params = [{transform_indices = @transform_0, window_bounds = array<i64: 1>}, {transform_indices = @transform_1, window_bounds = array<i64: 128, 128>}, {transform_indices = @transform_2, window_bounds = array<i64: 128, 128>}, {transform_indices = @transform_3, window_bounds = array<i64: 1, 128>}, {transform_indices = @transform_4, window_bounds = array<i64: 128, 128>}]} {
    %c0_i32 = arith.constant 0 : i32
    %0 = arith.cmpi eq, %arg2, %c0_i32 : i32
    %1 = arith.extui %0 : i1 to i32
    %c0_i32_0 = arith.constant 0 : i32
    %2 = arith.cmpi ne, %1, %c0_i32_0 : i32
    scf.if %2 {
      %cst_10 = arith.constant 0.000000e+00 : f32
      %12 = vector.broadcast %cst_10 : f32 to vector<128x128xf32>
      %c0_11 = arith.constant 0 : index
      %c0_12 = arith.constant 0 : index
      %13 = vector.load %arg8[%c0_11, %c0_12] : memref<128x128xf32, #tpu.memory_space<vmem>>, vector<128x128xf32>
      tpu.vector_store %arg8[%c0_11, %c0_12], %12 {strides = array<i32>} : memref<128x128xf32, #tpu.memory_space<vmem>>, vector<128x128xf32>,
    } else {
    }
    %c0 = arith.constant 0 : index
    %c0_1 = arith.constant 0 : index
    %3 = vector.load %arg8[%c0, %c0_1] : memref<128x128xf32, #tpu.memory_space<vmem>>, vector<128x128xf32>
    %c0_2 = arith.constant 0 : index
    %c0_3 = arith.constant 0 : index
    %4 = vector.load %arg4[%c0_2, %c0_3] : memref<128x128xbf16, #tpu.memory_space<vmem>>, vector<128x128xbf16>
    %c0_4 = arith.constant 0 : index
    %c0_5 = arith.constant 0 : index
    %5 = vector.load %arg5[%c0_4, %c0_5] : memref<128x128xbf16, #tpu.memory_space<vmem>>, vector<128x128xbf16>
    %cst = arith.constant dense<0.000000e+00> : vector<128x128xf32>
    %6 = tpu.matmul %4, %5, %cst {dimension_numbers = #tpu.dot_dimension_numbers<[1], [0], [0], [1], [0, 0, 1, 1], [], []>} : vector<128x128xbf16>, vector<128x128xbf16>, vector<128x128xf32> -> vector<128x128xf32>
    %7 = arith.addf %3, %6 : vector<128x128xf32>
    %c0_6 = arith.constant 0 : index
    %c0_7 = arith.constant 0 : index
    %8 = vector.load %arg8[%c0_6, %c0_7] : memref<128x128xf32, #tpu.memory_space<vmem>>, vector<128x128xf32>
    tpu.vector_store %arg8[%c0_6, %c0_7], %7 {strides = array<i32>} : memref<128x128xf32, #tpu.memory_space<vmem>>, vector<128x128xf32>,
    %c0_i32_8 = arith.constant 0 : i32
    %9 = arith.cmpi eq, %arg2, %c0_i32_8 : i32
    %10 = arith.extui %9 : i1 to i32
    %c0_i32_9 = arith.constant 0 : i32
    %11 = arith.cmpi ne, %10, %c0_i32_9 : i32
    scf.if %11 {
      %c0_10 = arith.constant 0 : index
      %c0_11 = arith.constant 0 : index
      %12 = vector.load %arg8[%c0_10, %c0_11] : memref<128x128xf32, #tpu.memory_space<vmem>>, vector<128x128xf32>
      %c0_12 = arith.constant 0 : index
      %c0_13 = arith.constant 0 : index
      %13 = vector.load %arg6[%c0_12, %c0_13] : memref<1x128xf32, #tpu.memory_space<vmem>>, vector<1x128xf32>
      %14 = vector.broadcast %13 : vector<1x128xf32> to vector<128x128xf32>
      %15 = arith.addf %12, %14 : vector<128x128xf32>
      %c0_14 = arith.constant 0 : index
      %16 = memref.load %arg3[%c0_14] : memref<1xf32, #tpu.memory_space<smem>>
      %cst_15 = arith.constant 0.000000e+00 : f32
      %17 = vector.broadcast %cst_15 : f32 to vector<128x128xf32>
      %18 = arith.cmpf oge, %15, %17 : vector<128x128xf32>
      %19 = vector.broadcast %16 : f32 to vector<128x128xf32>
      %20 = arith.mulf %19, %15 : vector<128x128xf32>
      %21 = arith.select %18, %15, %20 : vector<128x128xi1>, vector<128x128xf32>
      %c0_16 = arith.constant 0 : index
      %c0_17 = arith.constant 0 : index
      %22 = vector.load %arg7[%c0_16, %c0_17] : memref<128x128xf32, #tpu.memory_space<vmem>>, vector<128x128xf32>
      tpu.vector_store %arg7[%c0_16, %c0_17], %21 {strides = array<i32>} : memref<128x128xf32, #tpu.memory_space<vmem>>, vector<128x128xf32>,
    } else {
    }
    return
  }
  func.func @transform_0(%arg0: i32, %arg1: i32, %arg2: i32) -> i32 {
    %c0_i32 = arith.constant 0 : i32
    %c0_i32_0 = arith.constant 0 : i32
    return %c0_i32 : i32
  }
  func.func @transform_1(%arg0: i32, %arg1: i32, %arg2: i32) -> (i32, i32) {
    %c0_i32 = arith.constant 0 : i32
    return %arg0, %arg2 : i32, i32
  }
  func.func @transform_2(%arg0: i32, %arg1: i32, %arg2: i32) -> (i32, i32) {
    %c0_i32 = arith.constant 0 : i32
    return %arg2, %arg1 : i32, i32
  }
  func.func @transform_3(%arg0: i32, %arg1: i32, %arg2: i32) -> (i32, i32) {
    %c0_i32 = arith.constant 0 : i32
    %c0_i32_0 = arith.constant 0 : i32
    return %c0_i32, %arg1 : i32, i32
  }
  func.func @transform_4(%arg0: i32, %arg1: i32, %arg2: i32) -> (i32, i32) {
    %c0_i32 = arith.constant 0 : i32
    return %arg0, %arg1 : i32, i32
  }
}

module attributes {stable_mosaic.version = 11 : i64} {
  func.func @_matmul_bias_act_kernel(%arg0: i32, %arg1: i32, %arg2: i32, %arg3: memref<1xf32, #tpu.memory_space<smem>>, %arg4: memref<128x256xbf16, #tpu.memory_space<vmem>>, %arg5: memref<256x128xbf16, #tpu.memory_space<vmem>>, %arg6: memref<1x128xf32, #tpu.memory_space<vmem>>, %arg7: memref<128x128xf32, #tpu.memory_space<vmem>>, %arg8: memref<128x128xf32, #tpu.memory_space<vmem>>) attributes {dimension_semantics = [#tpu.dimension_semantics<parallel>, #tpu.dimension_semantics<parallel>, #tpu.dimension_semantics<arbitrary>], iteration_bounds = array<i64: 1, 1, 1>, scalar_prefetch = 0 : i64, scratch_operands = 1 : i64, tpu.core_type = #tpu.core_type<tc>, window_params = [{transform_indices = @transform_0, window_bounds = array<i64: 1>}, {transform_indices = @transform_1, window_bounds = array<i64: 128, 256>}, {transform_indices = @transform_2, window_bounds = array<i64: 256, 128>}, {transform_indices = @transform_3, window_bounds = array<i64: 1, 128>}, {transform_indices = @transform_4, window_bounds = array<i64: 128, 128>}]} {
    %c0_i32 = arith.constant 0 : i32
    %0 = arith.cmpi eq, %arg2, %c0_i32 : i32
    %1 = arith.extui %0 : i1 to i32
    %c0_i32_0 = arith.constant 0 : i32
    %2 = arith.cmpi ne, %1, %c0_i32_0 : i32
    scf.if %2 {
      %cst_10 = arith.constant 0.000000e+00 : f32
      %12 = vector.broadcast %cst_10 : f32 to vector<128x128xf32>
      %c0_11 = arith.constant 0 : index
      %c0_12 = arith.constant 0 : index
      %13 = vector.load %arg8[%c0_11, %c0_12] : memref<128x128xf32, #tpu.memory_space<vmem>>, vector<128x128xf32>
      tpu.vector_store %arg8[%c0_11, %c0_12], %12 {strides = array<i32>} : memref<128x128xf32, #tpu.memory_space<vmem>>, vector<128x128xf32>,
    } else {
    }
    %c0 = arith.constant 0 : index
    %c0_1 = arith.constant 0 : index
    %3 = vector.load %arg8[%c0, %c0_1] : memref<128x128xf32, #tpu.memory_space<vmem>>, vector<128x128xf32>
    %c0_2 = arith.constant 0 : index
    %c0_3 = arith.constant 0 : index
    %4 = vector.load %arg4[%c0_2, %c0_3] : memref<128x256xbf16, #tpu.memory_space<vmem>>, vector<128x256xbf16>
    %c0_4 = arith.constant 0 : index
    %c0_5 = arith.constant 0 : index
    %5 = vector.load %arg5[%c0_4, %c0_5] : memref<256x128xbf16, #tpu.memory_space<vmem>>, vector<256x128xbf16>
    %cst = arith.constant dense<0.000000e+00> : vector<128x128xf32>
    %6 = tpu.matmul %4, %5, %cst {dimension_numbers = #tpu.dot_dimension_numbers<[1], [0], [0], [1], [0, 0, 1, 1], [], []>} : vector<128x256xbf16>, vector<256x128xbf16>, vector<128x128xf32> -> vector<128x128xf32>
    %7 = arith.addf %3, %6 : vector<128x128xf32>
    %c0_6 = arith.constant 0 : index
    %c0_7 = arith.constant 0 : index
    %8 = vector.load %arg8[%c0_6, %c0_7] : memref<128x128xf32, #tpu.memory_space<vmem>>, vector<128x128xf32>
    tpu.vector_store %arg8[%c0_6, %c0_7], %7 {strides = array<i32>} : memref<128x128xf32, #tpu.memory_space<vmem>>, vector<128x128xf32>,
    %c0_i32_8 = arith.constant 0 : i32
    %9 = arith.cmpi eq, %arg2, %c0_i32_8 : i32
    %10 = arith.extui %9 : i1 to i32
    %c0_i32_9 = arith.constant 0 : i32
    %11 = arith.cmpi ne, %10, %c0_i32_9 : i32
    scf.if %11 {
      %c0_10 = arith.constant 0 : index
      %c0_11 = arith.constant 0 : index
      %12 = vector.load %arg8[%c0_10, %c0_11] : memref<128x128xf32, #tpu.memory_space<vmem>>, vector<128x128xf32>
      %c0_12 = arith.constant 0 : index
      %c0_13 = arith.constant 0 : index
      %13 = vector.load %arg6[%c0_12, %c0_13] : memref<1x128xf32, #tpu.memory_space<vmem>>, vector<1x128xf32>
      %14 = vector.broadcast %13 : vector<1x128xf32> to vector<128x128xf32>
      %15 = arith.addf %12, %14 : vector<128x128xf32>
      %c0_14 = arith.constant 0 : index
      %16 = memref.load %arg3[%c0_14] : memref<1xf32, #tpu.memory_space<smem>>
      %cst_15 = arith.constant 0.000000e+00 : f32
      %17 = vector.broadcast %cst_15 : f32 to vector<128x128xf32>
      %18 = arith.cmpf oge, %15, %17 : vector<128x128xf32>
      %19 = vector.broadcast %16 : f32 to vector<128x128xf32>
      %20 = arith.mulf %19, %15 : vector<128x128xf32>
      %21 = arith.select %18, %15, %20 : vector<128x128xi1>, vector<128x128xf32>
      %c0_16 = arith.constant 0 : index
      %c0_17 = arith.constant 0 : index
      %22 = vector.load %arg7[%c0_16, %c0_17] : memref<128x128xf32, #tpu.memory_space<vmem>>, vector<128x128xf32>
      tpu.vector_store %arg7[%c0_16, %c0_17], %21 {strides = array<i32>} : memref<128x128xf32, #tpu.memory_space<vmem>>, vector<128x128xf32>,
    } else {
    }
    return
  }
  func.func @transform_0(%arg0: i32, %arg1: i32, %arg2: i32) -> i32 {
    %c0_i32 = arith.constant 0 : i32
    %c0_i32_0 = arith.constant 0 : i32
    return %c0_i32 : i32
  }
  func.func @transform_1(%arg0: i32, %arg1: i32, %arg2: i32) -> (i32, i32) {
    %c0_i32 = arith.constant 0 : i32
    return %arg0, %arg2 : i32, i32
  }
  func.func @transform_2(%arg0: i32, %arg1: i32, %arg2: i32) -> (i32, i32) {
    %c0_i32 = arith.constant 0 : i32
    return %arg2, %arg1 : i32, i32
  }
  func.func @transform_3(%arg0: i32, %arg1: i32, %arg2: i32) -> (i32, i32) {
    %c0_i32 = arith.constant 0 : i32
    %c0_i32_0 = arith.constant 0 : i32
    return %c0_i32, %arg1 : i32, i32
  }
  func.func @transform_4(%arg0: i32, %arg1: i32, %arg2: i32) -> (i32, i32) {
    %c0_i32 = arith.constant 0 : i32
    return %arg0, %arg1 : i32, i32
  }
}

module attributes {stable_mosaic.version = 11 : i64} {
  func.func @_matmul_bias_act_kernel(%arg0: i32, %arg1: i32, %arg2: i32, %arg3: memref<1xf32, #tpu.memory_space<smem>>, %arg4: memref<128x256xbf16, #tpu.memory_space<vmem>>, %arg5: memref<256x128xbf16, #tpu.memory_space<vmem>>, %arg6: memref<1x128xf32, #tpu.memory_space<vmem>>, %arg7: memref<128x128xf32, #tpu.memory_space<vmem>>, %arg8: memref<128x128xf32, #tpu.memory_space<vmem>>) attributes {dimension_semantics = [#tpu.dimension_semantics<parallel>, #tpu.dimension_semantics<parallel>, #tpu.dimension_semantics<arbitrary>], iteration_bounds = array<i64: 1, 2, 1>, scalar_prefetch = 0 : i64, scratch_operands = 1 : i64, tpu.core_type = #tpu.core_type<tc>, window_params = [{transform_indices = @transform_0, window_bounds = array<i64: 1>}, {transform_indices = @transform_1, window_bounds = array<i64: 128, 256>}, {transform_indices = @transform_2, window_bounds = array<i64: 256, 128>}, {transform_indices = @transform_3, window_bounds = array<i64: 1, 128>}, {transform_indices = @transform_4, window_bounds = array<i64: 128, 128>}]} {
    %c0_i32 = arith.constant 0 : i32
    %0 = arith.cmpi eq, %arg2, %c0_i32 : i32
    %1 = arith.extui %0 : i1 to i32
    %c0_i32_0 = arith.constant 0 : i32
    %2 = arith.cmpi ne, %1, %c0_i32_0 : i32
    scf.if %2 {
      %cst_10 = arith.constant 0.000000e+00 : f32
      %12 = vector.broadcast %cst_10 : f32 to vector<128x128xf32>
      %c0_11 = arith.constant 0 : index
      %c0_12 = arith.constant 0 : index
      %13 = vector.load %arg8[%c0_11, %c0_12] : memref<128x128xf32, #tpu.memory_space<vmem>>, vector<128x128xf32>
      tpu.vector_store %arg8[%c0_11, %c0_12], %12 {strides = array<i32>} : memref<128x128xf32, #tpu.memory_space<vmem>>, vector<128x128xf32>,
    } else {
    }
    %c0 = arith.constant 0 : index
    %c0_1 = arith.constant 0 : index
    %3 = vector.load %arg8[%c0, %c0_1] : memref<128x128xf32, #tpu.memory_space<vmem>>, vector<128x128xf32>
    %c0_2 = arith.constant 0 : index
    %c0_3 = arith.constant 0 : index
    %4 = vector.load %arg4[%c0_2, %c0_3] : memref<128x256xbf16, #tpu.memory_space<vmem>>, vector<128x256xbf16>
    %c0_4 = arith.constant 0 : index
    %c0_5 = arith.constant 0 : index
    %5 = vector.load %arg5[%c0_4, %c0_5] : memref<256x128xbf16, #tpu.memory_space<vmem>>, vector<256x128xbf16>
    %cst = arith.constant dense<0.000000e+00> : vector<128x128xf32>
    %6 = tpu.matmul %4, %5, %cst {dimension_numbers = #tpu.dot_dimension_numbers<[1], [0], [0], [1], [0, 0, 1, 1], [], []>} : vector<128x256xbf16>, vector<256x128xbf16>, vector<128x128xf32> -> vector<128x128xf32>
    %7 = arith.addf %3, %6 : vector<128x128xf32>
    %c0_6 = arith.constant 0 : index
    %c0_7 = arith.constant 0 : index
    %8 = vector.load %arg8[%c0_6, %c0_7] : memref<128x128xf32, #tpu.memory_space<vmem>>, vector<128x128xf32>
    tpu.vector_store %arg8[%c0_6, %c0_7], %7 {strides = array<i32>} : memref<128x128xf32, #tpu.memory_space<vmem>>, vector<128x128xf32>,
    %c0_i32_8 = arith.constant 0 : i32
    %9 = arith.cmpi eq, %arg2, %c0_i32_8 : i32
    %10 = arith.extui %9 : i1 to i32
    %c0_i32_9 = arith.constant 0 : i32
    %11 = arith.cmpi ne, %10, %c0_i32_9 : i32
    scf.if %11 {
      %c0_10 = arith.constant 0 : index
      %c0_11 = arith.constant 0 : index
      %12 = vector.load %arg8[%c0_10, %c0_11] : memref<128x128xf32, #tpu.memory_space<vmem>>, vector<128x128xf32>
      %c0_12 = arith.constant 0 : index
      %c0_13 = arith.constant 0 : index
      %13 = vector.load %arg6[%c0_12, %c0_13] : memref<1x128xf32, #tpu.memory_space<vmem>>, vector<1x128xf32>
      %14 = vector.broadcast %13 : vector<1x128xf32> to vector<128x128xf32>
      %15 = arith.addf %12, %14 : vector<128x128xf32>
      %c0_14 = arith.constant 0 : index
      %16 = memref.load %arg3[%c0_14] : memref<1xf32, #tpu.memory_space<smem>>
      %cst_15 = arith.constant 0.000000e+00 : f32
      %17 = vector.broadcast %cst_15 : f32 to vector<128x128xf32>
      %18 = arith.cmpf oge, %15, %17 : vector<128x128xf32>
      %19 = vector.broadcast %16 : f32 to vector<128x128xf32>
      %20 = arith.mulf %19, %15 : vector<128x128xf32>
      %21 = arith.select %18, %15, %20 : vector<128x128xi1>, vector<128x128xf32>
      %c0_16 = arith.constant 0 : index
      %c0_17 = arith.constant 0 : index
      %22 = vector.load %arg7[%c0_16, %c0_17] : memref<128x128xf32, #tpu.memory_space<vmem>>, vector<128x128xf32>
      tpu.vector_store %arg7[%c0_16, %c0_17], %21 {strides = array<i32>} : memref<128x128xf32, #tpu.memory_space<vmem>>, vector<128x128xf32>,
    } else {
    }
    return
  }
  func.func @transform_0(%arg0: i32, %arg1: i32, %arg2: i32) -> i32 {
    %c0_i32 = arith.constant 0 : i32
    %c0_i32_0 = arith.constant 0 : i32
    return %c0_i32 : i32
  }
  func.func @transform_1(%arg0: i32, %arg1: i32, %arg2: i32) -> (i32, i32) {
    %c0_i32 = arith.constant 0 : i32
    return %arg0, %arg2 : i32, i32
  }
  func.func @transform_2(%arg0: i32, %arg1: i32, %arg2: i32) -> (i32, i32) {
    %c0_i32 = arith.constant 0 : i32
    return %arg2, %arg1 : i32, i32
  }
  func.func @transform_3(%arg0: i32, %arg1: i32, %arg2: i32) -> (i32, i32) {
    %c0_i32 = arith.constant 0 : i32
    %c0_i32_0 = arith.constant 0 : i32
    return %c0_i32, %arg1 : i32, i32
  }
  func.func @transform_4(%arg0: i32, %arg1: i32, %arg2: i32) -> (i32, i32) {
    %c0_i32 = arith.constant 0 : i32
    return %arg0, %arg1 : i32, i32
  }
}

module attributes {stable_mosaic.version = 11 : i64} {
  func.func @_matmul_bias_act_kernel(%arg0: i32, %arg1: i32, %arg2: i32, %arg3: memref<1xf32, #tpu.memory_space<smem>>, %arg4: memref<128x1024xbf16, #tpu.memory_space<vmem>>, %arg5: memref<1024x128xbf16, #tpu.memory_space<vmem>>, %arg6: memref<1x128xf32, #tpu.memory_space<vmem>>, %arg7: memref<128x128xf32, #tpu.memory_space<vmem>>, %arg8: memref<128x128xf32, #tpu.memory_space<vmem>>) attributes {dimension_semantics = [#tpu.dimension_semantics<parallel>, #tpu.dimension_semantics<parallel>, #tpu.dimension_semantics<arbitrary>], iteration_bounds = array<i64: 1, 1, 1>, scalar_prefetch = 0 : i64, scratch_operands = 1 : i64, tpu.core_type = #tpu.core_type<tc>, window_params = [{transform_indices = @transform_0, window_bounds = array<i64: 1>}, {transform_indices = @transform_1, window_bounds = array<i64: 128, 1024>}, {transform_indices = @transform_2, window_bounds = array<i64: 1024, 128>}, {transform_indices = @transform_3, window_bounds = array<i64: 1, 128>}, {transform_indices = @transform_4, window_bounds = array<i64: 128, 128>}]} {
    %c0_i32 = arith.constant 0 : i32
    %0 = arith.cmpi eq, %arg2, %c0_i32 : i32
    %1 = arith.extui %0 : i1 to i32
    %c0_i32_0 = arith.constant 0 : i32
    %2 = arith.cmpi ne, %1, %c0_i32_0 : i32
    scf.if %2 {
      %cst_10 = arith.constant 0.000000e+00 : f32
      %12 = vector.broadcast %cst_10 : f32 to vector<128x128xf32>
      %c0_11 = arith.constant 0 : index
      %c0_12 = arith.constant 0 : index
      %13 = vector.load %arg8[%c0_11, %c0_12] : memref<128x128xf32, #tpu.memory_space<vmem>>, vector<128x128xf32>
      tpu.vector_store %arg8[%c0_11, %c0_12], %12 {strides = array<i32>} : memref<128x128xf32, #tpu.memory_space<vmem>>, vector<128x128xf32>,
    } else {
    }
    %c0 = arith.constant 0 : index
    %c0_1 = arith.constant 0 : index
    %3 = vector.load %arg8[%c0, %c0_1] : memref<128x128xf32, #tpu.memory_space<vmem>>, vector<128x128xf32>
    %c0_2 = arith.constant 0 : index
    %c0_3 = arith.constant 0 : index
    %4 = vector.load %arg4[%c0_2, %c0_3] : memref<128x1024xbf16, #tpu.memory_space<vmem>>, vector<128x1024xbf16>
    %c0_4 = arith.constant 0 : index
    %c0_5 = arith.constant 0 : index
    %5 = vector.load %arg5[%c0_4, %c0_5] : memref<1024x128xbf16, #tpu.memory_space<vmem>>, vector<1024x128xbf16>
    %cst = arith.constant dense<0.000000e+00> : vector<128x128xf32>
    %6 = tpu.matmul %4, %5, %cst {dimension_numbers = #tpu.dot_dimension_numbers<[1], [0], [0], [1], [0, 0, 1, 1], [], []>} : vector<128x1024xbf16>, vector<1024x128xbf16>, vector<128x128xf32> -> vector<128x128xf32>
    %7 = arith.addf %3, %6 : vector<128x128xf32>
    %c0_6 = arith.constant 0 : index
    %c0_7 = arith.constant 0 : index
    %8 = vector.load %arg8[%c0_6, %c0_7] : memref<128x128xf32, #tpu.memory_space<vmem>>, vector<128x128xf32>
    tpu.vector_store %arg8[%c0_6, %c0_7], %7 {strides = array<i32>} : memref<128x128xf32, #tpu.memory_space<vmem>>, vector<128x128xf32>,
    %c0_i32_8 = arith.constant 0 : i32
    %9 = arith.cmpi eq, %arg2, %c0_i32_8 : i32
    %10 = arith.extui %9 : i1 to i32
    %c0_i32_9 = arith.constant 0 : i32
    %11 = arith.cmpi ne, %10, %c0_i32_9 : i32
    scf.if %11 {
      %c0_10 = arith.constant 0 : index
      %c0_11 = arith.constant 0 : index
      %12 = vector.load %arg8[%c0_10, %c0_11] : memref<128x128xf32, #tpu.memory_space<vmem>>, vector<128x128xf32>
      %c0_12 = arith.constant 0 : index
      %c0_13 = arith.constant 0 : index
      %13 = vector.load %arg6[%c0_12, %c0_13] : memref<1x128xf32, #tpu.memory_space<vmem>>, vector<1x128xf32>
      %14 = vector.broadcast %13 : vector<1x128xf32> to vector<128x128xf32>
      %15 = arith.addf %12, %14 : vector<128x128xf32>
      %c0_14 = arith.constant 0 : index
      %16 = memref.load %arg3[%c0_14] : memref<1xf32, #tpu.memory_space<smem>>
      %cst_15 = arith.constant 0.000000e+00 : f32
      %17 = vector.broadcast %cst_15 : f32 to vector<128x128xf32>
      %18 = arith.cmpf oge, %15, %17 : vector<128x128xf32>
      %19 = vector.broadcast %16 : f32 to vector<128x128xf32>
      %20 = arith.mulf %19, %15 : vector<128x128xf32>
      %21 = arith.select %18, %15, %20 : vector<128x128xi1>, vector<128x128xf32>
      %c0_16 = arith.constant 0 : index
      %c0_17 = arith.constant 0 : index
      %22 = vector.load %arg7[%c0_16, %c0_17] : memref<128x128xf32, #tpu.memory_space<vmem>>, vector<128x128xf32>
      tpu.vector_store %arg7[%c0_16, %c0_17], %21 {strides = array<i32>} : memref<128x128xf32, #tpu.memory_space<vmem>>, vector<128x128xf32>,
    } else {
    }
    return
  }
  func.func @transform_0(%arg0: i32, %arg1: i32, %arg2: i32) -> i32 {
    %c0_i32 = arith.constant 0 : i32
    %c0_i32_0 = arith.constant 0 : i32
    return %c0_i32 : i32
  }
  func.func @transform_1(%arg0: i32, %arg1: i32, %arg2: i32) -> (i32, i32) {
    %c0_i32 = arith.constant 0 : i32
    return %arg0, %arg2 : i32, i32
  }
  func.func @transform_2(%arg0: i32, %arg1: i32, %arg2: i32) -> (i32, i32) {
    %c0_i32 = arith.constant 0 : i32
    return %arg2, %arg1 : i32, i32
  }
  func.func @transform_3(%arg0: i32, %arg1: i32, %arg2: i32) -> (i32, i32) {
    %c0_i32 = arith.constant 0 : i32
    %c0_i32_0 = arith.constant 0 : i32
    return %c0_i32, %arg1 : i32, i32
  }
  func.func @transform_4(%arg0: i32, %arg1: i32, %arg2: i32) -> (i32, i32) {
    %c0_i32 = arith.constant 0 : i32
    return %arg0, %arg1 : i32, i32
  }
}

module attributes {stable_mosaic.version = 11 : i64} {
  func.func @_matmul_bias_act_kernel(%arg0: i32, %arg1: i32, %arg2: i32, %arg3: memref<1xf32, #tpu.memory_space<smem>>, %arg4: memref<128x128xbf16, #tpu.memory_space<vmem>>, %arg5: memref<128x128xbf16, #tpu.memory_space<vmem>>, %arg6: memref<1x128xf32, #tpu.memory_space<vmem>>, %arg7: memref<128x128xf32, #tpu.memory_space<vmem>>, %arg8: memref<128x128xf32, #tpu.memory_space<vmem>>) attributes {dimension_semantics = [#tpu.dimension_semantics<parallel>, #tpu.dimension_semantics<parallel>, #tpu.dimension_semantics<arbitrary>], iteration_bounds = array<i64: 1, 1, 1>, scalar_prefetch = 0 : i64, scratch_operands = 1 : i64, tpu.core_type = #tpu.core_type<tc>, window_params = [{transform_indices = @transform_0, window_bounds = array<i64: 1>}, {transform_indices = @transform_1, window_bounds = array<i64: 128, 128>}, {transform_indices = @transform_2, window_bounds = array<i64: 128, 128>}, {transform_indices = @transform_3, window_bounds = array<i64: 1, 128>}, {transform_indices = @transform_4, window_bounds = array<i64: 128, 128>}]} {
    %c0_i32 = arith.constant 0 : i32
    %0 = arith.cmpi eq, %arg2, %c0_i32 : i32
    %1 = arith.extui %0 : i1 to i32
    %c0_i32_0 = arith.constant 0 : i32
    %2 = arith.cmpi ne, %1, %c0_i32_0 : i32
    scf.if %2 {
      %cst_10 = arith.constant 0.000000e+00 : f32
      %12 = vector.broadcast %cst_10 : f32 to vector<128x128xf32>
      %c0_11 = arith.constant 0 : index
      %c0_12 = arith.constant 0 : index
      %13 = vector.load %arg8[%c0_11, %c0_12] : memref<128x128xf32, #tpu.memory_space<vmem>>, vector<128x128xf32>
      tpu.vector_store %arg8[%c0_11, %c0_12], %12 {strides = array<i32>} : memref<128x128xf32, #tpu.memory_space<vmem>>, vector<128x128xf32>,
    } else {
    }
    %c0 = arith.constant 0 : index
    %c0_1 = arith.constant 0 : index
    %3 = vector.load %arg8[%c0, %c0_1] : memref<128x128xf32, #tpu.memory_space<vmem>>, vector<128x128xf32>
    %c0_2 = arith.constant 0 : index
    %c0_3 = arith.constant 0 : index
    %4 = vector.load %arg4[%c0_2, %c0_3] : memref<128x128xbf16, #tpu.memory_space<vmem>>, vector<128x128xbf16>
    %c0_4 = arith.constant 0 : index
    %c0_5 = arith.constant 0 : index
    %5 = vector.load %arg5[%c0_4, %c0_5] : memref<128x128xbf16, #tpu.memory_space<vmem>>, vector<128x128xbf16>
    %cst = arith.constant dense<0.000000e+00> : vector<128x128xf32>
    %6 = tpu.matmul %4, %5, %cst {dimension_numbers = #tpu.dot_dimension_numbers<[1], [0], [0], [1], [0, 0, 1, 1], [], []>} : vector<128x128xbf16>, vector<128x128xbf16>, vector<128x128xf32> -> vector<128x128xf32>
    %7 = arith.addf %3, %6 : vector<128x128xf32>
    %c0_6 = arith.constant 0 : index
    %c0_7 = arith.constant 0 : index
    %8 = vector.load %arg8[%c0_6, %c0_7] : memref<128x128xf32, #tpu.memory_space<vmem>>, vector<128x128xf32>
    tpu.vector_store %arg8[%c0_6, %c0_7], %7 {strides = array<i32>} : memref<128x128xf32, #tpu.memory_space<vmem>>, vector<128x128xf32>,
    %c0_i32_8 = arith.constant 0 : i32
    %9 = arith.cmpi eq, %arg2, %c0_i32_8 : i32
    %10 = arith.extui %9 : i1 to i32
    %c0_i32_9 = arith.constant 0 : i32
    %11 = arith.cmpi ne, %10, %c0_i32_9 : i32
    scf.if %11 {
      %c0_10 = arith.constant 0 : index
      %c0_11 = arith.constant 0 : index
      %12 = vector.load %arg8[%c0_10, %c0_11] : memref<128x128xf32, #tpu.memory_space<vmem>>, vector<128x128xf32>
      %c0_12 = arith.constant 0 : index
      %c0_13 = arith.constant 0 : index
      %13 = vector.load %arg6[%c0_12, %c0_13] : memref<1x128xf32, #tpu.memory_space<vmem>>, vector<1x128xf32>
      %14 = vector.broadcast %13 : vector<1x128xf32> to vector<128x128xf32>
      %15 = arith.addf %12, %14 : vector<128x128xf32>
      %c0_14 = arith.constant 0 : index
      %16 = memref.load %arg3[%c0_14] : memref<1xf32, #tpu.memory_space<smem>>
      %cst_15 = arith.constant 0.000000e+00 : f32
      %17 = vector.broadcast %cst_15 : f32 to vector<128x128xf32>
      %18 = arith.cmpf oge, %15, %17 : vector<128x128xf32>
      %19 = vector.broadcast %16 : f32 to vector<128x128xf32>
      %20 = arith.mulf %19, %15 : vector<128x128xf32>
      %21 = arith.select %18, %15, %20 : vector<128x128xi1>, vector<128x128xf32>
      %c0_16 = arith.constant 0 : index
      %c0_17 = arith.constant 0 : index
      %22 = vector.load %arg7[%c0_16, %c0_17] : memref<128x128xf32, #tpu.memory_space<vmem>>, vector<128x128xf32>
      tpu.vector_store %arg7[%c0_16, %c0_17], %21 {strides = array<i32>} : memref<128x128xf32, #tpu.memory_space<vmem>>, vector<128x128xf32>,
    } else {
    }
    return
  }
  func.func @transform_0(%arg0: i32, %arg1: i32, %arg2: i32) -> i32 {
    %c0_i32 = arith.constant 0 : i32
    %c0_i32_0 = arith.constant 0 : i32
    return %c0_i32 : i32
  }
  func.func @transform_1(%arg0: i32, %arg1: i32, %arg2: i32) -> (i32, i32) {
    %c0_i32 = arith.constant 0 : i32
    return %arg0, %arg2 : i32, i32
  }
  func.func @transform_2(%arg0: i32, %arg1: i32, %arg2: i32) -> (i32, i32) {
    %c0_i32 = arith.constant 0 : i32
    return %arg2, %arg1 : i32, i32
  }
  func.func @transform_3(%arg0: i32, %arg1: i32, %arg2: i32) -> (i32, i32) {
    %c0_i32 = arith.constant 0 : i32
    %c0_i32_0 = arith.constant 0 : i32
    return %c0_i32, %arg1 : i32, i32
  }
  func.func @transform_4(%arg0: i32, %arg1: i32, %arg2: i32) -> (i32, i32) {
    %c0_i32 = arith.constant 0 : i32
    return %arg0, %arg1 : i32, i32
  }
}

module attributes {stable_mosaic.version = 11 : i64} {
  func.func @_matmul_bias_act_kernel(%arg0: i32, %arg1: i32, %arg2: i32, %arg3: memref<1xf32, #tpu.memory_space<smem>>, %arg4: memref<512x512xbf16, #tpu.memory_space<vmem>>, %arg5: memref<512x128xbf16, #tpu.memory_space<vmem>>, %arg6: memref<1x128xf32, #tpu.memory_space<vmem>>, %arg7: memref<512x128xf32, #tpu.memory_space<vmem>>, %arg8: memref<512x128xf32, #tpu.memory_space<vmem>>) attributes {dimension_semantics = [#tpu.dimension_semantics<parallel>, #tpu.dimension_semantics<parallel>, #tpu.dimension_semantics<arbitrary>], iteration_bounds = array<i64: 4, 1, 1>, scalar_prefetch = 0 : i64, scratch_operands = 1 : i64, tpu.core_type = #tpu.core_type<tc>, window_params = [{transform_indices = @transform_0, window_bounds = array<i64: 1>}, {transform_indices = @transform_1, window_bounds = array<i64: 512, 512>}, {transform_indices = @transform_2, window_bounds = array<i64: 512, 128>}, {transform_indices = @transform_3, window_bounds = array<i64: 1, 128>}, {transform_indices = @transform_4, window_bounds = array<i64: 512, 128>}]} {
    %c0_i32 = arith.constant 0 : i32
    %0 = arith.cmpi eq, %arg2, %c0_i32 : i32
    %1 = arith.extui %0 : i1 to i32
    %c0_i32_0 = arith.constant 0 : i32
    %2 = arith.cmpi ne, %1, %c0_i32_0 : i32
    scf.if %2 {
      %cst_10 = arith.constant 0.000000e+00 : f32
      %12 = vector.broadcast %cst_10 : f32 to vector<512x128xf32>
      %c0_11 = arith.constant 0 : index
      %c0_12 = arith.constant 0 : index
      %13 = vector.load %arg8[%c0_11, %c0_12] : memref<512x128xf32, #tpu.memory_space<vmem>>, vector<512x128xf32>
      tpu.vector_store %arg8[%c0_11, %c0_12], %12 {strides = array<i32>} : memref<512x128xf32, #tpu.memory_space<vmem>>, vector<512x128xf32>,
    } else {
    }
    %c0 = arith.constant 0 : index
    %c0_1 = arith.constant 0 : index
    %3 = vector.load %arg8[%c0, %c0_1] : memref<512x128xf32, #tpu.memory_space<vmem>>, vector<512x128xf32>
    %c0_2 = arith.constant 0 : index
    %c0_3 = arith.constant 0 : index
    %4 = vector.load %arg4[%c0_2, %c0_3] : memref<512x512xbf16, #tpu.memory_space<vmem>>, vector<512x512xbf16>
    %c0_4 = arith.constant 0 : index
    %c0_5 = arith.constant 0 : index
    %5 = vector.load %arg5[%c0_4, %c0_5] : memref<512x128xbf16, #tpu.memory_space<vmem>>, vector<512x128xbf16>
    %cst = arith.constant dense<0.000000e+00> : vector<512x128xf32>
    %6 = tpu.matmul %4, %5, %cst {dimension_numbers = #tpu.dot_dimension_numbers<[1], [0], [0], [1], [0, 0, 1, 1], [], []>} : vector<512x512xbf16>, vector<512x128xbf16>, vector<512x128xf32> -> vector<512x128xf32>
    %7 = arith.addf %3, %6 : vector<512x128xf32>
    %c0_6 = arith.constant 0 : index
    %c0_7 = arith.constant 0 : index
    %8 = vector.load %arg8[%c0_6, %c0_7] : memref<512x128xf32, #tpu.memory_space<vmem>>, vector<512x128xf32>
    tpu.vector_store %arg8[%c0_6, %c0_7], %7 {strides = array<i32>} : memref<512x128xf32, #tpu.memory_space<vmem>>, vector<512x128xf32>,
    %c0_i32_8 = arith.constant 0 : i32
    %9 = arith.cmpi eq, %arg2, %c0_i32_8 : i32
    %10 = arith.extui %9 : i1 to i32
    %c0_i32_9 = arith.constant 0 : i32
    %11 = arith.cmpi ne, %10, %c0_i32_9 : i32
    scf.if %11 {
      %c0_10 = arith.constant 0 : index
      %c0_11 = arith.constant 0 : index
      %12 = vector.load %arg8[%c0_10, %c0_11] : memref<512x128xf32, #tpu.memory_space<vmem>>, vector<512x128xf32>
      %c0_12 = arith.constant 0 : index
      %c0_13 = arith.constant 0 : index
      %13 = vector.load %arg6[%c0_12, %c0_13] : memref<1x128xf32, #tpu.memory_space<vmem>>, vector<1x128xf32>
      %14 = vector.broadcast %13 : vector<1x128xf32> to vector<512x128xf32>
      %15 = arith.addf %12, %14 : vector<512x128xf32>
      %c0_14 = arith.constant 0 : index
      %c0_15 = arith.constant 0 : index
      %16 = vector.load %arg7[%c0_14, %c0_15] : memref<512x128xf32, #tpu.memory_space<vmem>>, vector<512x128xf32>
      tpu.vector_store %arg7[%c0_14, %c0_15], %15 {strides = array<i32>} : memref<512x128xf32, #tpu.memory_space<vmem>>, vector<512x128xf32>,
    } else {
    }
    return
  }
  func.func @transform_0(%arg0: i32, %arg1: i32, %arg2: i32) -> i32 {
    %c0_i32 = arith.constant 0 : i32
    %c0_i32_0 = arith.constant 0 : i32
    return %c0_i32 : i32
  }
  func.func @transform_1(%arg0: i32, %arg1: i32, %arg2: i32) -> (i32, i32) {
    %c0_i32 = arith.constant 0 : i32
    return %arg0, %arg2 : i32, i32
  }
  func.func @transform_2(%arg0: i32, %arg1: i32, %arg2: i32) -> (i32, i32) {
    %c0_i32 = arith.constant 0 : i32
    return %arg2, %arg1 : i32, i32
  }
  func.func @transform_3(%arg0: i32, %arg1: i32, %arg2: i32) -> (i32, i32) {
    %c0_i32 = arith.constant 0 : i32
    %c0_i32_0 = arith.constant 0 : i32
    return %c0_i32, %arg1 : i32, i32
  }
  func.func @transform_4(%arg0: i32, %arg1: i32, %arg2: i32) -> (i32, i32) {
    %c0_i32 = arith.constant 0 : i32
    return %arg0, %arg1 : i32, i32
  }
}

</mosaic_0001>

<bundles_post_ra>
// kernel: d_dbpn_forward.19
= control target key start
LH: loop header
LB: loop body
LE: loop exit
PB: predicated region body
PF: predicated region fallthrough
CT: control target
= control target key end

     0   :  { %s1399_s0 = inlined_call_operand.<no memory space> [shape: f32[1], index: 0, kind: input, shape index: {}]   ;;  %s1400_s1 = inlined_call_operand.vmem [shape: bf16[128,128], index: 1, kind: input, shape index: {}]   ;;  %s1401_s2 = inlined_call_operand.vmem [shape: bf16[128,256], index: 2, kind: input, shape index: {}]   ;;  %s1402_s3 = inlined_call_operand.vmem [shape: f32[1,256], index: 3, kind: input, shape index: {}]   ;;  %s1403_s4 = inlined_call_operand.vmem [shape: f32[128,256], index: 4, kind: output, shape index: {}]  }
   0x1   :  { %9 = sst [smem:[#allocation3]] %s1399_s0 }
   0x2   :  { %s1196_s17 = smov 0   ;;  %s1198_s18 = smov 0  }
   0x3   :  { %s1200_s19 = smov 0   ;;  %s1202_s20 = smov 0  }
   0x4   :  { %s1204_s21 = smov 0  }
   0x5 LB: > { %s30_s0 = sadd.s32 1, %s1162_s20  ;;  %s977_s22 = sadd.s32 4294967295, %s1166_s21   ;;  %s1166_s21 = sphi %s1204_s21, %s15_s21   ;;  %s1162_s20 = sphi %s1202_s20, %s1408_s20   ;;  %s1158_s19 = sphi %s1200_s19, %s1407_s19   ;;  %s1154_s18 = sphi %s1198_s18, %s1406_s18   ;;  %s1150_s17 = sphi %s1196_s17, %s1405_s17  }
   0x6   : > { %p32_p0 = scmp.ge.s32.totalorder %s30_s0, 2  ;;  %p99_p1 = scmp.ne.s32.totalorder %s1154_s18, %s1150_s17 }
   0x7   : > { %p100_p2 = scmp.eq.s32.totalorder %s1166_s21, 0  ;;  %p157_p4 = scmp.eq.s32.totalorder %s977_s22, 1 }
   0x8   : > { %s1410_s0 = smov (%p32_p0, %s30_s0), 0  ;;  %s92_s24 = sadd.s32 1, %s1154_s18 }
   0x9   : > { %p101_p3 = por %p100_p2, %p99_p1  ;;  %s88_s23 = ssub.s32 %s1162_s20, %s1410_s0 }
   0xa   : > { %p90_p5 = scmp.eq.s32.totalorder %s88_s23, 0  ;;  %p1231_p6 = por %p157_p4, %p99_p1 }
   0xb   : > { %p981_p7 = scmp.ge.s32.totalorder %s1166_s21, 2 }
   0xc   : > { %s1236_s26 = scalar_select %p90_p5, %s1154_s18, %s92_s24  }
   0xd   : > { %194 = sbr.rel (%p981_p7) target bundleno = 32 (0x20), region = 24 }
  0x12   : > { %197 = sbr.rel (!%p101_p3) target bundleno = 32 (0x20), region = 28  ;;  %s199_s27 = sand.u32 (%p101_p3), 1, %s1154_s18  }
  0x13   : > { %s983_s28 = sshll.u32 (%p101_p3), %s1162_s20, 2  ;;  %s982_s29 = sshll.u32 (%p101_p3), %s199_s27, 6 }
  0x14   : > { %s1244_s6 = scalar_lea.vmem (%p101_p3), %s1401_s2, %s983_s28  ;;  %s201_s7 = scalar_lea.vmem (%p101_p3), [#allocation4], %s982_s29 }
  0x15   : > { %v223_v0 = vld [vmem:[%s1244_s6] sm:$0xf] (%p101_p3)  ;;  %v225_v1 = vld [vmem:[%s1244_s6 + $0x8] sm:$0xf] (%p101_p3)  ;;  %v227_v2 = vld [vmem:[%s1244_s6 + $0x10] sm:$0xf] (%p101_p3) }
  0x16   : > { %224 = vst [vmem:[%s201_s7] sm:$0xf] (%p101_p3), %v223_v0  ;;  %226 = vst [vmem:[%s201_s7 + $0x4] sm:$0xf] (%p101_p3), %v225_v1  ;;  %v229_v3 = vld [vmem:[%s1244_s6 + $0x18] sm:$0xf] (%p101_p3) }
  0x17   : > { %v231_v4 = vld [vmem:[%s1244_s6 + $0x20] sm:$0xf]  ;;  %228 = vst [vmem:[%s201_s7 + $0x8] sm:$0xf] %v227_v2  ;;  %230 = vst [vmem:[%s201_s7 + $0xc] sm:$0xf] %v229_v3 }
  0x18   : > { %232 = vst [vmem:[%s201_s7 + $0x10] sm:$0xf] %v231_v4  ;;  %v233_v5 = vld [vmem:[%s1244_s6 + $0x28] sm:$0xf]  ;;  %v235_v6 = vld [vmem:[%s1244_s6 + $0x30] sm:$0xf] }
  0x19   : > { %v237_v7 = vld [vmem:[%s1244_s6 + $0x38] sm:$0xf]  ;;  %234 = vst [vmem:[%s201_s7 + $0x14] sm:$0xf] %v233_v5  ;;  %236 = vst [vmem:[%s201_s7 + $0x18] sm:$0xf] %v235_v6 }
  0x1a   : > { %238 = vst [vmem:[%s201_s7 + $0x1c] sm:$0xf] %v237_v7  ;;  %v239_v8 = vld [vmem:[%s1244_s6 + $0x40] sm:$0xf]  ;;  %v241_v9 = vld [vmem:[%s1244_s6 + $0x48] sm:$0xf] }
  0x1b   : > { %v243_v10 = vld [vmem:[%s1244_s6 + $0x50] sm:$0xf]  ;;  %240 = vst [vmem:[%s201_s7 + $0x20] sm:$0xf] %v239_v8  ;;  %242 = vst [vmem:[%s201_s7 + $0x24] sm:$0xf] %v241_v9 }
  0x1c   : > { %244 = vst [vmem:[%s201_s7 + $0x28] sm:$0xf] %v243_v10  ;;  %v245_v11 = vld [vmem:[%s1244_s6 + $0x58] sm:$0xf]  ;;  %v247_v12 = vld [vmem:[%s1244_s6 + $0x60] sm:$0xf] }
  0x1d   : > { %v249_v13 = vld [vmem:[%s1244_s6 + $0x68] sm:$0xf]  ;;  %246 = vst [vmem:[%s201_s7 + $0x2c] sm:$0xf] %v245_v11  ;;  %248 = vst [vmem:[%s201_s7 + $0x30] sm:$0xf] %v247_v12 }
  0x1e   : > { %250 = vst [vmem:[%s201_s7 + $0x34] sm:$0xf] %v249_v13  ;;  %v251_v14 = vld [vmem:[%s1244_s6 + $0x70] sm:$0xf]  ;;  %v253_v15 = vld [vmem:[%s1244_s6 + $0x78] sm:$0xf] }
  0x1f   : > { %252 = vst [vmem:[%s201_s7 + $0x38] sm:$0xf] %v251_v14  ;;  %254 = vst [vmem:[%s201_s7 + $0x3c] sm:$0xf] %v253_v15 }
  0x20 PF: > { %p984_p8 = scmp.ge.s32.totalorder %s1166_s21, 1  ;;  %p315_p9 = scmp.lt.s32.totalorder %s1166_s21, 3 }
  0x22   : > { %p316_p10 = pnand %p984_p8, %p315_p9 }
  0x23   : > { %s322_s8 = sand.u32 (!%p316_p10), 1, %s1150_s17   ;;  %p367_p11 = scmp.lt.s32.totalorder (!%p316_p10), %s1158_s19, 1 }
  0x24   : > { %319 = sbr.rel (%p316_p10) target bundleno = 298 (0x12a), region = 73  ;;  %s985_s11 = sshll.u32 (!%p316_p10), %s322_s8, 6 }
  0x25   : > { %s1273_s14 = scalar_lea.vmem (!%p316_p10), [#allocation4], %s985_s11  ;;  %s707_s10 = sld [smem:[#allocation3]] (!%p316_p10) }
  0x29   : > { %v1120_v16 = vld [vmem:[%s1400_s1] sm:$0xff]   ;;  %v1112_v18 = vld [vmem:[%s1273_s14 + $0x38] sm:$0xff]   ;;  %v1113_v19 = vld [vmem:[%s1273_s14 + $0x30] sm:$0xff]   ;;  %s368_s9 = scalar_select %p367_p11, %s1158_s19, 1 }
  0x2a   : > { %v1121_v17 = vld [vmem:[%s1400_s1 + $0x20] sm:$0xff]   ;;  %1040 = vmatprep.mubr.bf16.mxu0 %v1120_v16  ;;  %1024 = vmatprep.subr.bf16.mxu0 %v1112_v18  ;;  %v1114_v20 = vld [vmem:[%s1273_s14 + $0x28] sm:$0xff]   ;;  %v1116_v22 = vld [vmem:[%s1273_s14 + $0x18] sm:$0xff]  }
  0x2b   : > { %1048 = vmatprep.mubr.bf16.mxu1 %v1121_v17  ;;  %1056 = vmatprep.subr.bf16.mxu1 %v1112_v18  ;;  %v1115_v21 = vld [vmem:[%s1273_s14 + $0x20] sm:$0xff]   ;;  %v1117_v23 = vld [vmem:[%s1273_s14 + $0x10] sm:$0xff]   ;;  %v1118_v24 = vld [vmem:[%s1273_s14 + $0x8] sm:$0xff]   ;;  %s369_s13 = scalar_lea.vmem %s1402_s3, %s368_s9  ;;  %v1310_v34 = vstv %s707_s10 }
  0x2c   : > { %1025 = vmatpush3.bf16.msra.mxu0 %v1112_v18  ;;  %1064 = vmatpush3.bf16.msra.mxu1 %v1112_v18  ;;  %v1119_v25 = vld [vmem:[%s1273_s14] sm:$0xff]   ;;  %v1122_v26 = vld [vmem:[%s1400_s1 + $0x8] sm:$0xff]   ;;  %v1124_v28 = vld [vmem:[%s1400_s1 + $0x10] sm:$0xff]   ;;  %s986_s14 = sshll.u32 %s322_s8, 7  ;;  %s1005_s8 = sshll.u32 (%p1231_p6), %s1158_s19, 3 }
  0x2d   : > { %1026 = vmatprep.subr.bf16.mxu0 %v1113_v19  ;;  %1057 = vmatprep.subr.bf16.mxu1 %v1113_v19  ;;  %v1123_v27 = vld [vmem:[%s1400_s1 + $0x28] sm:$0xff]   ;;  %v1125_v29 = vld [vmem:[%s1400_s1 + $0x30] sm:$0xff]   ;;  %v1126_v30 = vld [vmem:[%s1400_s1 + $0x18] sm:$0xff]   ;;  %s1320_s17 = scalar_lea.vmem [#allocation5], %s986_s14  ;;  %s784_s22 = scalar_lea.vmem (%p1231_p6), %s1403_s4, %s1005_s8 }
  0x2e   : > { %v1127_v31 = vld [vmem:[%s1400_s1 + $0x38] sm:$0xff]   ;;  %v1306_v32 = vld [vmem:[%s369_s13] ss:$0 sm:$0xff] }
  0x30   : > { %1027 = vmatpush3.bf16.msra.mxu0 %v1113_v19  ;;  %1065 = vmatpush3.bf16.msra.mxu1 %v1113_v19 }
  0x31   : > { %1028 = vmatprep.subr.bf16.mxu0 %v1114_v20  ;;  %1058 = vmatprep.subr.bf16.mxu1 %v1114_v20 }
  0x34   : > { %1029 = vmatpush3.bf16.msra.mxu0 %v1114_v20  ;;  %1066 = vmatpush3.bf16.msra.mxu1 %v1114_v20 }
  0x35   : > { %1030 = vmatprep.subr.bf16.mxu0 %v1115_v21  ;;  %1059 = vmatprep.subr.bf16.mxu1 %v1115_v21 }
  0x38   : > { %1031 = vmatpush3.bf16.msra.mxu0 %v1115_v21  ;;  %1067 = vmatpush3.bf16.msra.mxu1 %v1115_v21 }
  0x39   : > { %1032 = vmatprep.subr.bf16.mxu0 %v1116_v22  ;;  %1060 = vmatprep.subr.bf16.mxu1 %v1116_v22 }
  0x3c   : > { %1033 = vmatpush3.bf16.msra.mxu0 %v1116_v22  ;;  %1068 = vmatpush3.bf16.msra.mxu1 %v1116_v22 }
  0x3d   : > { %1034 = vmatprep.subr.bf16.mxu0 %v1117_v23  ;;  %1061 = vmatprep.subr.bf16.mxu1 %v1117_v23 }
  0x40   : > { %1035 = vmatpush3.bf16.msra.mxu0 %v1117_v23  ;;  %1069 = vmatpush3.bf16.msra.mxu1 %v1117_v23 }
  0x41   : > { %1036 = vmatprep.subr.bf16.mxu0 %v1118_v24  ;;  %1062 = vmatprep.subr.bf16.mxu1 %v1118_v24 }
  0x44   : > { %1037 = vmatpush3.bf16.msra.mxu0 %v1118_v24  ;;  %1070 = vmatpush3.bf16.msra.mxu1 %v1118_v24 }
  0x45   : > { %1038 = vmatprep.subr.bf16.mxu0 %v1119_v25  ;;  %1063 = vmatprep.subr.bf16.mxu1 %v1119_v25 }
  0x48   : > { %1039 = vmatpush3.bf16.msra.mxu0 %v1119_v25  ;;  %1071 = vmatpush3.bf16.msra.mxu1 %v1119_v25 }
  0x4b   : > { %1041 = vmatmul.mubr.bf16.vlgmr.msra.gmra.mxu0 %v1122_v26  ;;  %1049 = vmatmul.mubr.bf16.vlgmr.msra.gmra.mxu1 %v1123_v27 }
  0x4c   : > { %1044 = vmatprep.mubr.bf16.mxu0 %v1124_v28  ;;  %1052 = vmatprep.mubr.bf16.mxu1 %v1125_v29 }
  0x53   : > { %1045 = vmatmul.mubr.bf16.gmra.mxu0 %v1126_v30  ;;  %1053 = vmatmul.mubr.bf16.gmra.mxu1 %v1127_v31 }
 0x10b   : > { %v1042_v33 = vpop.f32.mrf.mxu0  ;;  %v1050_v35 = vpop.f32.mrf.mxu1 }
 0x10c   : > { %v693_v36 = vadd.f32 %v1042_v33, %v1306_v32  ;;  %v701_v37 = vadd.f32 %v1050_v35, %v1306_v32 }
 0x10d   : > { %v570_v38 = vpop.f32.mrf.mxu0  ;;  %v602_v39 = vpop.f32.mrf.mxu1 }
 0x10e   : > { %vm710_vm0 = vcmp.ge.f32.partialorder %v693_v36, 0.0  ;;  %v727_v40 = vmul.f32 %v1310_v34, %v693_v36  ;;  %vm718_vm1 = vcmp.ge.f32.partialorder %v701_v37, 0.0  ;;  %v735_v41 = vmul.f32 %v1310_v34, %v701_v37 }
 0x10f   : > { %v691_v42 = vadd.f32 %v1306_v32, %v570_v38  ;;  %v699_v43 = vadd.f32 %v1306_v32, %v602_v39  ;;  %v1043_v44 = vpop.f32.mrf.mxu0  ;;  %v1051_v45 = vpop.f32.mrf.mxu1 }
 0x110   : > { %v743_v46 = vsel %vm710_vm0, %v693_v36, %v727_v40  ;;  %v751_v47 = vsel %vm718_vm1, %v701_v37, %v735_v41  ;;  %v694_v48 = vadd.f32 %v1043_v44, %v1306_v32  ;;  %v702_v49 = vadd.f32 %v1051_v45, %v1306_v32 }
 0x111   : > { %759 = vst [vmem:[%s1320_s17 + $0x10] sm:$0xff] %v743_v46  ;;  %767 = vst [vmem:[%s1320_s17 + $0x50] sm:$0xff] %v751_v47  ;;  %vm708_vm2 = vcmp.ge.f32.partialorder %v691_v42, 0.0  ;;  %v725_v50 = vmul.f32 %v1310_v34, %v691_v42  ;;  %vm716_vm3 = vcmp.ge.f32.partialorder %v699_v43, 0.0  ;;  %v733_v51 = vmul.f32 %v1310_v34, %v699_v43  ;;  %v573_v52 = vpop.f32.mrf.mxu0  ;;  %v605_v53 = vpop.f32.mrf.mxu1 }
 0x112   : > { %vm711_vm4 = vcmp.ge.f32.partialorder %v694_v48, 0.0  ;;  %v728_v54 = vmul.f32 %v1310_v34, %v694_v48  ;;  %vm719_vm5 = vcmp.ge.f32.partialorder %v702_v49, 0.0  ;;  %v736_v55 = vmul.f32 %v1310_v34, %v702_v49 }
 0x113   : > { %v741_v56 = vsel %vm708_vm2, %v691_v42, %v725_v50  ;;  %v749_v57 = vsel %vm716_vm3, %v699_v43, %v733_v51  ;;  %v692_v58 = vadd.f32 %v1306_v32, %v573_v52  ;;  %v700_v59 = vadd.f32 %v1306_v32, %v605_v53  ;;  %v1046_v60 = vpop.f32.mrf.mxu0  ;;  %v1054_v61 = vpop.f32.mrf.mxu1 }
 0x114   : > { %757 = vst [vmem:[%s1320_s17] sm:$0xff] %v741_v56  ;;  %765 = vst [vmem:[%s1320_s17 + $0x40] sm:$0xff] %v749_v57  ;;  %v744_v62 = vsel %vm711_vm4, %v694_v48, %v728_v54  ;;  %v752_v63 = vsel %vm719_vm5, %v702_v49, %v736_v55  ;;  %v697_v0 = vadd.f32 %v1046_v60, %v1306_v32 }
 0x115   : > { %v705_v1 = vadd.f32 %v1054_v61, %v1306_v32  ;;  %760 = vst [vmem:[%s1320_s17 + $0x18] sm:$0xff] %v744_v62  ;;  %768 = vst [vmem:[%s1320_s17 + $0x58] sm:$0xff] %v752_v63  ;;  %vm709_vm6 = vcmp.ge.f32.partialorder %v692_v58, 0.0  ;;  %v726_v2 = vmul.f32 %v1310_v34, %v692_v58  ;;  %vm717_vm7 = vcmp.ge.f32.partialorder %v700_v59, 0.0  ;;  %v586_v4 = vpop.f32.mrf.mxu0  ;;  %v618_v5 = vpop.f32.mrf.mxu1 }
 0x116   : > { %v734_v3 = vmul.f32 %v1310_v34, %v700_v59  ;;  %vm714_vm8 = vcmp.ge.f32.partialorder %v697_v0, 0.0  ;;  %v731_v6 = vmul.f32 %v1310_v34, %v697_v0  ;;  %v695_v10 = vadd.f32 %v1306_v32, %v586_v4 }
 0x117   : > { %vm722_vm9 = vcmp.ge.f32.partialorder %v705_v1, 0.0  ;;  %v739_v7 = vmul.f32 %v1310_v34, %v705_v1  ;;  %v742_v8 = vsel %vm709_vm6, %v692_v58, %v726_v2  ;;  %v703_v11 = vadd.f32 %v1306_v32, %v618_v5  ;;  %v1047_v12 = vpop.f32.mrf.mxu0  ;;  %v1055_v13 = vpop.f32.mrf.mxu1 }
 0x118   : > { %v750_v9 = vsel %vm717_vm7, %v700_v59, %v734_v3  ;;  %758 = vst [vmem:[%s1320_s17 + $0x8] sm:$0xff] %v742_v8  ;;  %v747_v14 = vsel %vm714_vm8, %v697_v0, %v731_v6  ;;  %v698_v16 = vadd.f32 %v1047_v12, %v1306_v32  ;;  %v706_v17 = vadd.f32 %v1055_v13, %v1306_v32  ;;  %v847_v36 = vld [vmem:[%s1320_s17 + $0x10] sm:$0xff] (%p1231_p6) }
 0x119   : > { %766 = vst [vmem:[%s1320_s17 + $0x48] sm:$0xff] %v750_v9  ;;  %v755_v15 = vsel %vm722_vm9, %v705_v1, %v739_v7  ;;  %763 = vst [vmem:[%s1320_s17 + $0x30] sm:$0xff] %v747_v14  ;;  %vm712_vm10 = vcmp.ge.f32.partialorder %v695_v10, 0.0  ;;  %v729_v18 = vmul.f32 %v1310_v34, %v695_v10  ;;  %vm720_vm11 = vcmp.ge.f32.partialorder %v703_v11, 0.0  ;;  %v589_v20 = vpop.f32.mrf.mxu0  ;;  %v621_v21 = vpop.f32.mrf.mxu1  ;;  %v863_v44 = vld [vmem:[%s1320_s17 + $0x50] sm:$0xff] (%p1231_p6) }
 0x11a   : > { %771 = vst [vmem:[%s1320_s17 + $0x70] sm:$0xff] %v755_v15  ;;  %v737_v19 = vmul.f32 %v1310_v34, %v703_v11  ;;  %vm715_vm12 = vcmp.ge.f32.partialorder %v698_v16, 0.0  ;;  %v732_v22 = vmul.f32 %v1310_v34, %v698_v16  ;;  %vm723_vm13 = vcmp.ge.f32.partialorder %v706_v17, 0.0  ;;  %848 = vst [vmem:[%s784_s22 + $0x20] sm:$0xff] (%p1231_p6), %v847_v36 }
 0x11b   : > { %v740_v23 = vmul.f32 %v1310_v34, %v706_v17  ;;  %v745_v24 = vsel %vm712_vm10, %v695_v10, %v729_v18  ;;  %v696_v26 = vadd.f32 %v1306_v32, %v589_v20  ;;  %v704_v27 = vadd.f32 %v1306_v32, %v621_v21  ;;  %v843_v32 = vld [vmem:[%s1320_s17] sm:$0xff] (%p1231_p6)  ;;  %864 = vst [vmem:[%s784_s22 + $0xa0] sm:$0xff] (%p1231_p6), %v863_v44 }
 0x11c   : > { %v753_v25 = vsel %vm720_vm11, %v703_v11, %v737_v19  ;;  %761 = vst [vmem:[%s1320_s17 + $0x20] sm:$0xff] %v745_v24  ;;  %v748_v28 = vsel %vm715_vm12, %v698_v16, %v732_v22  ;;  %v849_v37 = vld [vmem:[%s1320_s17 + $0x18] sm:$0xff] (%p1231_p6)  ;;  %844 = vst [vmem:[%s784_s22] sm:$0xff] (%p1231_p6), %v843_v32  ;;  %v859_v42 = vld [vmem:[%s1320_s17 + $0x40] sm:$0xff] (%p1231_p6) }
 0x11d   : > { %769 = vst [vmem:[%s1320_s17 + $0x60] sm:$0xff] %v753_v25  ;;  %v756_v29 = vsel %vm723_vm13, %v706_v17, %v740_v23  ;;  %764 = vst [vmem:[%s1320_s17 + $0x38] sm:$0xff] %v748_v28  ;;  %vm713_vm14 = vcmp.ge.f32.partialorder %v696_v26, 0.0  ;;  %v730_v30 = vmul.f32 %v1310_v34, %v696_v26  ;;  %vm721_vm15 = vcmp.ge.f32.partialorder %v704_v27, 0.0  ;;  %779 = sbr.rel (!%p1231_p6) target bundleno = 298 (0x12a), region = 89  ;;  %v865_v45 = vld [vmem:[%s1320_s17 + $0x58] sm:$0xff] (%p1231_p6) }
 0x11e   : > { %772 = vst [vmem:[%s1320_s17 + $0x78] sm:$0xff] %v756_v29  ;;  %v738_v31 = vmul.f32 %v1310_v34, %v704_v27  ;;  %850 = vst [vmem:[%s784_s22 + $0x30] sm:$0xff] (%p1231_p6), %v849_v37 }
 0x11f   : > { %v746_v33 = vsel %vm713_vm14, %v696_v26, %v730_v30  ;;  %v845_v34 = vld [vmem:[%s1320_s17 + $0x8] sm:$0xff] (%p1231_p6)  ;;  %860 = vst [vmem:[%s784_s22 + $0x80] sm:$0xff] (%p1231_p6), %v859_v42  ;;  %866 = vst [vmem:[%s784_s22 + $0xb0] sm:$0xff] (%p1231_p6), %v865_v45 }
 0x120   : > { %v754_v35 = vsel %vm721_vm15, %v704_v27, %v738_v31  ;;  %762 = vst [vmem:[%s1320_s17 + $0x28] sm:$0xff] %v746_v33  ;;  %846 = vst [vmem:[%s784_s22 + $0x10] sm:$0xff] (%p1231_p6), %v845_v34  ;;  %v855_v40 = vld [vmem:[%s1320_s17 + $0x30] sm:$0xff] (%p1231_p6)  ;;  %v861_v43 = vld [vmem:[%s1320_s17 + $0x48] sm:$0xff] (%p1231_p6) }
 0x121   : > { %770 = vst [vmem:[%s1320_s17 + $0x68] sm:$0xff] %v754_v35  ;;  %856 = vst [vmem:[%s784_s22 + $0x60] sm:$0xff] (%p1231_p6), %v855_v40  ;;  %v871_v48 = vld [vmem:[%s1320_s17 + $0x70] sm:$0xff] (%p1231_p6) }
 0x122   : > { %862 = vst [vmem:[%s784_s22 + $0x90] sm:$0xff] %v861_v43  ;;  %872 = vst [vmem:[%s784_s22 + $0xe0] sm:$0xff] %v871_v48 }
 0x123   : > { %v851_v38 = vld [vmem:[%s1320_s17 + $0x20] sm:$0xff] }
 0x124   : > { %852 = vst [vmem:[%s784_s22 + $0x40] sm:$0xff] %v851_v38  ;;  %v857_v41 = vld [vmem:[%s1320_s17 + $0x38] sm:$0xff]  ;;  %v867_v46 = vld [vmem:[%s1320_s17 + $0x60] sm:$0xff] }
 0x125   : > { %858 = vst [vmem:[%s784_s22 + $0x70] sm:$0xff] %v857_v41  ;;  %868 = vst [vmem:[%s784_s22 + $0xc0] sm:$0xff] %v867_v46  ;;  %v873_v49 = vld [vmem:[%s1320_s17 + $0x78] sm:$0xff] }
 0x126   : > { %874 = vst [vmem:[%s784_s22 + $0xf0] sm:$0xff] %v873_v49 }
 0x127   : > { %v853_v39 = vld [vmem:[%s1320_s17 + $0x28] sm:$0xff] }
 0x128   : > { %854 = vst [vmem:[%s784_s22 + $0x50] sm:$0xff] %v853_v39  ;;  %v869_v47 = vld [vmem:[%s1320_s17 + $0x68] sm:$0xff] }
 0x129   : > { %870 = vst [vmem:[%s784_s22 + $0xd0] sm:$0xff] %v869_v47 }
 0x12a PF: > { %s15_s21 = sadd.s32 1, %s1166_s21   ;;  %s1405_s17 = smov %s1154_s18 }
 0x12b   : > { %p12_p12 = scmp.ge.s32.totalorder %s15_s21, 4   ;;  %s1406_s18 = smov %s1236_s26 }
 0x12c   : > { %s1407_s19 = smov %s1162_s20  ;;  %s1408_s20 = smov %s1410_s0 }
 0x12d   :  { %14 = sbr.rel (!%p12_p12) target bundleno = 5 (0x5), region = 164 }

// kernel: d_dbpn_forward.20
= control target key start
LH: loop header
LB: loop body
LE: loop exit
PB: predicated region body
PF: predicated region fallthrough
CT: control target
= control target key end

     0   :  { %s884_s2 = inlined_call_operand.vmem [shape: bf16[256,128], index: 2, kind: input, shape index: {}]   ;;  %s885_s1 = inlined_call_operand.vmem [shape: bf16[128,256], index: 1, kind: input, shape index: {}]   ;;  %s886_s3 = inlined_call_operand.vmem [shape: f32[1,128], index: 3, kind: input, shape index: {}]   ;;  %s887_s0 = inlined_call_operand.<no memory space> [shape: f32[1], index: 0, kind: input, shape index: {}]   ;;  %s888_s4 = inlined_call_operand.vmem [shape: f32[128,128], index: 4, kind: output, shape index: {}]  }
   0x1   :  { %v633_v0 = vld [vmem:[%s884_s2 + $0x78] sm:$0xff]   ;;  %v635_v2 = vld [vmem:[%s884_s2 + $0x70] sm:$0xff]   ;;  %v637_v4 = vld [vmem:[%s884_s2 + $0x68] sm:$0xff]   ;;  %v802_v39 = vstv %s887_s0 }
   0x2   :  { %v634_v1 = vld [vmem:[%s884_s2 + $0x38] sm:$0xff]   ;;  %553 = vmatprep.subr.bf16.mxu0 %v633_v0  ;;  %617 = vmatprep.subr.bf16.mxu1 %v633_v0  ;;  %v636_v3 = vld [vmem:[%s884_s2 + $0x30] sm:$0xff]   ;;  %v638_v5 = vld [vmem:[%s884_s2 + $0x28] sm:$0xff]  }
   0x3   :  { %554 = vmatpush3.bf16.msra.mxu0 %v634_v1  ;;  %625 = vmatpush3.bf16.msra.mxu1 %v634_v1  ;;  %v639_v6 = vld [vmem:[%s884_s2 + $0x60] sm:$0xff]   ;;  %v641_v8 = vld [vmem:[%s884_s2 + $0x58] sm:$0xff]   ;;  %v643_v10 = vld [vmem:[%s884_s2 + $0x50] sm:$0xff]  }
   0x4   :  { %555 = vmatprep.subr.bf16.mxu0 %v635_v2  ;;  %618 = vmatprep.subr.bf16.mxu1 %v635_v2  ;;  %v640_v7 = vld [vmem:[%s884_s2 + $0x20] sm:$0xff]   ;;  %v642_v9 = vld [vmem:[%s884_s2 + $0x18] sm:$0xff]   ;;  %v644_v13 = vld [vmem:[%s884_s2 + $0x10] sm:$0xff]  }
   0x5   :  { %v651_v11 = vld [vmem:[%s885_s1 + $0x4] ss:$8 sps:$4 sm:$0xff]   ;;  %v649_v18 = vld [vmem:[%s885_s1] ss:$8 sps:$4 sm:$0xff]   ;;  %v655_v20 = vld [vmem:[%s885_s1 + $0x14] ss:$8 sps:$4 sm:$0xff]  }
   0x6   :  { %v654_v12 = vld [vmem:[%s885_s1 + $0x44] ss:$8 sps:$4 sm:$0xff]   ;;  %311 = vmatprep.mubr.bf16.mxu0 %v651_v11  ;;  %v652_v19 = vld [vmem:[%s885_s1 + $0x40] ss:$8 sps:$4 sm:$0xff]   ;;  %v657_v21 = vld [vmem:[%s885_s1 + $0x54] ss:$8 sps:$4 sm:$0xff]  }
   0x7   :  { %556 = vmatpush3.bf16.msra.mxu0 %v636_v3  ;;  %626 = vmatpush3.bf16.msra.mxu1 %v636_v3  ;;  %v645_v14 = vld [vmem:[%s884_s2 + $0x48] sm:$0xff]   ;;  %v647_v16 = vld [vmem:[%s884_s2 + $0x40] sm:$0xff]   ;;  %v659_v22 = vld [vmem:[%s885_s1 + $0x10] ss:$8 sps:$4 sm:$0xff]  }
   0x8   :  { %557 = vmatprep.subr.bf16.mxu0 %v637_v4  ;;  %619 = vmatprep.subr.bf16.mxu1 %v637_v4  ;;  %v646_v15 = vld [vmem:[%s884_s2 + $0x8] sm:$0xff]   ;;  %v648_v17 = vld [vmem:[%s884_s2] sm:$0xff]   ;;  %v660_v23 = vld [vmem:[%s885_s1 + $0x50] ss:$8 sps:$4 sm:$0xff]  }
   0x9   :  { %343 = vmatprep.mubr.bf16.mxu1 %v654_v12  ;;  %v661_v24 = vld [vmem:[%s885_s1 + $0x24] ss:$8 sps:$4 sm:$0xff]   ;;  %v665_v26 = vld [vmem:[%s885_s1 + $0x20] ss:$8 sps:$4 sm:$0xff]   ;;  %v667_v28 = vld [vmem:[%s885_s1 + $0x34] ss:$8 sps:$4 sm:$0xff]  }
   0xa   :  { %v663_v25 = vld [vmem:[%s885_s1 + $0x64] ss:$8 sps:$4 sm:$0xff]   ;;  %v666_v27 = vld [vmem:[%s885_s1 + $0x60] ss:$8 sps:$4 sm:$0xff]   ;;  %v669_v29 = vld [vmem:[%s885_s1 + $0x74] ss:$8 sps:$4 sm:$0xff]  }
   0xb   :  { %558 = vmatpush3.bf16.msra.mxu0 %v638_v5  ;;  %627 = vmatpush3.bf16.msra.mxu1 %v638_v5  ;;  %v671_v30 = vld [vmem:[%s885_s1 + $0x30] ss:$8 sps:$4 sm:$0xff]   ;;  %v797_v35 = vld [vmem:[%s886_s3] ss:$0 sm:$0xff] }
   0xc   :  { %559 = vmatprep.subr.bf16.mxu0 %v639_v6  ;;  %620 = vmatprep.subr.bf16.mxu1 %v639_v6  ;;  %v672_v31 = vld [vmem:[%s885_s1 + $0x70] ss:$8 sps:$4 sm:$0xff]  }
   0xf   :  { %560 = vmatpush3.bf16.msra.mxu0 %v640_v7  ;;  %628 = vmatpush3.bf16.msra.mxu1 %v640_v7 }
  0x10   :  { %561 = vmatprep.subr.bf16.mxu0 %v641_v8  ;;  %621 = vmatprep.subr.bf16.mxu1 %v641_v8 }
  0x13   :  { %562 = vmatpush3.bf16.msra.mxu0 %v642_v9  ;;  %629 = vmatpush3.bf16.msra.mxu1 %v642_v9 }
  0x14   :  { %563 = vmatprep.subr.bf16.mxu0 %v643_v10  ;;  %622 = vmatprep.subr.bf16.mxu1 %v643_v10 }
  0x17   :  { %564 = vmatpush3.bf16.msra.mxu0 %v644_v13  ;;  %630 = vmatpush3.bf16.msra.mxu1 %v644_v13 }
  0x18   :  { %565 = vmatprep.subr.bf16.mxu0 %v645_v14  ;;  %623 = vmatprep.subr.bf16.mxu1 %v645_v14 }
  0x1b   :  { %566 = vmatpush3.bf16.msra.mxu0 %v646_v15  ;;  %631 = vmatpush3.bf16.msra.mxu1 %v646_v15 }
  0x1c   :  { %567 = vmatprep.subr.bf16.mxu0 %v647_v16  ;;  %624 = vmatprep.subr.bf16.mxu1 %v647_v16 }
  0x1f   :  { %568 = vmatpush3.bf16.msra.mxu0 %v648_v17  ;;  %632 = vmatpush3.bf16.msra.mxu1 %v648_v17 }
  0x22   :  { %312 = vmatmul.mubr.bf16.vlgmr.msra.gmra.mxu0 %v649_v18  ;;  %344 = vmatmul.mubr.bf16.vlgmr.msra.gmra.mxu1 %v652_v19 }
  0x23   :  { %319 = vmatprep.mubr.bf16.mxu0 %v655_v20  ;;  %351 = vmatprep.mubr.bf16.mxu1 %v657_v21 }
  0x2a   :  { %320 = vmatmul.mubr.bf16.gmra.mxu0 %v659_v22  ;;  %352 = vmatmul.mubr.bf16.gmra.mxu1 %v660_v23 }
  0x2b   :  { %327 = vmatprep.mubr.bf16.mxu0 %v661_v24  ;;  %359 = vmatprep.mubr.bf16.mxu1 %v663_v25 }
  0x32   :  { %328 = vmatmul.mubr.bf16.gmra.mxu0 %v665_v26  ;;  %360 = vmatmul.mubr.bf16.gmra.mxu1 %v666_v27 }
  0x33   :  { %335 = vmatprep.mubr.bf16.mxu0 %v667_v28  ;;  %367 = vmatprep.mubr.bf16.mxu1 %v669_v29 }
  0x3a   :  { %336 = vmatmul.mubr.bf16.gmra.mxu0 %v671_v30  ;;  %368 = vmatmul.mubr.bf16.gmra.mxu1 %v672_v31 }
  0xe2   :  { %v569_v32 = vpop.f32.mrf.mxu0  ;;  %v593_v33 = vpop.f32.mrf.mxu1 }
  0xe4   :  { %v570_v34 = vpop.f32.mrf.mxu0  ;;  %v594_v36 = vpop.f32.mrf.mxu1 }
  0xe5   :  { %v571_v37 = vadd.f32 %v570_v34, %v569_v32  ;;  %v595_v38 = vadd.f32 %v594_v36, %v593_v33 }
  0xe6   :  { %v572_v40 = vpop.f32.mrf.mxu0  ;;  %v596_v41 = vpop.f32.mrf.mxu1 }
  0xe7   :  { %v434_v42 = vadd.f32 %v571_v37, %v797_v35  ;;  %v442_v43 = vadd.f32 %v595_v38, %v797_v35 }
  0xe8   :  { %v573_v44 = vpop.f32.mrf.mxu0  ;;  %v597_v45 = vpop.f32.mrf.mxu1 }
  0xe9   :  { %vm451_vm0 = vcmp.ge.f32.partialorder %v434_v42, 0.0  ;;  %v468_v46 = vmul.f32 %v802_v39, %v434_v42  ;;  %vm459_vm1 = vcmp.ge.f32.partialorder %v442_v43, 0.0  ;;  %v476_v47 = vmul.f32 %v802_v39, %v442_v43 }
  0xea   :  { %v574_v48 = vadd.f32 %v573_v44, %v572_v40  ;;  %v598_v49 = vadd.f32 %v597_v45, %v596_v41  ;;  %v575_v50 = vpop.f32.mrf.mxu0  ;;  %v599_v51 = vpop.f32.mrf.mxu1 }
  0xeb   :  { %v484_v52 = vsel %vm451_vm0, %v434_v42, %v468_v46  ;;  %v492_v53 = vsel %vm459_vm1, %v442_v43, %v476_v47 }
  0xec   :  { %500 = vst [vmem:[%s888_s4] sm:$0xff] %v484_v52  ;;  %508 = vst [vmem:[%s888_s4 + $0x40] sm:$0xff] %v492_v53  ;;  %v435_v54 = vadd.f32 %v574_v48, %v797_v35  ;;  %v443_v55 = vadd.f32 %v598_v49, %v797_v35  ;;  %v576_v56 = vpop.f32.mrf.mxu0  ;;  %v600_v57 = vpop.f32.mrf.mxu1 }
  0xed   :  { %v577_v58 = vadd.f32 %v576_v56, %v575_v50  ;;  %v601_v59 = vadd.f32 %v600_v57, %v599_v51 }
  0xee   :  { %vm452_vm2 = vcmp.ge.f32.partialorder %v435_v54, 0.0  ;;  %v469_v60 = vmul.f32 %v802_v39, %v435_v54  ;;  %vm460_vm3 = vcmp.ge.f32.partialorder %v443_v55, 0.0  ;;  %v477_v61 = vmul.f32 %v802_v39, %v443_v55  ;;  %v578_v62 = vpop.f32.mrf.mxu0  ;;  %v602_v63 = vpop.f32.mrf.mxu1 }
  0xef   :  { %v436_v0 = vadd.f32 %v577_v58, %v797_v35  ;;  %v444_v1 = vadd.f32 %v601_v59, %v797_v35 }
  0xf0   :  { %v485_v2 = vsel %vm452_vm2, %v435_v54, %v469_v60  ;;  %v493_v3 = vsel %vm460_vm3, %v443_v55, %v477_v61  ;;  %v579_v4 = vpop.f32.mrf.mxu0  ;;  %v603_v5 = vpop.f32.mrf.mxu1 }
  0xf1   :  { %501 = vst [vmem:[%s888_s4 + $0x8] sm:$0xff] %v485_v2  ;;  %509 = vst [vmem:[%s888_s4 + $0x48] sm:$0xff] %v493_v3  ;;  %vm453_vm4 = vcmp.ge.f32.partialorder %v436_v0, 0.0  ;;  %v470_v6 = vmul.f32 %v802_v39, %v436_v0  ;;  %vm461_vm5 = vcmp.ge.f32.partialorder %v444_v1, 0.0  ;;  %v478_v7 = vmul.f32 %v802_v39, %v444_v1 }
  0xf2   :  { %v580_v8 = vadd.f32 %v579_v4, %v578_v62  ;;  %v604_v9 = vadd.f32 %v603_v5, %v602_v63  ;;  %v581_v10 = vpop.f32.mrf.mxu0  ;;  %v605_v11 = vpop.f32.mrf.mxu1 }
  0xf3   :  { %v486_v12 = vsel %vm453_vm4, %v436_v0, %v470_v6  ;;  %v494_v13 = vsel %vm461_vm5, %v444_v1, %v478_v7 }
  0xf4   :  { %502 = vst [vmem:[%s888_s4 + $0x10] sm:$0xff] %v486_v12  ;;  %510 = vst [vmem:[%s888_s4 + $0x50] sm:$0xff] %v494_v13  ;;  %v437_v14 = vadd.f32 %v580_v8, %v797_v35  ;;  %v445_v15 = vadd.f32 %v604_v9, %v797_v35  ;;  %v582_v16 = vpop.f32.mrf.mxu0  ;;  %v606_v17 = vpop.f32.mrf.mxu1 }
  0xf5   :  { %v583_v18 = vadd.f32 %v582_v16, %v581_v10  ;;  %v607_v19 = vadd.f32 %v606_v17, %v605_v11 }
  0xf6   :  { %vm454_vm6 = vcmp.ge.f32.partialorder %v437_v14, 0.0  ;;  %v471_v20 = vmul.f32 %v802_v39, %v437_v14  ;;  %vm462_vm7 = vcmp.ge.f32.partialorder %v445_v15, 0.0  ;;  %v479_v21 = vmul.f32 %v802_v39, %v445_v15  ;;  %v584_v22 = vpop.f32.mrf.mxu0  ;;  %v608_v23 = vpop.f32.mrf.mxu1 }
  0xf7   :  { %v438_v24 = vadd.f32 %v583_v18, %v797_v35  ;;  %v446_v25 = vadd.f32 %v607_v19, %v797_v35 }
  0xf8   :  { %v487_v26 = vsel %vm454_vm6, %v437_v14, %v471_v20  ;;  %v495_v27 = vsel %vm462_vm7, %v445_v15, %v479_v21  ;;  %v585_v28 = vpop.f32.mrf.mxu0  ;;  %v609_v29 = vpop.f32.mrf.mxu1 }
  0xf9   :  { %503 = vst [vmem:[%s888_s4 + $0x18] sm:$0xff] %v487_v26  ;;  %511 = vst [vmem:[%s888_s4 + $0x58] sm:$0xff] %v495_v27  ;;  %vm455_vm8 = vcmp.ge.f32.partialorder %v438_v24, 0.0  ;;  %v472_v30 = vmul.f32 %v802_v39, %v438_v24  ;;  %vm463_vm9 = vcmp.ge.f32.partialorder %v446_v25, 0.0  ;;  %v480_v31 = vmul.f32 %v802_v39, %v446_v25 }
  0xfa   :  { %v586_v32 = vadd.f32 %v585_v28, %v584_v22  ;;  %v610_v33 = vadd.f32 %v609_v29, %v608_v23  ;;  %v587_v34 = vpop.f32.mrf.mxu0  ;;  %v611_v36 = vpop.f32.mrf.mxu1 }
  0xfb   :  { %v488_v37 = vsel %vm455_vm8, %v438_v24, %v472_v30  ;;  %v496_v38 = vsel %vm463_vm9, %v446_v25, %v480_v31 }
  0xfc   :  { %504 = vst [vmem:[%s888_s4 + $0x20] sm:$0xff] %v488_v37  ;;  %512 = vst [vmem:[%s888_s4 + $0x60] sm:$0xff] %v496_v38  ;;  %v439_v40 = vadd.f32 %v586_v32, %v797_v35  ;;  %v447_v41 = vadd.f32 %v610_v33, %v797_v35  ;;  %v588_v42 = vpop.f32.mrf.mxu0  ;;  %v612_v43 = vpop.f32.mrf.mxu1 }
  0xfd   :  { %v589_v44 = vadd.f32 %v588_v42, %v587_v34  ;;  %v613_v45 = vadd.f32 %v612_v43, %v611_v36 }
  0xfe   :  { %vm456_vm10 = vcmp.ge.f32.partialorder %v439_v40, 0.0  ;;  %v473_v46 = vmul.f32 %v802_v39, %v439_v40  ;;  %vm464_vm11 = vcmp.ge.f32.partialorder %v447_v41, 0.0  ;;  %v481_v47 = vmul.f32 %v802_v39, %v447_v41  ;;  %v590_v48 = vpop.f32.mrf.mxu0  ;;  %v614_v49 = vpop.f32.mrf.mxu1 }
  0xff   :  { %v440_v50 = vadd.f32 %v589_v44, %v797_v35  ;;  %v448_v51 = vadd.f32 %v613_v45, %v797_v35 }
 0x100   :  { %v489_v52 = vsel %vm456_vm10, %v439_v40, %v473_v46  ;;  %v497_v53 = vsel %vm464_vm11, %v447_v41, %v481_v47  ;;  %v591_v54 = vpop.f32.mrf.mxu0  ;;  %v615_v55 = vpop.f32.mrf.mxu1 }
 0x101   :  { %505 = vst [vmem:[%s888_s4 + $0x28] sm:$0xff] %v489_v52  ;;  %513 = vst [vmem:[%s888_s4 + $0x68] sm:$0xff] %v497_v53  ;;  %vm457_vm12 = vcmp.ge.f32.partialorder %v440_v50, 0.0  ;;  %v474_v56 = vmul.f32 %v802_v39, %v440_v50  ;;  %vm465_vm13 = vcmp.ge.f32.partialorder %v448_v51, 0.0  ;;  %v482_v57 = vmul.f32 %v802_v39, %v448_v51 }
 0x102   :  { %v592_v58 = vadd.f32 %v591_v54, %v590_v48  ;;  %v616_v59 = vadd.f32 %v615_v55, %v614_v49 }
 0x103   :  { %v490_v60 = vsel %vm457_vm12, %v440_v50, %v474_v56  ;;  %v498_v61 = vsel %vm465_vm13, %v448_v51, %v482_v57 }
 0x104   :  { %506 = vst [vmem:[%s888_s4 + $0x30] sm:$0xff] %v490_v60  ;;  %514 = vst [vmem:[%s888_s4 + $0x70] sm:$0xff] %v498_v61  ;;  %v441_v62 = vadd.f32 %v592_v58, %v797_v35  ;;  %v449_v63 = vadd.f32 %v616_v59, %v797_v35 }
 0x106   :  { %vm458_vm14 = vcmp.ge.f32.partialorder %v441_v62, 0.0  ;;  %v475_v0 = vmul.f32 %v802_v39, %v441_v62  ;;  %vm466_vm15 = vcmp.ge.f32.partialorder %v449_v63, 0.0  ;;  %v483_v1 = vmul.f32 %v802_v39, %v449_v63 }
 0x108   :  { %v491_v2 = vsel %vm458_vm14, %v441_v62, %v475_v0  ;;  %v499_v3 = vsel %vm466_vm15, %v449_v63, %v483_v1 }
 0x109   :  { %507 = vst [vmem:[%s888_s4 + $0x38] sm:$0xff] %v491_v2  ;;  %515 = vst [vmem:[%s888_s4 + $0x78] sm:$0xff] %v499_v3 }

// kernel: tile.43
= control target key start
LH: loop header
LB: loop body
LE: loop exit
PB: predicated region body
PF: predicated region fallthrough
CT: control target
= control target key end

     0   :  { %s28_s0 = inlined_call_operand.vmem [shape: f32[16], index: 0, kind: input, shape index: {}]   ;;  %s29_s1 = inlined_call_operand.vmem [shape: f32[16,16], index: 1, kind: output, shape index: {}]  }
   0x1   :  { %v4_v0 = vld [vmem:[%s28_s0] ss:$0 sm:$0xff] }
   0x2   :  { %5 = vst [vmem:[%s29_s1] sm:$0xff] %v4_v0  ;;  %8 = vst [vmem:[%s29_s1 + $0x8] sm:$0xff] %v4_v0 }

// kernel: tile.44
= control target key start
LH: loop header
LB: loop body
LE: loop exit
PB: predicated region body
PF: predicated region fallthrough
CT: control target
= control target key end

     0   :  { %s7_s6 = smov 3  ;;  %s21_s9 = smov 3  ;;  %vm4_vm0 = vcmask 130048   ;;  %vm11_vm1 = vcmask 1048448   ;;  %vm18_vm2 = vcmask 917248   ;;  %vm25_vm3 = vcmask 786048   ;;  %s131_s0 = inlined_call_operand.vmem [shape: f32[16,16], index: 0, kind: input, shape index: {}]   ;;  %s132_s1 = inlined_call_operand.vmem [shape: f32[1,256], index: 1, kind: output, shape index: {}]  }
   0x1   :  { %v69_v0 = vld [vmem:[%s131_s0 + $0x7] ss:$8 sm:%s7_s6]   ;;  %s84_s10 = smov 112   ;;  %v71_v1 = vld [vmem:[%s131_s0 + $0x5] ss:$8 sm:%s21_s9]   ;;  %s14_s13 = smov 3 }
   0x2   :  { %9 = vrot.lane.b32.xlu0 %v69_v0, %s84_s10  ;;  %s85_s14 = smov 80   ;;  %v70_v2 = vld [vmem:[%s131_s0 + $0x6] ss:$8 sm:%s14_s13]   ;;  %s28_s17 = smov 3  ;;  %vm32_vm4 = vcmask 654848   ;;  %vm39_vm5 = vcmask 523648  }
   0x3   :  { %23 = vrot.lane.b32.xlu1 %v71_v1, %s85_s14  ;;  %v72_v3 = vld [vmem:[%s131_s0 + $0x4] ss:$8 sm:%s28_s17]   ;;  %s35_s20 = smov 3  ;;  %s42_s21 = smov 3  ;;  %vm46_vm6 = vcmask 392448   ;;  %vm53_vm7 = vcmask 261248  }
   0x4   :  { %s86_s22 = smov 96   ;;  %s87_s23 = smov 64   ;;  %v73_v4 = vld [vmem:[%s131_s0 + $0x3] ss:$8 sm:%s35_s20]   ;;  %v74_v5 = vld [vmem:[%s131_s0 + $0x2] ss:$8 sm:%s42_s21]  }
   0x5   :  { %s2_s26 = smov 3  ;;  %s49_s29 = smov 3 }
   0x6   :  { %16 = vrot.lane.b32.xlu0 %v70_v2, %s86_s22  ;;  %v3_v6 = vld [vmem:[%s131_s0] ss:$8 sm:%s2_s26]   ;;  %s88_s3 = smov 48   ;;  %s89_s4 = smov 32  }
   0x7   :  { %30 = vrot.lane.b32.xlu1 %v72_v3, %s87_s23  ;;  %5 = vst.msk [vmem:[#allocation0] ss:$8 sm:$0x3] %vm4_vm0, %v3_v6   ;;  %v75_v7 = vld [vmem:[%s131_s0 + $0x1] ss:$8 sm:%s49_s29]   ;;  %s90_s0 = smov 16  }
   0xa   :  { %37 = vrot.lane.b32.xlu0 %v73_v4, %s88_s3 }
   0xb   :  { %44 = vrot.lane.b32.xlu1 %v74_v5, %s89_s4 }
   0xe   :  { %51 = vrot.lane.b32.xlu0 %v75_v7, %s90_s0 }
  0x74   :  { %v10_v8 = vpop.permute.xlu0 %9  }
  0x75   :  { %12 = vst.msk [vmem:[#allocation0] ss:$8 sm:$0x3] %vm11_vm1, %v10_v8   ;;  %v24_v9 = vpop.permute.xlu1 %23  }
  0x78   :  { %v17_v10 = vpop.permute.xlu0 %16  }
  0x79   :  { %19 = vst.msk [vmem:[#allocation0] ss:$8 sm:$0x3] %vm18_vm2, %v17_v10   ;;  %v31_v11 = vpop.permute.xlu1 %30  }
  0x7a   :  { %26 = vst.msk [vmem:[#allocation0] ss:$8 sm:$0x3] %vm25_vm3, %v24_v9  }
  0x7b   :  { %33 = vst.msk [vmem:[#allocation0] ss:$8 sm:$0x3] %vm32_vm4, %v31_v11  }
  0x7c   :  { %v38_v12 = vpop.permute.xlu0 %37  }
  0x7d   :  { %40 = vst.msk [vmem:[#allocation0] ss:$8 sm:$0x3] %vm39_vm5, %v38_v12   ;;  %v45_v13 = vpop.permute.xlu1 %44  }
  0x7e   :  { %47 = vst.msk [vmem:[#allocation0] ss:$8 sm:$0x3] %vm46_vm6, %v45_v13  }
  0x80   :  { %v52_v14 = vpop.permute.xlu0 %51  }
  0x81   :  { %54 = vst.msk [vmem:[#allocation0] ss:$8 sm:$0x3] %vm53_vm7, %v52_v14  }
  0x88   :  { %v59_v15 = vld [vmem:[#allocation0] sm:$0x1]  ;;  %v64_v16 = vld [vmem:[#allocation0 + $0x8] sm:$0x1] }
  0x89   :  { %62 = vst [vmem:[%s132_s1] sm:$0x1] %v59_v15  ;;  %76 = vst [vmem:[%s132_s1 + $0x1] sm:$0x1] %v64_v16 }

// kernel: d_dbpn_forward.21
= control target key start
LH: loop header
LB: loop body
LE: loop exit
PB: predicated region body
PF: predicated region fallthrough
CT: control target
= control target key end

     0   :  { %s1708_s0 = inlined_call_operand.<no memory space> [shape: f32[1], index: 0, kind: input, shape index: {}]   ;;  %s1709_s1 = inlined_call_operand.vmem [shape: bf16[128,256], index: 1, kind: input, shape index: {}]   ;;  %s1710_s2 = inlined_call_operand.vmem [shape: bf16[256,256], index: 2, kind: input, shape index: {}]   ;;  %s1711_s3 = inlined_call_operand.vmem [shape: f32[1,256], index: 3, kind: input, shape index: {}]   ;;  %s1712_s4 = inlined_call_operand.vmem [shape: f32[128,256], index: 4, kind: output, shape index: {}]  }
   0x1   :  { %9 = sst [smem:[#allocation3]] %s1708_s0 }
   0x2   :  { %s1423_s17 = smov 0   ;;  %s1425_s18 = smov 0  }
   0x3   :  { %s1427_s19 = smov 0   ;;  %s1429_s20 = smov 0  }
   0x4   :  { %s1431_s21 = smov 0  }
   0x5 LB: > { %s30_s0 = sadd.s32 1, %s1389_s20  ;;  %s1148_s22 = sadd.s32 4294967295, %s1393_s21   ;;  %s1393_s21 = sphi %s1431_s21, %s15_s21   ;;  %s1389_s20 = sphi %s1429_s20, %s1717_s20   ;;  %s1385_s19 = sphi %s1427_s19, %s1716_s19   ;;  %s1381_s18 = sphi %s1425_s18, %s1715_s18   ;;  %s1377_s17 = sphi %s1423_s17, %s1714_s17  }
   0x6   : > { %p32_p0 = scmp.ge.s32.totalorder %s30_s0, 2  ;;  %p99_p1 = scmp.ne.s32.totalorder %s1381_s18, %s1377_s17 }
   0x7   : > { %p100_p2 = scmp.eq.s32.totalorder %s1393_s21, 0  ;;  %p157_p4 = scmp.eq.s32.totalorder %s1148_s22, 1 }
   0x8   : > { %s1719_s0 = smov (%p32_p0, %s30_s0), 0  ;;  %s92_s24 = sadd.s32 1, %s1381_s18 }
   0x9   : > { %p101_p3 = por %p100_p2, %p99_p1  ;;  %s88_s23 = ssub.s32 %s1389_s20, %s1719_s0 }
   0xa   : > { %p90_p5 = scmp.eq.s32.totalorder %s88_s23, 0  ;;  %p1458_p6 = por %p157_p4, %p99_p1 }
   0xb   : > { %p1152_p7 = scmp.ge.s32.totalorder %s1393_s21, 2 }
   0xc   : > { %s1463_s26 = scalar_select %p90_p5, %s1381_s18, %s92_s24  }
   0xd   : > { %197 = sbr.rel (%p1152_p7) target bundleno = 43 (0x2b), region = 24 }
  0x12   : > { %200 = sbr.rel (!%p101_p3) target bundleno = 43 (0x2b), region = 28  ;;  %s202_s27 = sand.u32 (%p101_p3), 1, %s1381_s18  }
  0x13   : > { %s1154_s28 = sshll.u32 (%p101_p3), %s1389_s20, 2  ;;  %s1153_s29 = sshll.u32 (%p101_p3), %s202_s27, 7 }
  0x14   : > { %s1471_s6 = scalar_lea.vmem (%p101_p3), %s1710_s2, %s1154_s28  ;;  %s1475_s7 = scalar_lea.vmem (%p101_p3), [#allocation4], %s1153_s29 }
  0x15   : > { %v226_v0 = vld [vmem:[%s1471_s6] sm:$0xf] (%p101_p3)  ;;  %v228_v1 = vld [vmem:[%s1471_s6 + $0x8] sm:$0xf] (%p101_p3)  ;;  %v230_v2 = vld [vmem:[%s1471_s6 + $0x10] sm:$0xf] (%p101_p3) }
  0x16   : > { %227 = vst [vmem:[%s1475_s7] sm:$0xf] (%p101_p3), %v226_v0  ;;  %229 = vst [vmem:[%s1475_s7 + $0x4] sm:$0xf] (%p101_p3), %v228_v1  ;;  %v232_v3 = vld [vmem:[%s1471_s6 + $0x18] sm:$0xf] (%p101_p3) }
  0x17   : > { %v234_v4 = vld [vmem:[%s1471_s6 + $0x20] sm:$0xf]  ;;  %231 = vst [vmem:[%s1475_s7 + $0x8] sm:$0xf] %v230_v2  ;;  %233 = vst [vmem:[%s1475_s7 + $0xc] sm:$0xf] %v232_v3 }
  0x18   : > { %235 = vst [vmem:[%s1475_s7 + $0x10] sm:$0xf] %v234_v4  ;;  %v236_v5 = vld [vmem:[%s1471_s6 + $0x28] sm:$0xf]  ;;  %v238_v6 = vld [vmem:[%s1471_s6 + $0x30] sm:$0xf] }
  0x19   : > { %v240_v7 = vld [vmem:[%s1471_s6 + $0x38] sm:$0xf]  ;;  %237 = vst [vmem:[%s1475_s7 + $0x14] sm:$0xf] %v236_v5  ;;  %239 = vst [vmem:[%s1475_s7 + $0x18] sm:$0xf] %v238_v6 }
  0x1a   : > { %241 = vst [vmem:[%s1475_s7 + $0x1c] sm:$0xf] %v240_v7  ;;  %v242_v8 = vld [vmem:[%s1471_s6 + $0x40] sm:$0xf]  ;;  %v244_v9 = vld [vmem:[%s1471_s6 + $0x48] sm:$0xf] }
  0x1b   : > { %v246_v10 = vld [vmem:[%s1471_s6 + $0x50] sm:$0xf]  ;;  %243 = vst [vmem:[%s1475_s7 + $0x20] sm:$0xf] %v242_v8  ;;  %245 = vst [vmem:[%s1475_s7 + $0x24] sm:$0xf] %v244_v9 }
  0x1c   : > { %247 = vst [vmem:[%s1475_s7 + $0x28] sm:$0xf] %v246_v10  ;;  %v248_v11 = vld [vmem:[%s1471_s6 + $0x58] sm:$0xf]  ;;  %v250_v12 = vld [vmem:[%s1471_s6 + $0x60] sm:$0xf] }
  0x1d   : > { %v252_v13 = vld [vmem:[%s1471_s6 + $0x68] sm:$0xf]  ;;  %249 = vst [vmem:[%s1475_s7 + $0x2c] sm:$0xf] %v248_v11  ;;  %251 = vst [vmem:[%s1475_s7 + $0x30] sm:$0xf] %v250_v12 }
  0x1e   : > { %253 = vst [vmem:[%s1475_s7 + $0x34] sm:$0xf] %v252_v13  ;;  %v254_v14 = vld [vmem:[%s1471_s6 + $0x70] sm:$0xf]  ;;  %v256_v15 = vld [vmem:[%s1471_s6 + $0x78] sm:$0xf] }
  0x1f   : > { %v258_v16 = vld [vmem:[%s1471_s6 + $0x80] sm:$0xf]  ;;  %255 = vst [vmem:[%s1475_s7 + $0x38] sm:$0xf] %v254_v14  ;;  %257 = vst [vmem:[%s1475_s7 + $0x3c] sm:$0xf] %v256_v15 }
  0x20   : > { %259 = vst [vmem:[%s1475_s7 + $0x40] sm:$0xf] %v258_v16  ;;  %v260_v17 = vld [vmem:[%s1471_s6 + $0x88] sm:$0xf]  ;;  %v262_v18 = vld [vmem:[%s1471_s6 + $0x90] sm:$0xf] }
  0x21   : > { %v264_v19 = vld [vmem:[%s1471_s6 + $0x98] sm:$0xf]  ;;  %261 = vst [vmem:[%s1475_s7 + $0x44] sm:$0xf] %v260_v17  ;;  %263 = vst [vmem:[%s1475_s7 + $0x48] sm:$0xf] %v262_v18 }
  0x22   : > { %265 = vst [vmem:[%s1475_s7 + $0x4c] sm:$0xf] %v264_v19  ;;  %v266_v20 = vld [vmem:[%s1471_s6 + $0xa0] sm:$0xf]  ;;  %v268_v21 = vld [vmem:[%s1471_s6 + $0xa8] sm:$0xf] }
  0x23   : > { %v270_v22 = vld [vmem:[%s1471_s6 + $0xb0] sm:$0xf]  ;;  %267 = vst [vmem:[%s1475_s7 + $0x50] sm:$0xf] %v266_v20  ;;  %269 = vst [vmem:[%s1475_s7 + $0x54] sm:$0xf] %v268_v21 }
  0x24   : > { %271 = vst [vmem:[%s1475_s7 + $0x58] sm:$0xf] %v270_v22  ;;  %v272_v23 = vld [vmem:[%s1471_s6 + $0xb8] sm:$0xf]  ;;  %v274_v24 = vld [vmem:[%s1471_s6 + $0xc0] sm:$0xf] }
  0x25   : > { %v276_v25 = vld [vmem:[%s1471_s6 + $0xc8] sm:$0xf]  ;;  %273 = vst [vmem:[%s1475_s7 + $0x5c] sm:$0xf] %v272_v23  ;;  %275 = vst [vmem:[%s1475_s7 + $0x60] sm:$0xf] %v274_v24 }
  0x26   : > { %277 = vst [vmem:[%s1475_s7 + $0x64] sm:$0xf] %v276_v25  ;;  %v278_v26 = vld [vmem:[%s1471_s6 + $0xd0] sm:$0xf]  ;;  %v280_v27 = vld [vmem:[%s1471_s6 + $0xd8] sm:$0xf] }
  0x27   : > { %v282_v28 = vld [vmem:[%s1471_s6 + $0xe0] sm:$0xf]  ;;  %279 = vst [vmem:[%s1475_s7 + $0x68] sm:$0xf] %v278_v26  ;;  %281 = vst [vmem:[%s1475_s7 + $0x6c] sm:$0xf] %v280_v27 }
  0x28   : > { %283 = vst [vmem:[%s1475_s7 + $0x70] sm:$0xf] %v282_v28  ;;  %v284_v29 = vld [vmem:[%s1471_s6 + $0xe8] sm:$0xf]  ;;  %v286_v30 = vld [vmem:[%s1471_s6 + $0xf0] sm:$0xf] }
  0x29   : > { %v288_v31 = vld [vmem:[%s1471_s6 + $0xf8] sm:$0xf]  ;;  %285 = vst [vmem:[%s1475_s7 + $0x74] sm:$0xf] %v284_v29  ;;  %287 = vst [vmem:[%s1475_s7 + $0x78] sm:$0xf] %v286_v30 }
  0x2a   : > { %289 = vst [vmem:[%s1475_s7 + $0x7c] sm:$0xf] %v288_v31 }
  0x2b PF: > { %p1155_p8 = scmp.ge.s32.totalorder %s1393_s21, 1  ;;  %p382_p9 = scmp.lt.s32.totalorder %s1393_s21, 3 }
  0x2d   : > { %p383_p10 = pnand %p1155_p8, %p382_p9 }
  0x2e   : > { %s389_s8 = sand.u32 (!%p383_p10), 1, %s1377_s17   ;;  %p439_p11 = scmp.lt.s32.totalorder (!%p383_p10), %s1385_s19, 1 }
  0x2f   : > { %386 = sbr.rel (%p383_p10) target bundleno = 327 (0x147), region = 73  ;;  %s1542_s9 = sshll.u32 (!%p383_p10), %s389_s8, 7 }
  0x30   : > { %s1551_s14 = scalar_lea.vmem (!%p383_p10), [#allocation4], %s1542_s9  ;;  %s875_s5 = sld [smem:[#allocation3]] (!%p383_p10) }
  0x31   : > { %s1625_s10 = scalar_lea.vmem (!%p383_p10), [#allocation5], %s1542_s9 }
  0x34   : > { %v1333_v32 = vld [vmem:[%s1709_s1 + $0x4] ss:$8 sps:$4 sm:$0xff]   ;;  %v1315_v34 = vld [vmem:[%s1551_s14 + $0x78] sm:$0xff]   ;;  %v1317_v36 = vld [vmem:[%s1551_s14 + $0x70] sm:$0xff]   ;;  %s440_s30 = scalar_select %p439_p11, %s1385_s19, 1 }
  0x35   : > { %v1336_v33 = vld [vmem:[%s1709_s1 + $0x44] ss:$8 sps:$4 sm:$0xff]   ;;  %736 = vmatprep.mubr.bf16.mxu0 %v1333_v32  ;;  %v1316_v35 = vld [vmem:[%s1551_s14 + $0x38] sm:$0xff]   ;;  %1195 = vmatprep.subr.bf16.mxu0 %v1315_v34  ;;  %v1318_v37 = vld [vmem:[%s1551_s14 + $0x30] sm:$0xff]   ;;  %s1192_s9 = sshll.u32 (%p1458_p6), %s1385_s19, 3 }
  0x36   : > { %768 = vmatprep.mubr.bf16.mxu1 %v1336_v33  ;;  %1259 = vmatprep.subr.bf16.mxu1 %v1315_v34  ;;  %v1319_v38 = vld [vmem:[%s1551_s14 + $0x68] sm:$0xff]   ;;  %v1321_v40 = vld [vmem:[%s1551_s14 + $0x60] sm:$0xff]   ;;  %v1323_v42 = vld [vmem:[%s1551_s14 + $0x58] sm:$0xff]   ;;  %s441_s8 = scalar_lea.vmem %s1711_s3, %s440_s30  ;;  %v1618_v7 = vstv %s875_s5  ;;  %s952_s13 = scalar_lea.vmem (%p1458_p6), %s1712_s4, %s1192_s9 }
  0x37   : > { %1196 = vmatpush3.bf16.msra.mxu0 %v1316_v35  ;;  %1267 = vmatpush3.bf16.msra.mxu1 %v1316_v35  ;;  %v1320_v39 = vld [vmem:[%s1551_s14 + $0x28] sm:$0xff]   ;;  %v1322_v41 = vld [vmem:[%s1551_s14 + $0x20] sm:$0xff]   ;;  %v1324_v43 = vld [vmem:[%s1551_s14 + $0x18] sm:$0xff]  }
  0x38   : > { %1197 = vmatprep.subr.bf16.mxu0 %v1317_v36  ;;  %1260 = vmatprep.subr.bf16.mxu1 %v1317_v36  ;;  %v1325_v44 = vld [vmem:[%s1551_s14 + $0x50] sm:$0xff]   ;;  %v1327_v46 = vld [vmem:[%s1551_s14 + $0x48] sm:$0xff]   ;;  %v1329_v48 = vld [vmem:[%s1551_s14 + $0x40] sm:$0xff]  }
  0x39   : > { %v1326_v45 = vld [vmem:[%s1551_s14 + $0x10] sm:$0xff]   ;;  %v1328_v47 = vld [vmem:[%s1551_s14 + $0x8] sm:$0xff]   ;;  %v1330_v49 = vld [vmem:[%s1551_s14] sm:$0xff]  }
  0x3a   : > { %v1331_v50 = vld [vmem:[%s1709_s1] ss:$8 sps:$4 sm:$0xff]   ;;  %v1337_v52 = vld [vmem:[%s1709_s1 + $0x14] ss:$8 sps:$4 sm:$0xff]   ;;  %v1341_v54 = vld [vmem:[%s1709_s1 + $0x10] ss:$8 sps:$4 sm:$0xff]  }
  0x3b   : > { %1198 = vmatpush3.bf16.msra.mxu0 %v1318_v37  ;;  %1268 = vmatpush3.bf16.msra.mxu1 %v1318_v37  ;;  %v1334_v51 = vld [vmem:[%s1709_s1 + $0x40] ss:$8 sps:$4 sm:$0xff]   ;;  %v1339_v53 = vld [vmem:[%s1709_s1 + $0x54] ss:$8 sps:$4 sm:$0xff]   ;;  %v1342_v55 = vld [vmem:[%s1709_s1 + $0x50] ss:$8 sps:$4 sm:$0xff]  }
  0x3c   : > { %1199 = vmatprep.subr.bf16.mxu0 %v1319_v38  ;;  %1261 = vmatprep.subr.bf16.mxu1 %v1319_v38  ;;  %v1343_v56 = vld [vmem:[%s1709_s1 + $0x24] ss:$8 sps:$4 sm:$0xff]   ;;  %v1347_v58 = vld [vmem:[%s1709_s1 + $0x20] ss:$8 sps:$4 sm:$0xff]   ;;  %v1349_v60 = vld [vmem:[%s1709_s1 + $0x34] ss:$8 sps:$4 sm:$0xff]  }
  0x3d   : > { %v1345_v57 = vld [vmem:[%s1709_s1 + $0x64] ss:$8 sps:$4 sm:$0xff]   ;;  %v1348_v59 = vld [vmem:[%s1709_s1 + $0x60] ss:$8 sps:$4 sm:$0xff]   ;;  %v1351_v61 = vld [vmem:[%s1709_s1 + $0x74] ss:$8 sps:$4 sm:$0xff]  }
  0x3e   : > { %v1353_v62 = vld [vmem:[%s1709_s1 + $0x30] ss:$8 sps:$4 sm:$0xff]   ;;  %v1616_v3 = vld [vmem:[%s441_s8] ss:$0 sm:$0xff] }
  0x3f   : > { %1200 = vmatpush3.bf16.msra.mxu0 %v1320_v39  ;;  %1269 = vmatpush3.bf16.msra.mxu1 %v1320_v39  ;;  %v1354_v63 = vld [vmem:[%s1709_s1 + $0x70] ss:$8 sps:$4 sm:$0xff]  }
  0x40   : > { %1201 = vmatprep.subr.bf16.mxu0 %v1321_v40  ;;  %1262 = vmatprep.subr.bf16.mxu1 %v1321_v40 }
  0x43   : > { %1202 = vmatpush3.bf16.msra.mxu0 %v1322_v41  ;;  %1270 = vmatpush3.bf16.msra.mxu1 %v1322_v41 }
  0x44   : > { %1203 = vmatprep.subr.bf16.mxu0 %v1323_v42  ;;  %1263 = vmatprep.subr.bf16.mxu1 %v1323_v42 }
  0x47   : > { %1204 = vmatpush3.bf16.msra.mxu0 %v1324_v43  ;;  %1271 = vmatpush3.bf16.msra.mxu1 %v1324_v43 }
  0x48   : > { %1205 = vmatprep.subr.bf16.mxu0 %v1325_v44  ;;  %1264 = vmatprep.subr.bf16.mxu1 %v1325_v44 }
  0x4b   : > { %1206 = vmatpush3.bf16.msra.mxu0 %v1326_v45  ;;  %1272 = vmatpush3.bf16.msra.mxu1 %v1326_v45 }
  0x4c   : > { %1207 = vmatprep.subr.bf16.mxu0 %v1327_v46  ;;  %1265 = vmatprep.subr.bf16.mxu1 %v1327_v46 }
  0x4f   : > { %1208 = vmatpush3.bf16.msra.mxu0 %v1328_v47  ;;  %1273 = vmatpush3.bf16.msra.mxu1 %v1328_v47 }
  0x50   : > { %1209 = vmatprep.subr.bf16.mxu0 %v1329_v48  ;;  %1266 = vmatprep.subr.bf16.mxu1 %v1329_v48 }
  0x53   : > { %1210 = vmatpush3.bf16.msra.mxu0 %v1330_v49  ;;  %1274 = vmatpush3.bf16.msra.mxu1 %v1330_v49 }
  0x56   : > { %737 = vmatmul.mubr.bf16.vlgmr.msra.gmra.mxu0 %v1331_v50  ;;  %769 = vmatmul.mubr.bf16.vlgmr.msra.gmra.mxu1 %v1334_v51 }
  0x57   : > { %744 = vmatprep.mubr.bf16.mxu0 %v1337_v52  ;;  %776 = vmatprep.mubr.bf16.mxu1 %v1339_v53 }
  0x5e   : > { %745 = vmatmul.mubr.bf16.gmra.mxu0 %v1341_v54  ;;  %777 = vmatmul.mubr.bf16.gmra.mxu1 %v1342_v55 }
  0x5f   : > { %752 = vmatprep.mubr.bf16.mxu0 %v1343_v56  ;;  %784 = vmatprep.mubr.bf16.mxu1 %v1345_v57 }
  0x66   : > { %753 = vmatmul.mubr.bf16.gmra.mxu0 %v1347_v58  ;;  %785 = vmatmul.mubr.bf16.gmra.mxu1 %v1348_v59 }
  0x67   : > { %760 = vmatprep.mubr.bf16.mxu0 %v1349_v60  ;;  %792 = vmatprep.mubr.bf16.mxu1 %v1351_v61 }
  0x6e   : > { %761 = vmatmul.mubr.bf16.gmra.mxu0 %v1353_v62  ;;  %793 = vmatmul.mubr.bf16.gmra.mxu1 %v1354_v63 }
 0x116   : > { %v1211_v0 = vpop.f32.mrf.mxu0  ;;  %v1235_v1 = vpop.f32.mrf.mxu1 }
 0x118   : > { %v1212_v2 = vpop.f32.mrf.mxu0  ;;  %v1236_v4 = vpop.f32.mrf.mxu1 }
 0x119   : > { %v1213_v5 = vadd.f32 %v1212_v2, %v1211_v0  ;;  %v1237_v6 = vadd.f32 %v1236_v4, %v1235_v1 }
 0x11a   : > { %v1214_v8 = vpop.f32.mrf.mxu0  ;;  %v1238_v9 = vpop.f32.mrf.mxu1 }
 0x11b   : > { %v859_v10 = vadd.f32 %v1213_v5, %v1616_v3  ;;  %v867_v11 = vadd.f32 %v1237_v6, %v1616_v3 }
 0x11c   : > { %v1215_v12 = vpop.f32.mrf.mxu0  ;;  %v1239_v13 = vpop.f32.mrf.mxu1 }
 0x11d   : > { %vm876_vm0 = vcmp.ge.f32.partialorder %v859_v10, 0.0  ;;  %v893_v14 = vmul.f32 %v1618_v7, %v859_v10  ;;  %vm884_vm1 = vcmp.ge.f32.partialorder %v867_v11, 0.0  ;;  %v901_v15 = vmul.f32 %v1618_v7, %v867_v11 }
 0x11e   : > { %v1216_v16 = vadd.f32 %v1215_v12, %v1214_v8  ;;  %v1240_v17 = vadd.f32 %v1239_v13, %v1238_v9  ;;  %v1217_v18 = vpop.f32.mrf.mxu0  ;;  %v1241_v19 = vpop.f32.mrf.mxu1 }
 0x11f   : > { %v909_v20 = vsel %vm876_vm0, %v859_v10, %v893_v14  ;;  %v917_v21 = vsel %vm884_vm1, %v867_v11, %v901_v15 }
 0x120   : > { %925 = vst [vmem:[%s1625_s10] sm:$0xff] %v909_v20  ;;  %933 = vst [vmem:[%s1625_s10 + $0x40] sm:$0xff] %v917_v21  ;;  %v860_v22 = vadd.f32 %v1216_v16, %v1616_v3  ;;  %v868_v23 = vadd.f32 %v1240_v17, %v1616_v3  ;;  %v1218_v24 = vpop.f32.mrf.mxu0  ;;  %v1242_v25 = vpop.f32.mrf.mxu1 }
 0x121   : > { %v1219_v26 = vadd.f32 %v1218_v24, %v1217_v18  ;;  %v1243_v27 = vadd.f32 %v1242_v25, %v1241_v19 }
 0x122   : > { %vm877_vm2 = vcmp.ge.f32.partialorder %v860_v22, 0.0  ;;  %v894_v28 = vmul.f32 %v1618_v7, %v860_v22  ;;  %vm885_vm3 = vcmp.ge.f32.partialorder %v868_v23, 0.0  ;;  %v902_v29 = vmul.f32 %v1618_v7, %v868_v23  ;;  %v1220_v30 = vpop.f32.mrf.mxu0  ;;  %v1244_v31 = vpop.f32.mrf.mxu1 }
 0x123   : > { %v861_v32 = vadd.f32 %v1219_v26, %v1616_v3  ;;  %v869_v33 = vadd.f32 %v1243_v27, %v1616_v3 }
 0x124   : > { %v910_v34 = vsel %vm877_vm2, %v860_v22, %v894_v28  ;;  %v918_v35 = vsel %vm885_vm3, %v868_v23, %v902_v29  ;;  %v1221_v36 = vpop.f32.mrf.mxu0  ;;  %v1245_v37 = vpop.f32.mrf.mxu1 }
 0x125   : > { %926 = vst [vmem:[%s1625_s10 + $0x8] sm:$0xff] %v910_v34  ;;  %934 = vst [vmem:[%s1625_s10 + $0x48] sm:$0xff] %v918_v35  ;;  %vm878_vm4 = vcmp.ge.f32.partialorder %v861_v32, 0.0  ;;  %v895_v38 = vmul.f32 %v1618_v7, %v861_v32  ;;  %vm886_vm5 = vcmp.ge.f32.partialorder %v869_v33, 0.0  ;;  %v903_v39 = vmul.f32 %v1618_v7, %v869_v33 }
 0x126   : > { %v1222_v40 = vadd.f32 %v1221_v36, %v1220_v30  ;;  %v1246_v41 = vadd.f32 %v1245_v37, %v1244_v31  ;;  %v1223_v42 = vpop.f32.mrf.mxu0  ;;  %v1247_v43 = vpop.f32.mrf.mxu1 }
 0x127   : > { %v911_v44 = vsel %vm878_vm4, %v861_v32, %v895_v38  ;;  %v919_v45 = vsel %vm886_vm5, %v869_v33, %v903_v39 }
 0x128   : > { %927 = vst [vmem:[%s1625_s10 + $0x10] sm:$0xff] %v911_v44  ;;  %935 = vst [vmem:[%s1625_s10 + $0x50] sm:$0xff] %v919_v45  ;;  %v862_v46 = vadd.f32 %v1222_v40, %v1616_v3  ;;  %v870_v47 = vadd.f32 %v1246_v41, %v1616_v3  ;;  %v1224_v48 = vpop.f32.mrf.mxu0  ;;  %v1248_v49 = vpop.f32.mrf.mxu1 }
 0x129   : > { %v1225_v50 = vadd.f32 %v1224_v48, %v1223_v42  ;;  %v1249_v51 = vadd.f32 %v1248_v49, %v1247_v43  ;;  %v1027_v42 = vld [vmem:[%s1625_s10 + $0x40] sm:$0xff] (%p1458_p6) }
 0x12a   : > { %vm879_vm6 = vcmp.ge.f32.partialorder %v862_v46, 0.0  ;;  %v896_v52 = vmul.f32 %v1618_v7, %v862_v46  ;;  %vm887_vm7 = vcmp.ge.f32.partialorder %v870_v47, 0.0  ;;  %v904_v53 = vmul.f32 %v1618_v7, %v870_v47  ;;  %v1226_v54 = vpop.f32.mrf.mxu0  ;;  %v1250_v55 = vpop.f32.mrf.mxu1  ;;  %1028 = vst [vmem:[%s952_s13 + $0x80] sm:$0xff] (%p1458_p6), %v1027_v42 }
 0x12b   : > { %v863_v56 = vadd.f32 %v1225_v50, %v1616_v3  ;;  %v871_v57 = vadd.f32 %v1249_v51, %v1616_v3 }
 0x12c   : > { %v912_v58 = vsel %vm879_vm6, %v862_v46, %v896_v52  ;;  %v920_v59 = vsel %vm887_vm7, %v870_v47, %v904_v53  ;;  %v1227_v60 = vpop.f32.mrf.mxu0  ;;  %v1251_v61 = vpop.f32.mrf.mxu1  ;;  %v1029_v43 = vld [vmem:[%s1625_s10 + $0x48] sm:$0xff] (%p1458_p6) }
 0x12d   : > { %928 = vst [vmem:[%s1625_s10 + $0x18] sm:$0xff] %v912_v58  ;;  %936 = vst [vmem:[%s1625_s10 + $0x58] sm:$0xff] %v920_v59  ;;  %vm880_vm8 = vcmp.ge.f32.partialorder %v863_v56, 0.0  ;;  %v897_v62 = vmul.f32 %v1618_v7, %v863_v56  ;;  %vm888_vm9 = vcmp.ge.f32.partialorder %v871_v57, 0.0  ;;  %v905_v63 = vmul.f32 %v1618_v7, %v871_v57 }
 0x12e   : > { %v1228_v0 = vadd.f32 %v1227_v60, %v1226_v54  ;;  %v1252_v1 = vadd.f32 %v1251_v61, %v1250_v55  ;;  %v1229_v2 = vpop.f32.mrf.mxu0  ;;  %v1253_v4 = vpop.f32.mrf.mxu1  ;;  %1030 = vst [vmem:[%s952_s13 + $0x90] sm:$0xff] (%p1458_p6), %v1029_v43 }
 0x12f   : > { %v913_v5 = vsel %vm880_vm8, %v863_v56, %v897_v62  ;;  %v921_v6 = vsel %vm888_vm9, %v871_v57, %v905_v63  ;;  %v1015_v36 = vld [vmem:[%s1625_s10 + $0x10] sm:$0xff] (%p1458_p6) }
 0x130   : > { %929 = vst [vmem:[%s1625_s10 + $0x20] sm:$0xff] %v913_v5  ;;  %937 = vst [vmem:[%s1625_s10 + $0x60] sm:$0xff] %v921_v6  ;;  %v864_v8 = vadd.f32 %v1228_v0, %v1616_v3  ;;  %v872_v9 = vadd.f32 %v1252_v1, %v1616_v3  ;;  %v1230_v10 = vpop.f32.mrf.mxu0  ;;  %v1254_v11 = vpop.f32.mrf.mxu1  ;;  %v1031_v44 = vld [vmem:[%s1625_s10 + $0x50] sm:$0xff] (%p1458_p6) }
 0x131   : > { %v1231_v12 = vadd.f32 %v1230_v10, %v1229_v2  ;;  %v1255_v13 = vadd.f32 %v1254_v11, %v1253_v4  ;;  %1016 = vst [vmem:[%s952_s13 + $0x20] sm:$0xff] (%p1458_p6), %v1015_v36  ;;  %1032 = vst [vmem:[%s952_s13 + $0xa0] sm:$0xff] (%p1458_p6), %v1031_v44 }
 0x132   : > { %vm881_vm10 = vcmp.ge.f32.partialorder %v864_v8, 0.0  ;;  %v898_v14 = vmul.f32 %v1618_v7, %v864_v8  ;;  %vm889_vm11 = vcmp.ge.f32.partialorder %v872_v9, 0.0  ;;  %v906_v15 = vmul.f32 %v1618_v7, %v872_v9  ;;  %v1232_v16 = vpop.f32.mrf.mxu0  ;;  %v1256_v17 = vpop.f32.mrf.mxu1 }
 0x133   : > { %v865_v18 = vadd.f32 %v1231_v12, %v1616_v3  ;;  %v873_v19 = vadd.f32 %v1255_v13, %v1616_v3 }
 0x134   : > { %v914_v20 = vsel %vm881_vm10, %v864_v8, %v898_v14  ;;  %v922_v21 = vsel %vm889_vm11, %v872_v9, %v906_v15  ;;  %v1233_v22 = vpop.f32.mrf.mxu0  ;;  %v1257_v23 = vpop.f32.mrf.mxu1  ;;  %v1017_v37 = vld [vmem:[%s1625_s10 + $0x18] sm:$0xff] (%p1458_p6) }
 0x135   : > { %930 = vst [vmem:[%s1625_s10 + $0x28] sm:$0xff] %v914_v20  ;;  %938 = vst [vmem:[%s1625_s10 + $0x68] sm:$0xff] %v922_v21  ;;  %vm882_vm12 = vcmp.ge.f32.partialorder %v865_v18, 0.0  ;;  %v899_v24 = vmul.f32 %v1618_v7, %v865_v18  ;;  %vm890_vm13 = vcmp.ge.f32.partialorder %v873_v19, 0.0  ;;  %v907_v25 = vmul.f32 %v1618_v7, %v873_v19  ;;  %v1033_v45 = vld [vmem:[%s1625_s10 + $0x58] sm:$0xff] (%p1458_p6) }
 0x136   : > { %v1234_v26 = vadd.f32 %v1233_v22, %v1232_v16  ;;  %v1258_v27 = vadd.f32 %v1257_v23, %v1256_v17  ;;  %1018 = vst [vmem:[%s952_s13 + $0x30] sm:$0xff] (%p1458_p6), %v1017_v37  ;;  %1034 = vst [vmem:[%s952_s13 + $0xb0] sm:$0xff] (%p1458_p6), %v1033_v45 }
 0x137   : > { %v915_v28 = vsel %vm882_vm12, %v865_v18, %v899_v24  ;;  %v923_v29 = vsel %vm890_vm13, %v873_v19, %v907_v25  ;;  %v1019_v38 = vld [vmem:[%s1625_s10 + $0x20] sm:$0xff] (%p1458_p6) }
 0x138   : > { %931 = vst [vmem:[%s1625_s10 + $0x30] sm:$0xff] %v915_v28  ;;  %939 = vst [vmem:[%s1625_s10 + $0x70] sm:$0xff] %v923_v29  ;;  %v866_v30 = vadd.f32 %v1234_v26, %v1616_v3  ;;  %v874_v31 = vadd.f32 %v1258_v27, %v1616_v3  ;;  %v1011_v3 = vld [vmem:[%s1625_s10] sm:$0xff] (%p1458_p6) }
 0x139   : > { %947 = sbr.rel (!%p1458_p6) target bundleno = 327 (0x147), region = 89  ;;  %1012 = vst [vmem:[%s952_s13] sm:$0xff] (%p1458_p6), %v1011_v3  ;;  %1020 = vst [vmem:[%s952_s13 + $0x40] sm:$0xff] (%p1458_p6), %v1019_v38  ;;  %v1035_v46 = vld [vmem:[%s1625_s10 + $0x60] sm:$0xff] (%p1458_p6) }
 0x13a   : > { %vm883_vm14 = vcmp.ge.f32.partialorder %v866_v30, 0.0  ;;  %v900_v32 = vmul.f32 %v1618_v7, %v866_v30  ;;  %vm891_vm15 = vcmp.ge.f32.partialorder %v874_v31, 0.0  ;;  %v908_v33 = vmul.f32 %v1618_v7, %v874_v31  ;;  %v1013_v7 = vld [vmem:[%s1625_s10 + $0x8] sm:$0xff] (%p1458_p6)  ;;  %1036 = vst [vmem:[%s952_s13 + $0xc0] sm:$0xff] (%p1458_p6), %v1035_v46 }
 0x13b   : > { %1014 = vst [vmem:[%s952_s13 + $0x10] sm:$0xff] (%p1458_p6), %v1013_v7 }
 0x13c   : > { %v916_v34 = vsel %vm883_vm14, %v866_v30, %v900_v32  ;;  %v924_v35 = vsel %vm891_vm15, %v874_v31, %v908_v33  ;;  %v1021_v39 = vld [vmem:[%s1625_s10 + $0x28] sm:$0xff] (%p1458_p6) }
 0x13d   : > { %932 = vst [vmem:[%s1625_s10 + $0x38] sm:$0xff] %v916_v34  ;;  %940 = vst [vmem:[%s1625_s10 + $0x78] sm:$0xff] %v924_v35  ;;  %v1037_v47 = vld [vmem:[%s1625_s10 + $0x68] sm:$0xff] (%p1458_p6) }
 0x13e   : > { %1022 = vst [vmem:[%s952_s13 + $0x50] sm:$0xff] %v1021_v39  ;;  %1038 = vst [vmem:[%s952_s13 + $0xd0] sm:$0xff] %v1037_v47 }
 0x13f   : > { %v1023_v40 = vld [vmem:[%s1625_s10 + $0x30] sm:$0xff] }
 0x140   : > { %1024 = vst [vmem:[%s952_s13 + $0x60] sm:$0xff] %v1023_v40  ;;  %v1039_v48 = vld [vmem:[%s1625_s10 + $0x70] sm:$0xff] }
 0x141   : > { %1040 = vst [vmem:[%s952_s13 + $0xe0] sm:$0xff] %v1039_v48 }
 0x144   : > { %v1025_v41 = vld [vmem:[%s1625_s10 + $0x38] sm:$0xff] }
 0x145   : > { %1026 = vst [vmem:[%s952_s13 + $0x70] sm:$0xff] %v1025_v41  ;;  %v1041_v49 = vld [vmem:[%s1625_s10 + $0x78] sm:$0xff] }
 0x146   : > { %1042 = vst [vmem:[%s952_s13 + $0xf0] sm:$0xff] %v1041_v49 }
 0x147 PF: > { %s15_s21 = sadd.s32 1, %s1393_s21   ;;  %s1714_s17 = smov %s1381_s18 }
 0x148   : > { %p12_p12 = scmp.ge.s32.totalorder %s15_s21, 4   ;;  %s1715_s18 = smov %s1463_s26 }
 0x149   : > { %s1716_s19 = smov %s1389_s20  ;;  %s1717_s20 = smov %s1719_s0 }
 0x14a   :  { %14 = sbr.rel (!%p12_p12) target bundleno = 5 (0x5), region = 164 }

// kernel: d_dbpn_forward.22
= control target key start
LH: loop header
LB: loop body
LE: loop exit
PB: predicated region body
PF: predicated region fallthrough
CT: control target
= control target key end

     0   :  { %s2617_s2 = inlined_call_operand.vmem [shape: bf16[1024,128], index: 2, kind: input, shape index: {}]   ;;  %s2618_s1 = inlined_call_operand.vmem [shape: bf16[128,1024], index: 1, kind: input, shape index: {}]   ;;  %s2619_s3 = inlined_call_operand.vmem [shape: f32[1,128], index: 3, kind: input, shape index: {}]   ;;  %s2620_s0 = inlined_call_operand.<no memory space> [shape: f32[1], index: 0, kind: input, shape index: {}]   ;;  %s2621_s4 = inlined_call_operand.vmem [shape: f32[128,128], index: 4, kind: output, shape index: {}]  }
   0x1   :  { %v1868_v0 = vld [vmem:[%s2617_s2 + $0x78] sm:$0xff]   ;;  %v1872_v4 = vld [vmem:[%s2617_s2 + $0x70] sm:$0xff]   ;;  %v1876_v8 = vld [vmem:[%s2617_s2 + $0x68] sm:$0xff]  }
   0x2   :  { %v1869_v1 = vld [vmem:[%s2617_s2 + $0xf8] sm:$0xff]   ;;  %1612 = vmatprep.subr.bf16.mxu0 %v1868_v0  ;;  %v1873_v5 = vld [vmem:[%s2617_s2 + $0xf0] sm:$0xff]   ;;  %v1877_v9 = vld [vmem:[%s2617_s2 + $0xe8] sm:$0xff]  }
   0x3   :  { %v1870_v2 = vld [vmem:[%s2617_s2 + $0x38] sm:$0xff]   ;;  %1676 = vmatprep.subr.bf16.mxu1 %v1869_v1  ;;  %v1874_v6 = vld [vmem:[%s2617_s2 + $0x30] sm:$0xff]   ;;  %v1878_v10 = vld [vmem:[%s2617_s2 + $0x28] sm:$0xff]  }
   0x4   :  { %v1871_v3 = vld [vmem:[%s2617_s2 + $0xb8] sm:$0xff]   ;;  %1613 = vmatpush3.bf16.msra.mxu0 %v1870_v2  ;;  %v1875_v7 = vld [vmem:[%s2617_s2 + $0xb0] sm:$0xff]   ;;  %v1879_v11 = vld [vmem:[%s2617_s2 + $0xa8] sm:$0xff]  }
   0x5   :  { %1677 = vmatpush3.bf16.msra.mxu1 %v1871_v3  ;;  %1614 = vmatprep.subr.bf16.mxu0 %v1872_v4  ;;  %v1880_v12 = vld [vmem:[%s2617_s2 + $0x60] sm:$0xff]   ;;  %v1884_v16 = vld [vmem:[%s2617_s2 + $0x58] sm:$0xff]   ;;  %v1888_v20 = vld [vmem:[%s2617_s2 + $0x50] sm:$0xff]  }
   0x6   :  { %1678 = vmatprep.subr.bf16.mxu1 %v1873_v5  ;;  %v1881_v13 = vld [vmem:[%s2617_s2 + $0xe0] sm:$0xff]   ;;  %v1885_v17 = vld [vmem:[%s2617_s2 + $0xd8] sm:$0xff]   ;;  %v1889_v21 = vld [vmem:[%s2617_s2 + $0xd0] sm:$0xff]  }
   0x7   :  { %v1882_v14 = vld [vmem:[%s2617_s2 + $0x20] sm:$0xff]   ;;  %v1886_v18 = vld [vmem:[%s2617_s2 + $0x18] sm:$0xff]   ;;  %v1890_v22 = vld [vmem:[%s2617_s2 + $0x10] sm:$0xff]  }
   0x8   :  { %1615 = vmatpush3.bf16.msra.mxu0 %v1874_v6  ;;  %v1883_v15 = vld [vmem:[%s2617_s2 + $0xa0] sm:$0xff]   ;;  %v1887_v19 = vld [vmem:[%s2617_s2 + $0x98] sm:$0xff]   ;;  %v1891_v23 = vld [vmem:[%s2617_s2 + $0x90] sm:$0xff]  }
   0x9   :  { %1679 = vmatpush3.bf16.msra.mxu1 %v1875_v7  ;;  %1616 = vmatprep.subr.bf16.mxu0 %v1876_v8  ;;  %v1892_v24 = vld [vmem:[%s2617_s2 + $0x48] sm:$0xff]   ;;  %v1896_v28 = vld [vmem:[%s2617_s2 + $0x40] sm:$0xff]   ;;  %v1900_v40 = vld [vmem:[%s2617_s2 + $0x178] sm:$0xff]  }
   0xa   :  { %1680 = vmatprep.subr.bf16.mxu1 %v1877_v9  ;;  %v1893_v25 = vld [vmem:[%s2617_s2 + $0xc8] sm:$0xff]   ;;  %v1897_v29 = vld [vmem:[%s2617_s2 + $0xc0] sm:$0xff]   ;;  %v1901_v41 = vld [vmem:[%s2617_s2 + $0x138] sm:$0xff]  }
   0xb   :  { %v1894_v26 = vld [vmem:[%s2617_s2 + $0x8] sm:$0xff]   ;;  %v1898_v30 = vld [vmem:[%s2617_s2] sm:$0xff]   ;;  %v1902_v42 = vld [vmem:[%s2617_s2 + $0x1f8] sm:$0xff]  }
   0xc   :  { %1617 = vmatpush3.bf16.msra.mxu0 %v1878_v10  ;;  %v1895_v27 = vld [vmem:[%s2617_s2 + $0x88] sm:$0xff]   ;;  %v1899_v31 = vld [vmem:[%s2617_s2 + $0x80] sm:$0xff]   ;;  %v1903_v43 = vld [vmem:[%s2617_s2 + $0x1b8] sm:$0xff]  }
   0xd   :  { %1681 = vmatpush3.bf16.msra.mxu1 %v1879_v11  ;;  %1618 = vmatprep.subr.bf16.mxu0 %v1880_v12  ;;  %v55_v32 = vld [vmem:[%s2618_s1] sm:$0xff]  ;;  %v56_v34 = vld [vmem:[%s2618_s1 + $0x8] sm:$0xff]  ;;  %v1904_v50 = vld [vmem:[%s2617_s2 + $0x170] sm:$0xff]  }
   0xe   :  { %1682 = vmatprep.subr.bf16.mxu1 %v1881_v13  ;;  %v59_v33 = vld [vmem:[%s2618_s1 + $0x20] sm:$0xff]  ;;  %v60_v37 = vld [vmem:[%s2618_s1 + $0x28] sm:$0xff]  ;;  %v1905_v52 = vld [vmem:[%s2617_s2 + $0x130] sm:$0xff]  }
   0xf   :  { %v1483_v35 = vcombine.low %v55_v32, %v59_v33  ;;  %v1484_v36 = vcombine.high %v55_v32, %v59_v33  ;;  %v1485_v38 = vcombine.low %v56_v34, %v60_v37  ;;  %v1486_v39 = vcombine.high %v56_v34, %v60_v37  ;;  %v63_v44 = vld [vmem:[%s2618_s1 + $0x40] sm:$0xff]  ;;  %v64_v47 = vld [vmem:[%s2618_s1 + $0x48] sm:$0xff]  ;;  %v1906_v54 = vld [vmem:[%s2617_s2 + $0x1f0] sm:$0xff]  }
  0x10   :  { %1619 = vmatpush3.bf16.msra.mxu0 %v1882_v14  ;;  %v67_v45 = vld [vmem:[%s2618_s1 + $0x60] sm:$0xff]  ;;  %v68_v48 = vld [vmem:[%s2618_s1 + $0x68] sm:$0xff]  ;;  %v1907_v55 = vld [vmem:[%s2617_s2 + $0x1b0] sm:$0xff]  }
  0x11   :  { %1683 = vmatpush3.bf16.msra.mxu1 %v1883_v15  ;;  %1620 = vmatprep.subr.bf16.mxu0 %v1884_v16  ;;  %v1492_v46 = vcombine.high %v63_v44, %v67_v45  ;;  %v1494_v49 = vcombine.high %v64_v47, %v68_v48  ;;  %v1491_v51 = vcombine.low %v63_v44, %v67_v45  ;;  %v71_v56 = vld [vmem:[%s2618_s1 + $0x80] sm:$0xff]  ;;  %v72_v58 = vld [vmem:[%s2618_s1 + $0x88] sm:$0xff]  ;;  %v1922_v32 = vld [vmem:[%s2617_s2 + $0x1d0] sm:$0xff]  }
  0x12   :  { %1684 = vmatprep.subr.bf16.mxu1 %v1885_v17  ;;  %983 = vmatprep.mubr.bf16.mxu0 %v1484_v36  ;;  %v1493_v53 = vcombine.low %v64_v47, %v68_v48  ;;  %v75_v57 = vld [vmem:[%s2618_s1 + $0xa0] sm:$0xff]  ;;  %v76_v59 = vld [vmem:[%s2618_s1 + $0xa8] sm:$0xff]  ;;  %v1923_v33 = vld [vmem:[%s2617_s2 + $0x190] sm:$0xff]  }
  0x13   :  { %1080 = vmatprep.mubr.bf16.mxu1 %v1486_v39  ;;  %v1500_v60 = vcombine.high %v71_v56, %v75_v57  ;;  %v1502_v61 = vcombine.high %v72_v58, %v76_v59  ;;  %v1908_v62 = vld [vmem:[%s2617_s2 + $0x168] sm:$0xff]   ;;  %v1499_v2 = vcombine.low %v71_v56, %v75_v57  ;;  %v79_v3 = vld [vmem:[%s2618_s1 + $0xc0] sm:$0xff]  ;;  %v1501_v6 = vcombine.low %v72_v58, %v76_v59 }
  0x14   :  { %1621 = vmatpush3.bf16.msra.mxu0 %v1886_v18  ;;  %v1909_v63 = vld [vmem:[%s2617_s2 + $0x128] sm:$0xff]   ;;  %v83_v4 = vld [vmem:[%s2618_s1 + $0xe0] sm:$0xff]  ;;  %v1916_v18 = vld [vmem:[%s2617_s2 + $0x158] sm:$0xff]  }
  0x15   :  { %1685 = vmatpush3.bf16.msra.mxu1 %v1887_v19  ;;  %1622 = vmatprep.subr.bf16.mxu0 %v1888_v20  ;;  %v1910_v0 = vld [vmem:[%s2617_s2 + $0x1e8] sm:$0xff]   ;;  %v1508_v7 = vcombine.high %v79_v3, %v83_v4  ;;  %v1912_v10 = vld [vmem:[%s2617_s2 + $0x160] sm:$0xff]   ;;  %v1507_v19 = vcombine.low %v79_v3, %v83_v4  ;;  %v1917_v20 = vld [vmem:[%s2617_s2 + $0x118] sm:$0xff]  }
  0x16   :  { %1686 = vmatprep.subr.bf16.mxu1 %v1889_v21  ;;  %v1911_v1 = vld [vmem:[%s2617_s2 + $0x1a8] sm:$0xff]   ;;  %v1913_v11 = vld [vmem:[%s2617_s2 + $0x120] sm:$0xff]  }
  0x17   :  { %v80_v5 = vld [vmem:[%s2618_s1 + $0xc8] sm:$0xff]  ;;  %v1914_v12 = vld [vmem:[%s2617_s2 + $0x1e0] sm:$0xff]  }
  0x18   :  { %1623 = vmatpush3.bf16.msra.mxu0 %v1890_v22  ;;  %v84_v8 = vld [vmem:[%s2618_s1 + $0xe8] sm:$0xff]  ;;  %v1915_v13 = vld [vmem:[%s2617_s2 + $0x1a0] sm:$0xff]  }
  0x19   :  { %1687 = vmatpush3.bf16.msra.mxu1 %v1891_v23  ;;  %1624 = vmatprep.subr.bf16.mxu0 %v1892_v24  ;;  %v1510_v9 = vcombine.high %v80_v5, %v84_v8  ;;  %v87_v14 = vld [vmem:[%s2618_s1 + $0x100] sm:$0xff]  ;;  %v88_v16 = vld [vmem:[%s2618_s1 + $0x108] sm:$0xff]  ;;  %v1509_v21 = vcombine.low %v80_v5, %v84_v8  ;;  %v1918_v23 = vld [vmem:[%s2617_s2 + $0x1d8] sm:$0xff]  }
  0x1a   :  { %1688 = vmatprep.subr.bf16.mxu1 %v1893_v25  ;;  %v91_v15 = vld [vmem:[%s2618_s1 + $0x120] sm:$0xff]  ;;  %v92_v17 = vld [vmem:[%s2618_s1 + $0x128] sm:$0xff]  ;;  %v1919_v25 = vld [vmem:[%s2617_s2 + $0x198] sm:$0xff]  }
  0x1b   :  { %v1516_v22 = vcombine.high %v87_v14, %v91_v15  ;;  %v1518_v24 = vcombine.high %v88_v16, %v92_v17  ;;  %v1515_v34 = vcombine.low %v87_v14, %v91_v15  ;;  %v1925_v39 = vld [vmem:[%s2617_s2 + $0x108] sm:$0xff]   ;;  %v1929_v48 = vld [vmem:[%s2617_s2 + $0x100] sm:$0xff]   ;;  %v66_v8 = vld [vmem:[%s2618_s1 + $0x58] sm:$0xff] }
  0x1c   :  { %1625 = vmatpush3.bf16.msra.mxu0 %v1894_v26  ;;  %v95_v26 = vld [vmem:[%s2618_s1 + $0x140] sm:$0xff]  ;;  %v104_v44 = vld [vmem:[%s2618_s1 + $0x188] sm:$0xff]  ;;  %v73_v14 = vld [vmem:[%s2618_s1 + $0x90] sm:$0xff] }
  0x1d   :  { %1689 = vmatpush3.bf16.msra.mxu1 %v1895_v27  ;;  %1626 = vmatprep.subr.bf16.mxu0 %v1896_v28  ;;  %v99_v27 = vld [vmem:[%s2618_s1 + $0x160] sm:$0xff]  ;;  %v1920_v28 = vld [vmem:[%s2617_s2 + $0x150] sm:$0xff]   ;;  %v108_v45 = vld [vmem:[%s2618_s1 + $0x1a8] sm:$0xff] }
  0x1e   :  { %1690 = vmatprep.subr.bf16.mxu1 %v1897_v29  ;;  %v96_v29 = vld [vmem:[%s2618_s1 + $0x148] sm:$0xff]  ;;  %v1524_v36 = vcombine.high %v95_v26, %v99_v27  ;;  %v1523_v47 = vcombine.low %v95_v26, %v99_v27  ;;  %v1533_v59 = vcombine.low %v104_v44, %v108_v45  ;;  %v77_v15 = vld [vmem:[%s2618_s1 + $0xb0] sm:$0xff] }
  0x1f   :  { %v112_v56 = vld [vmem:[%s2618_s1 + $0x1c8] sm:$0xff]  ;;  %v1503_v26 = vcombine.low %v73_v14, %v77_v15 }
  0x20   :  { %1627 = vmatpush3.bf16.msra.mxu0 %v1898_v30  ;;  %v100_v30 = vld [vmem:[%s2618_s1 + $0x168] sm:$0xff] }
  0x21   :  { %1691 = vmatpush3.bf16.msra.mxu1 %v1899_v31  ;;  %1740 = vmatprep.subr.bf16.mxu0 %v1900_v40  ;;  %v1921_v31 = vld [vmem:[%s2617_s2 + $0x110] sm:$0xff]   ;;  %v1526_v37 = vcombine.high %v96_v29, %v100_v30  ;;  %v1926_v40 = vld [vmem:[%s2617_s2 + $0x1c8] sm:$0xff]  }
  0x22   :  { %1804 = vmatprep.subr.bf16.mxu1 %v1902_v42  ;;  %v107_v42 = vld [vmem:[%s2618_s1 + $0x1a0] sm:$0xff]  ;;  %v116_v57 = vld [vmem:[%s2618_s1 + $0x1e8] sm:$0xff] }
  0x23   :  { %984 = vmatmul.mubr.bf16.vlgmr.msra.gmra.mxu0 %v1483_v35  ;;  %v1517_v35 = vcombine.low %v88_v16, %v92_v17  ;;  %v1541_v3 = vcombine.low %v112_v56, %v116_v57  ;;  %v74_v16 = vld [vmem:[%s2618_s1 + $0x98] sm:$0xff] }
  0x24   :  { %1081 = vmatmul.mubr.bf16.vlgmr.msra.gmra.mxu1 %v1485_v38  ;;  %1741 = vmatpush3.bf16.msra.mxu0 %v1901_v41  ;;  %v1924_v38 = vld [vmem:[%s2617_s2 + $0x148] sm:$0xff]   ;;  %v103_v41 = vld [vmem:[%s2618_s1 + $0x180] sm:$0xff]  ;;  %v78_v17 = vld [vmem:[%s2618_s1 + $0xb8] sm:$0xff] }
  0x25   :  { %1805 = vmatpush3.bf16.msra.mxu1 %v1903_v43  ;;  %991 = vmatprep.mubr.bf16.mxu0 %v1492_v46  ;;  %v1927_v43 = vld [vmem:[%s2617_s2 + $0x188] sm:$0xff]   ;;  %v1928_v46 = vld [vmem:[%s2617_s2 + $0x140] sm:$0xff]   ;;  %v1531_v58 = vcombine.low %v103_v41, %v107_v42  ;;  %v1505_v27 = vcombine.low %v74_v16, %v78_v17 }
  0x26   :  { %1088 = vmatprep.mubr.bf16.mxu1 %v1494_v49  ;;  %1742 = vmatprep.subr.bf16.mxu0 %v1904_v50  ;;  %v1525_v49 = vcombine.low %v96_v29, %v100_v30  ;;  %v1532_v50 = vcombine.high %v103_v41, %v107_v42  ;;  %v89_v30 = vld [vmem:[%s2618_s1 + $0x110] sm:$0xff]  ;;  %v102_v41 = vld [vmem:[%s2618_s1 + $0x178] sm:$0xff] }
  0x27   :  { %1806 = vmatprep.subr.bf16.mxu1 %v1906_v54  ;;  %v111_v54 = vld [vmem:[%s2618_s1 + $0x1c0] sm:$0xff] }
  0x28   :  { %1743 = vmatpush3.bf16.msra.mxu0 %v1905_v52  ;;  %v1534_v52 = vcombine.high %v104_v44, %v108_v45 }
  0x29   :  { %1807 = vmatpush3.bf16.msra.mxu1 %v1907_v55  ;;  %1744 = vmatprep.subr.bf16.mxu0 %v1908_v62  ;;  %v115_v55 = vld [vmem:[%s2618_s1 + $0x1e0] sm:$0xff]  ;;  %v57_v62 = vld [vmem:[%s2618_s1 + $0x10] sm:$0xff] }
  0x2a   :  { %1808 = vmatprep.subr.bf16.mxu1 %v1910_v0  ;;  %v58_v0 = vld [vmem:[%s2618_s1 + $0x18] sm:$0xff] }
  0x2b   :  { %992 = vmatmul.mubr.bf16.gmra.mxu0 %v1491_v51  ;;  %v1930_v51 = vld [vmem:[%s2617_s2 + $0x1c0] sm:$0xff]  }
  0x2c   :  { %1089 = vmatmul.mubr.bf16.gmra.mxu1 %v1493_v53  ;;  %999 = vmatprep.mubr.bf16.mxu0 %v1500_v60  ;;  %v1931_v53 = vld [vmem:[%s2617_s2 + $0x180] sm:$0xff]   ;;  %v1540_v60 = vcombine.high %v111_v54, %v115_v55 }
  0x2d   :  { %1096 = vmatprep.mubr.bf16.mxu1 %v1502_v61  ;;  %1745 = vmatpush3.bf16.msra.mxu0 %v1909_v63  ;;  %v1542_v61 = vcombine.high %v112_v56, %v116_v57  ;;  %v61_v63 = vld [vmem:[%s2618_s1 + $0x30] sm:$0xff]  ;;  %v114_v56 = vld [vmem:[%s2618_s1 + $0x1d8] sm:$0xff] }
  0x2e   :  { %1809 = vmatpush3.bf16.msra.mxu1 %v1911_v1  ;;  %1746 = vmatprep.subr.bf16.mxu0 %v1912_v10  ;;  %v62_v1 = vld [vmem:[%s2618_s1 + $0x38] sm:$0xff]  ;;  %v1488_v4 = vcombine.high %v57_v62, %v61_v63  ;;  %v1487_v10 = vcombine.low %v57_v62, %v61_v63 }
  0x2f   :  { %1810 = vmatprep.subr.bf16.mxu1 %v1914_v12  ;;  %v1490_v5 = vcombine.high %v58_v0, %v62_v1  ;;  %v118_v57 = vld [vmem:[%s2618_s1 + $0x1f8] sm:$0xff] }
  0x30   :  { %v1545_v63 = vcombine.low %v114_v56, %v118_v57 }
  0x31   :  { %1747 = vmatpush3.bf16.msra.mxu0 %v1913_v11  ;;  %v1489_v11 = vcombine.low %v58_v0, %v62_v1 }
  0x32   :  { %1811 = vmatpush3.bf16.msra.mxu1 %v1915_v13  ;;  %1748 = vmatprep.subr.bf16.mxu0 %v1916_v18 }
  0x33   :  { %1000 = vmatmul.mubr.bf16.gmra.mxu0 %v1499_v2  ;;  %1812 = vmatprep.subr.bf16.mxu1 %v1918_v23  ;;  %v1539_v2 = vcombine.low %v111_v54, %v115_v55  ;;  %v85_v23 = vld [vmem:[%s2618_s1 + $0xf0] sm:$0xff] }
  0x34   :  { %1097 = vmatmul.mubr.bf16.gmra.mxu1 %v1501_v6  ;;  %1007 = vmatprep.mubr.bf16.mxu0 %v1508_v7  ;;  %v65_v6 = vld [vmem:[%s2618_s1 + $0x50] sm:$0xff] }
  0x35   :  { %1104 = vmatprep.mubr.bf16.mxu1 %v1510_v9  ;;  %1749 = vmatpush3.bf16.msra.mxu0 %v1917_v20  ;;  %v69_v7 = vld [vmem:[%s2618_s1 + $0x70] sm:$0xff]  ;;  %v70_v9 = vld [vmem:[%s2618_s1 + $0x78] sm:$0xff]  ;;  %v1504_v20 = vcombine.high %v73_v14, %v77_v15 }
  0x36   :  { %1813 = vmatpush3.bf16.msra.mxu1 %v1919_v25  ;;  %1750 = vmatprep.subr.bf16.mxu0 %v1920_v28  ;;  %v1496_v12 = vcombine.high %v65_v6, %v69_v7  ;;  %v1498_v13 = vcombine.high %v66_v8, %v70_v9  ;;  %v1495_v18 = vcombine.low %v65_v6, %v69_v7  ;;  %v86_v25 = vld [vmem:[%s2618_s1 + $0xf8] sm:$0xff]  ;;  %v113_v54 = vld [vmem:[%s2618_s1 + $0x1d0] sm:$0xff] }
  0x37   :  { %1814 = vmatprep.subr.bf16.mxu1 %v1922_v32  ;;  %v90_v32 = vld [vmem:[%s2618_s1 + $0x118] sm:$0xff]  ;;  %v117_v55 = vld [vmem:[%s2618_s1 + $0x1f0] sm:$0xff] }
  0x38   :  { %v1543_v62 = vcombine.low %v113_v54, %v117_v55 }
  0x39   :  { %1751 = vmatpush3.bf16.msra.mxu0 %v1921_v31  ;;  %v93_v31 = vld [vmem:[%s2618_s1 + $0x130] sm:$0xff] }
  0x3a   :  { %1815 = vmatpush3.bf16.msra.mxu1 %v1923_v33  ;;  %1752 = vmatprep.subr.bf16.mxu0 %v1924_v38  ;;  %v94_v33 = vld [vmem:[%s2618_s1 + $0x138] sm:$0xff]  ;;  %v97_v38 = vld [vmem:[%s2618_s1 + $0x150] sm:$0xff]  ;;  %v1519_v42 = vcombine.low %v89_v30, %v93_v31 }
  0x3b   :  { %1008 = vmatmul.mubr.bf16.gmra.mxu0 %v1507_v19  ;;  %1816 = vmatprep.subr.bf16.mxu1 %v1926_v40  ;;  %v1497_v19 = vcombine.low %v66_v8, %v70_v9  ;;  %v98_v40 = vld [vmem:[%s2618_s1 + $0x158] sm:$0xff] }
  0x3c   :  { %1105 = vmatmul.mubr.bf16.gmra.mxu1 %v1509_v21  ;;  %1015 = vmatprep.mubr.bf16.mxu0 %v1516_v22  ;;  %v1506_v21 = vcombine.high %v74_v16, %v78_v17  ;;  %v81_v22 = vld [vmem:[%s2618_s1 + $0xd0] sm:$0xff]  ;;  %v1530_v45 = vcombine.high %v98_v40, %v102_v41 }
  0x3d   :  { %1112 = vmatprep.mubr.bf16.mxu1 %v1518_v24  ;;  %1753 = vmatpush3.bf16.msra.mxu0 %v1925_v39  ;;  %v82_v24 = vld [vmem:[%s2618_s1 + $0xd8] sm:$0xff]  ;;  %v1512_v28 = vcombine.high %v81_v22, %v85_v23  ;;  %v101_v39 = vld [vmem:[%s2618_s1 + $0x170] sm:$0xff] }
  0x3e   :  { %1817 = vmatpush3.bf16.msra.mxu1 %v1927_v43  ;;  %1754 = vmatprep.subr.bf16.mxu0 %v1928_v46  ;;  %v1514_v29 = vcombine.high %v82_v24, %v86_v25  ;;  %v1521_v43 = vcombine.low %v90_v32, %v94_v33  ;;  %v1528_v44 = vcombine.high %v97_v38, %v101_v39  ;;  %v105_v46 = vld [vmem:[%s2618_s1 + $0x190] sm:$0xff] }
  0x3f   :  { %1818 = vmatprep.subr.bf16.mxu1 %v1930_v51  ;;  %v1529_v51 = vcombine.low %v98_v40, %v102_v41 }
  0x41   :  { %1755 = vmatpush3.bf16.msra.mxu0 %v1929_v48  ;;  %v106_v48 = vld [vmem:[%s2618_s1 + $0x198] sm:$0xff] }
  0x42   :  { %1819 = vmatpush3.bf16.msra.mxu1 %v1931_v53 }
  0x43   :  { %1016 = vmatmul.mubr.bf16.gmra.mxu0 %v1515_v34  ;;  %v1511_v34 = vcombine.low %v81_v22, %v85_v23 }
  0x44   :  { %1113 = vmatmul.mubr.bf16.gmra.mxu1 %v1517_v35  ;;  %1023 = vmatprep.mubr.bf16.mxu0 %v1524_v36  ;;  %v1513_v35 = vcombine.low %v82_v24, %v86_v25  ;;  %v1520_v36 = vcombine.high %v89_v30, %v93_v31 }
  0x45   :  { %1120 = vmatprep.mubr.bf16.mxu1 %v1526_v37  ;;  %v1522_v37 = vcombine.high %v90_v32, %v94_v33 }
  0x4b   :  { %1024 = vmatmul.mubr.bf16.gmra.mxu0 %v1523_v47  ;;  %v109_v47 = vld [vmem:[%s2618_s1 + $0x1b0] sm:$0xff] }
  0x4c   :  { %1121 = vmatmul.mubr.bf16.gmra.mxu1 %v1525_v49  ;;  %1031 = vmatprep.mubr.bf16.mxu0 %v1532_v50  ;;  %v110_v49 = vld [vmem:[%s2618_s1 + $0x1b8] sm:$0xff]  ;;  %v1527_v50 = vcombine.low %v97_v38, %v101_v39 }
  0x4d   :  { %1128 = vmatprep.mubr.bf16.mxu1 %v1534_v52  ;;  %v1536_v52 = vcombine.high %v105_v46, %v109_v47  ;;  %v1538_v53 = vcombine.high %v106_v48, %v110_v49 }
  0x53   :  { %1032 = vmatmul.mubr.bf16.gmra.mxu0 %v1531_v58  ;;  %v1535_v58 = vcombine.low %v105_v46, %v109_v47 }
  0x54   :  { %1129 = vmatmul.mubr.bf16.gmra.mxu1 %v1533_v59  ;;  %1039 = vmatprep.mubr.bf16.mxu0 %v1540_v60  ;;  %v1537_v59 = vcombine.low %v106_v48, %v110_v49  ;;  %v1544_v60 = vcombine.high %v113_v54, %v117_v55 }
  0x55   :  { %1136 = vmatprep.mubr.bf16.mxu1 %v1542_v61  ;;  %v1546_v61 = vcombine.high %v114_v56, %v118_v57 }
  0x5b   :  { %1040 = vmatmul.mubr.bf16.gmra.mxu0 %v1539_v2 }
  0x5c   :  { %1137 = vmatmul.mubr.bf16.gmra.mxu1 %v1541_v3  ;;  %1177 = vmatprep.mubr.bf16.mxu0 %v1488_v4 }
  0x5d   :  { %1274 = vmatprep.mubr.bf16.mxu1 %v1490_v5 }
  0x63   :  { %1178 = vmatmul.mubr.bf16.vlgmr.msra.gmra.mxu0 %v1487_v10 }
  0x64   :  { %1275 = vmatmul.mubr.bf16.vlgmr.msra.gmra.mxu1 %v1489_v11  ;;  %1185 = vmatprep.mubr.bf16.mxu0 %v1496_v12 }
  0x65   :  { %1282 = vmatprep.mubr.bf16.mxu1 %v1498_v13 }
  0x6b   :  { %1186 = vmatmul.mubr.bf16.gmra.mxu0 %v1495_v18 }
  0x6c   :  { %1283 = vmatmul.mubr.bf16.gmra.mxu1 %v1497_v19  ;;  %1193 = vmatprep.mubr.bf16.mxu0 %v1504_v20 }
  0x6d   :  { %1290 = vmatprep.mubr.bf16.mxu1 %v1506_v21 }
  0x73   :  { %1194 = vmatmul.mubr.bf16.gmra.mxu0 %v1503_v26 }
  0x74   :  { %1291 = vmatmul.mubr.bf16.gmra.mxu1 %v1505_v27  ;;  %1201 = vmatprep.mubr.bf16.mxu0 %v1512_v28 }
  0x75   :  { %1298 = vmatprep.mubr.bf16.mxu1 %v1514_v29 }
  0x7b   :  { %1202 = vmatmul.mubr.bf16.gmra.mxu0 %v1511_v34 }
  0x7c   :  { %1299 = vmatmul.mubr.bf16.gmra.mxu1 %v1513_v35  ;;  %1209 = vmatprep.mubr.bf16.mxu0 %v1520_v36 }
  0x7d   :  { %1306 = vmatprep.mubr.bf16.mxu1 %v1522_v37 }
  0x83   :  { %1210 = vmatmul.mubr.bf16.gmra.mxu0 %v1519_v42 }
  0x84   :  { %1307 = vmatmul.mubr.bf16.gmra.mxu1 %v1521_v43  ;;  %1217 = vmatprep.mubr.bf16.mxu0 %v1528_v44 }
  0x85   :  { %1314 = vmatprep.mubr.bf16.mxu1 %v1530_v45 }
  0x8b   :  { %1218 = vmatmul.mubr.bf16.gmra.mxu0 %v1527_v50 }
  0x8c   :  { %1315 = vmatmul.mubr.bf16.gmra.mxu1 %v1529_v51  ;;  %1225 = vmatprep.mubr.bf16.mxu0 %v1536_v52 }
  0x8d   :  { %1322 = vmatprep.mubr.bf16.mxu1 %v1538_v53 }
  0x93   :  { %1226 = vmatmul.mubr.bf16.gmra.mxu0 %v1535_v58 }
  0x94   :  { %1323 = vmatmul.mubr.bf16.gmra.mxu1 %v1537_v59  ;;  %1233 = vmatprep.mubr.bf16.mxu0 %v1544_v60 }
  0x95   :  { %1330 = vmatprep.mubr.bf16.mxu1 %v1546_v61 }
  0x9b   :  { %1234 = vmatmul.mubr.bf16.gmra.mxu0 %v1543_v62 }
  0x9c   :  { %1331 = vmatmul.mubr.bf16.gmra.mxu1 %v1545_v63 }
  0xe3   :  { %v2341_v0 = vpop.f32.mrf.mxu0 }
  0xe4   :  { %v2343_v1 = vpop.f32.mrf.mxu1 }
  0xe5   :  { %v1629_v2 = vpop.f32.mrf.mxu0 }
  0xe6   :  { %v1693_v3 = vpop.f32.mrf.mxu1  ;;  %v1630_v63 = vadd.f32 %v1629_v2, %v2341_v0 }
  0xe7   :  { %v2345_v4 = vpop.f32.mrf.mxu0 }
  0xe8   :  { %v2347_v5 = vpop.f32.mrf.mxu1 }
  0xe9   :  { %v2349_v6 = vpop.f32.mrf.mxu0 }
  0xea   :  { %v2351_v7 = vpop.f32.mrf.mxu1 }
  0xeb   :  { %v2353_v8 = vpop.f32.mrf.mxu0 }
  0xec   :  { %v2355_v9 = vpop.f32.mrf.mxu1 }
  0xed   :  { %v2357_v10 = vpop.f32.mrf.mxu0 }
  0xee   :  { %v2359_v11 = vpop.f32.mrf.mxu1 }
  0xef   :  { %v2361_v12 = vpop.f32.mrf.mxu0  ;;  %v1700_v2 = vadd.f32 %v2359_v11, %v2355_v9 }
  0xf0   :  { %v2363_v13 = vpop.f32.mrf.mxu1 }
  0xf1   :  { %v2365_v14 = vpop.f32.mrf.mxu0 }
  0xf2   :  { %v2367_v15 = vpop.f32.mrf.mxu1 }
  0xf3   :  { %v2369_v16 = vpop.f32.mrf.mxu0 }
  0xf4   :  { %v2371_v17 = vpop.f32.mrf.mxu1 }
  0xf5   :  { %v2373_v18 = vpop.f32.mrf.mxu0 }
  0xf6   :  { %v2375_v19 = vpop.f32.mrf.mxu1 }
  0xf7   :  { %v2377_v20 = vpop.f32.mrf.mxu0 }
  0xf8   :  { %v2379_v21 = vpop.f32.mrf.mxu1 }
  0xf9   :  { %v2381_v22 = vpop.f32.mrf.mxu0 }
  0xfa   :  { %v2383_v23 = vpop.f32.mrf.mxu1 }
  0xfb   :  { %v2385_v24 = vpop.f32.mrf.mxu0 }
  0xfc   :  { %v2387_v25 = vpop.f32.mrf.mxu1 }
  0xfd   :  { %v2389_v26 = vpop.f32.mrf.mxu0 }
  0xfe   :  { %v2391_v27 = vpop.f32.mrf.mxu1 }
  0xff   :  { %v2393_v28 = vpop.f32.mrf.mxu0 }
 0x100   :  { %v2395_v29 = vpop.f32.mrf.mxu1 }
 0x101   :  { %v2397_v30 = vpop.f32.mrf.mxu0 }
 0x102   :  { %v2399_v31 = vpop.f32.mrf.mxu1 }
 0x103   :  { %v2401_v32 = vpop.f32.mrf.mxu0 }
 0x104   :  { %v2403_v33 = vpop.f32.mrf.mxu1 }
 0x105   :  { %v2405_v34 = vpop.f32.mrf.mxu0 }
 0x106   :  { %v2407_v35 = vpop.f32.mrf.mxu1 }
 0x107   :  { %v2409_v36 = vpop.f32.mrf.mxu0 }
 0x108   :  { %v2411_v37 = vpop.f32.mrf.mxu1 }
 0x109   :  { %v2413_v38 = vpop.f32.mrf.mxu0 }
 0x10a   :  { %v2415_v39 = vpop.f32.mrf.mxu1 }
 0x10b   :  { %v2417_v40 = vpop.f32.mrf.mxu0 }
 0x10c   :  { %v2419_v41 = vpop.f32.mrf.mxu1 }
 0x10d   :  { %v2421_v42 = vpop.f32.mrf.mxu0 }
 0x10e   :  { %v2423_v43 = vpop.f32.mrf.mxu1 }
 0x10f   :  { %v2425_v44 = vpop.f32.mrf.mxu0 }
 0x110   :  { %v2427_v45 = vpop.f32.mrf.mxu1 }
 0x111   :  { %v2429_v46 = vpop.f32.mrf.mxu0 }
 0x112   :  { %v2431_v47 = vpop.f32.mrf.mxu1 }
 0x113   :  { %v2433_v48 = vpop.f32.mrf.mxu0 }
 0x114   :  { %v2435_v49 = vpop.f32.mrf.mxu1 }
 0x115   :  { %2622 = vst [vmem:[#allocation4_spill] sm:$0xff] %v2435_v49  ;;  %v2437_v50 = vpop.f32.mrf.mxu0 }
 0x116   :  { %v2439_v51 = vpop.f32.mrf.mxu1 }
 0x117   :  { %2623 = vst [vmem:[#allocation5_spill] sm:$0xff] %v2439_v51  ;;  %v2441_v52 = vpop.f32.mrf.mxu0 }
 0x118   :  { %2624 = vst [vmem:[#allocation6_spill] sm:$0xff] %v2441_v52  ;;  %v2443_v53 = vpop.f32.mrf.mxu1 }
 0x119   :  { %2625 = vst [vmem:[#allocation7_spill] sm:$0xff] %v2443_v53  ;;  %v2445_v54 = vpop.f32.mrf.mxu0  ;;  %v1694_v53 = vadd.f32 %v1693_v3, %v2343_v1  ;;  %v1636_v1 = vadd.f32 %v2357_v10, %v2353_v8  ;;  %v2478_v3 = vld [vmem:[%s2619_s3] ss:$0 sm:$0xff] }
 0x11a   :  { %2626 = vst [vmem:[#allocation8_spill] sm:$0xff] %v2445_v54  ;;  %v2447_v55 = vpop.f32.mrf.mxu1 }
 0x11b   :  { %2627 = vst [vmem:[#allocation9_spill] sm:$0xff] %v2447_v55  ;;  %v2449_v56 = vpop.f32.mrf.mxu0 }
 0x11c   :  { %2628 = vst [vmem:[#allocation10_spill] sm:$0xff] %v2449_v56  ;;  %v2451_v57 = vpop.f32.mrf.mxu1 }
 0x11d   :  { %2629 = vst [vmem:[#allocation11_spill] sm:$0xff] %v2451_v57  ;;  %v2453_v58 = vpop.f32.mrf.mxu0  ;;  %v1083_v57 = vadd.f32 %v1694_v53, %v1630_v63  ;;  %v2483_v53 = vstv %s2620_s0 }
 0x11e   :  { %2630 = vst [vmem:[#allocation12_spill] sm:$0xff] %v2453_v58  ;;  %v2455_v59 = vpop.f32.mrf.mxu1  ;;  %v1633_v58 = vadd.f32 %v2349_v6, %v2345_v4 }
 0x11f   :  { %2631 = vst [vmem:[#allocation13_spill] sm:$0xff] %v2455_v59  ;;  %v2457_v60 = vpop.f32.mrf.mxu0 }
 0x120   :  { %2632 = vst [vmem:[#allocation14_spill] sm:$0xff] %v2457_v60  ;;  %v2459_v61 = vpop.f32.mrf.mxu1  ;;  %v1697_v60 = vadd.f32 %v2351_v7, %v2347_v5 }
 0x121   :  { %2633 = vst [vmem:[#allocation15_spill] sm:$0xff] %v2459_v61  ;;  %v2461_v62 = vpop.f32.mrf.mxu0 }
 0x122   :  { %2634 = vst [vmem:[#allocation16_spill] sm:$0xff] %v2461_v62  ;;  %v2465_v54 = vpop.f32.mrf.mxu1  ;;  %v1086_v6 = vadd.f32 %v1697_v60, %v1633_v58 }
 0x123   :  { %v1756_v55 = vpop.f32.mrf.mxu0 }
 0x124   :  { %v1820_v56 = vpop.f32.mrf.mxu1 }
 0x125   :  { %v1757_v52 = vpop.f32.mrf.mxu0 }
 0x126   :  { %v1758_v59 = vadd.f32 %v1757_v52, %v1756_v55  ;;  %v1821_v61 = vpop.f32.mrf.mxu1 }
 0x127   :  { %v1759_v51 = vpop.f32.mrf.mxu0  ;;  %v1822_v49 = vadd.f32 %v1821_v61, %v1820_v56  ;;  %v1091_v56 = vadd.f32 %v1700_v2, %v1636_v1 }
 0x128   :  { %v1180_v62 = vadd.f32 %v1758_v59, %v1083_v57  ;;  %v1823_v0 = vpop.f32.mrf.mxu1  ;;  %v1639_v57 = vadd.f32 %v2365_v14, %v2361_v12  ;;  %v1642_v12 = vadd.f32 %v2373_v18, %v2369_v16 }
 0x129   :  { %v1760_v4 = vpop.f32.mrf.mxu0 }
 0x12a   :  { %v1277_v5 = vadd.f32 %v1822_v49, %v1180_v62  ;;  %v1761_v7 = vadd.f32 %v1760_v4, %v1759_v51  ;;  %v1824_v52 = vpop.f32.mrf.mxu1  ;;  %v1703_v49 = vadd.f32 %v2367_v15, %v2363_v13  ;;  %v1706_v13 = vadd.f32 %v2375_v19, %v2371_v17 }
 0x12b   :  { %v1762_v55 = vpop.f32.mrf.mxu0  ;;  %v1825_v9 = vadd.f32 %v1824_v52, %v1823_v0  ;;  %v1645_v17 = vadd.f32 %v2381_v22, %v2377_v20  ;;  %v1709_v19 = vadd.f32 %v2383_v23, %v2379_v21  ;;  %v1648_v21 = vadd.f32 %v2389_v26, %v2385_v24 }
 0x12c   :  { %v1397_v8 = vadd.f32 %v2478_v3, %v1277_v5  ;;  %v1183_v10 = vadd.f32 %v1761_v7, %v1086_v6  ;;  %v1826_v11 = vpop.f32.mrf.mxu1  ;;  %v1094_v2 = vadd.f32 %v1703_v49, %v1639_v57  ;;  %v1712_v23 = vadd.f32 %v2391_v27, %v2387_v25 }
 0x12d   :  { %v1763_v51 = vpop.f32.mrf.mxu0  ;;  %v1651_v25 = vadd.f32 %v2397_v30, %v2393_v28  ;;  %v1715_v27 = vadd.f32 %v2399_v31, %v2395_v29  ;;  %v1654_v29 = vadd.f32 %v2405_v34, %v2401_v32  ;;  %v1718_v31 = vadd.f32 %v2407_v35, %v2403_v33 }
 0x12e   :  { %vm1414_vm0 = vcmp.ge.f32.partialorder %v1397_v8, 0.0  ;;  %v1431_v58 = vmul.f32 %v2483_v53, %v1397_v8  ;;  %v1280_v59 = vadd.f32 %v1825_v9, %v1183_v10  ;;  %v1764_v60 = vadd.f32 %v1763_v51, %v1762_v55  ;;  %v1827_v61 = vpop.f32.mrf.mxu1 }
 0x12f   :  { %v1765_v62 = vpop.f32.mrf.mxu0  ;;  %v1828_v6 = vadd.f32 %v1827_v61, %v1826_v11  ;;  %v1099_v11 = vadd.f32 %v1706_v13, %v1642_v12  ;;  %v1657_v33 = vadd.f32 %v2413_v38, %v2409_v36  ;;  %v1721_v35 = vadd.f32 %v2415_v39, %v2411_v37 }
 0x130   :  { %v1447_v63 = vsel %vm1414_vm0, %v1397_v8, %v1431_v58  ;;  %v1398_v4 = vadd.f32 %v2478_v3, %v1280_v59  ;;  %v1188_v0 = vadd.f32 %v1764_v60, %v1091_v56  ;;  %v1829_v1 = vpop.f32.mrf.mxu1  ;;  %v1660_v37 = vadd.f32 %v2421_v42, %v2417_v40 }
 0x131   :  { %1463 = vst [vmem:[%s2621_s4] sm:$0xff] %v1447_v63  ;;  %v1766_v14 = vpop.f32.mrf.mxu0  ;;  %v1102_v63 = vadd.f32 %v1709_v19, %v1645_v17  ;;  %v1110_v17 = vadd.f32 %v1715_v27, %v1651_v25  ;;  %v1724_v39 = vadd.f32 %v2423_v43, %v2419_v41  ;;  %v1663_v41 = vadd.f32 %v2429_v46, %v2425_v44 }
 0x132   :  { %vm1415_vm1 = vcmp.ge.f32.partialorder %v1398_v4, 0.0  ;;  %v1432_v15 = vmul.f32 %v2483_v53, %v1398_v4  ;;  %v1285_v5 = vadd.f32 %v1828_v6, %v1188_v0  ;;  %v1767_v7 = vadd.f32 %v1766_v14, %v1765_v62  ;;  %v1830_v52 = vpop.f32.mrf.mxu1 }
 0x133   :  { %v1768_v55 = vpop.f32.mrf.mxu0  ;;  %v1831_v16 = vadd.f32 %v1830_v52, %v1829_v1  ;;  %v1727_v43 = vadd.f32 %v2431_v47, %v2427_v45  ;;  %v1666_v45 = vadd.f32 %v2437_v50, %v2433_v48  ;;  %v2635_v47 = vld [vmem:[#allocation4_spill] sm:$0xff] }
 0x134   :  { %v1448_v8 = vsel %vm1415_vm1, %v1398_v4, %v1432_v15  ;;  %v1399_v10 = vadd.f32 %v2478_v3, %v1285_v5  ;;  %v1191_v9 = vadd.f32 %v1767_v7, %v1094_v2  ;;  %v1832_v18 = vpop.f32.mrf.mxu1  ;;  %v1107_v5 = vadd.f32 %v1712_v23, %v1648_v21 }
 0x135   :  { %1464 = vst [vmem:[%s2621_s4 + $0x8] sm:$0xff] %v1448_v8  ;;  %v1769_v56 = vpop.f32.mrf.mxu0 }
 0x136   :  { %vm1416_vm2 = vcmp.ge.f32.partialorder %v1399_v10, 0.0  ;;  %v1433_v57 = vmul.f32 %v2483_v53, %v1399_v10  ;;  %v1288_v49 = vadd.f32 %v1831_v16, %v1191_v9  ;;  %v1770_v51 = vadd.f32 %v1769_v56, %v1768_v55  ;;  %v1833_v58 = vpop.f32.mrf.mxu1 }
 0x137   :  { %v1771_v59 = vpop.f32.mrf.mxu0  ;;  %v1834_v20 = vadd.f32 %v1833_v58, %v1832_v18 }
 0x138   :  { %v1449_v60 = vsel %vm1416_vm2, %v1399_v10, %v1433_v57  ;;  %v1400_v61 = vadd.f32 %v2478_v3, %v1288_v49  ;;  %v1196_v62 = vadd.f32 %v1770_v51, %v1099_v11  ;;  %v1835_v22 = vpop.f32.mrf.mxu1 }
 0x139   :  { %1465 = vst [vmem:[%s2621_s4 + $0x10] sm:$0xff] %v1449_v60  ;;  %v1772_v4 = vpop.f32.mrf.mxu0 }
 0x13a   :  { %vm1417_vm3 = vcmp.ge.f32.partialorder %v1400_v61, 0.0  ;;  %v1434_v0 = vmul.f32 %v2483_v53, %v1400_v61  ;;  %v1293_v6 = vadd.f32 %v1834_v20, %v1196_v62  ;;  %v1773_v1 = vadd.f32 %v1772_v4, %v1771_v59  ;;  %v1836_v2 = vpop.f32.mrf.mxu1 }
 0x13b   :  { %v1774_v12 = vpop.f32.mrf.mxu0  ;;  %v1837_v24 = vadd.f32 %v1836_v2, %v1835_v22  ;;  %v1115_v62 = vadd.f32 %v1718_v31, %v1654_v29  ;;  %v1118_v2 = vadd.f32 %v1721_v35, %v1657_v33  ;;  %v2639_v33 = vld [vmem:[#allocation7_spill] sm:$0xff]  ;;  %v2640_v35 = vld [vmem:[#allocation9_spill] sm:$0xff] }
 0x13c   :  { %v1450_v13 = vsel %vm1417_vm3, %v1400_v61, %v1434_v0  ;;  %v1401_v14 = vadd.f32 %v2478_v3, %v1293_v6  ;;  %v1199_v15 = vadd.f32 %v1773_v1, %v1102_v63  ;;  %v1838_v26 = vpop.f32.mrf.mxu1 }
 0x13d   :  { %1466 = vst [vmem:[%s2621_s4 + $0x18] sm:$0xff] %v1450_v13  ;;  %v1775_v7 = vpop.f32.mrf.mxu0 }
 0x13e   :  { %vm1418_vm4 = vcmp.ge.f32.partialorder %v1401_v14, 0.0  ;;  %v1435_v52 = vmul.f32 %v2483_v53, %v1401_v14  ;;  %v1296_v55 = vadd.f32 %v1837_v24, %v1199_v15  ;;  %v1776_v8 = vadd.f32 %v1775_v7, %v1774_v12  ;;  %v1839_v10 = vpop.f32.mrf.mxu1 }
 0x13f   :  { %v1777_v9 = vpop.f32.mrf.mxu0  ;;  %v1840_v28 = vadd.f32 %v1839_v10, %v1838_v26  ;;  %v1123_v7 = vadd.f32 %v1724_v39, %v1660_v37  ;;  %v2641_v39 = vld [vmem:[#allocation10_spill] sm:$0xff] }
 0x140   :  { %v1451_v16 = vsel %vm1418_vm4, %v1401_v14, %v1435_v52  ;;  %v1402_v18 = vadd.f32 %v2478_v3, %v1296_v55  ;;  %v1204_v11 = vadd.f32 %v1776_v8, %v1107_v5  ;;  %v1841_v30 = vpop.f32.mrf.mxu1 }
 0x141   :  { %1467 = vst [vmem:[%s2621_s4 + $0x20] sm:$0xff] %v1451_v16  ;;  %v1778_v19 = vpop.f32.mrf.mxu0 }
 0x142   :  { %vm1419_vm5 = vcmp.ge.f32.partialorder %v1402_v18, 0.0  ;;  %v1436_v56 = vmul.f32 %v2483_v53, %v1402_v18  ;;  %v1301_v57 = vadd.f32 %v1840_v28, %v1204_v11  ;;  %v1779_v49 = vadd.f32 %v1778_v19, %v1777_v9  ;;  %v1842_v51 = vpop.f32.mrf.mxu1 }
 0x143   :  { %v1780_v58 = vpop.f32.mrf.mxu0  ;;  %v1843_v32 = vadd.f32 %v1842_v51, %v1841_v30  ;;  %v1126_v30 = vadd.f32 %v1727_v43, %v1663_v41 }
 0x144   :  { %v1452_v59 = vsel %vm1419_vm5, %v1402_v18, %v1436_v56  ;;  %v1403_v60 = vadd.f32 %v2478_v3, %v1301_v57  ;;  %v1207_v61 = vadd.f32 %v1779_v49, %v1110_v17  ;;  %v1844_v34 = vpop.f32.mrf.mxu1  ;;  %v2636_v17 = vld [vmem:[#allocation5_spill] sm:$0xff] }
 0x145   :  { %1468 = vst [vmem:[%s2621_s4 + $0x28] sm:$0xff] %v1452_v59  ;;  %v1781_v20 = vpop.f32.mrf.mxu0  ;;  %v1730_v29 = vadd.f32 %v2636_v17, %v2635_v47 }
 0x146   :  { %vm1420_vm6 = vcmp.ge.f32.partialorder %v1403_v60, 0.0  ;;  %v1437_v22 = vmul.f32 %v2483_v53, %v1403_v60  ;;  %v1304_v63 = vadd.f32 %v1843_v32, %v1207_v61  ;;  %v1782_v21 = vadd.f32 %v1781_v20, %v1780_v58  ;;  %v1845_v23 = vpop.f32.mrf.mxu1  ;;  %v2637_v32 = vld [vmem:[#allocation6_spill] sm:$0xff] }
 0x147   :  { %v1783_v4 = vpop.f32.mrf.mxu0  ;;  %v1846_v36 = vadd.f32 %v1845_v23, %v1844_v34  ;;  %v1131_v61 = vadd.f32 %v1730_v29, %v1666_v45  ;;  %v2638_v34 = vld [vmem:[#allocation8_spill] sm:$0xff]  ;;  %v1733_v20 = vadd.f32 %v2640_v35, %v2639_v33 }
 0x148   :  { %v1453_v0 = vsel %vm1420_vm6, %v1403_v60, %v1437_v22  ;;  %v1404_v6 = vadd.f32 %v2478_v3, %v1304_v63  ;;  %v1212_v1 = vadd.f32 %v1782_v21, %v1115_v62  ;;  %v1847_v38 = vpop.f32.mrf.mxu1  ;;  %v1669_v62 = vadd.f32 %v2638_v34, %v2637_v32 }
 0x149   :  { %1469 = vst [vmem:[%s2621_s4 + $0x30] sm:$0xff] %v1453_v0  ;;  %v1784_v12 = vpop.f32.mrf.mxu0 }
 0x14a   :  { %vm1421_vm7 = vcmp.ge.f32.partialorder %v1404_v6, 0.0  ;;  %v1438_v13 = vmul.f32 %v2483_v53, %v1404_v6  ;;  %v1309_v14 = vadd.f32 %v1846_v36, %v1212_v1  ;;  %v1785_v15 = vadd.f32 %v1784_v12, %v1783_v4  ;;  %v1848_v24 = vpop.f32.mrf.mxu1  ;;  %v2642_v12 = vld [vmem:[#allocation12_spill] sm:$0xff] }
 0x14b   :  { %v1786_v26 = vpop.f32.mrf.mxu0  ;;  %v1849_v40 = vadd.f32 %v1848_v24, %v1847_v38  ;;  %v1134_v37 = vadd.f32 %v1733_v20, %v1669_v62 }
 0x14c   :  { %v1454_v5 = vsel %vm1421_vm7, %v1404_v6, %v1438_v13  ;;  %v1405_v25 = vadd.f32 %v2478_v3, %v1309_v14  ;;  %v1215_v27 = vadd.f32 %v1785_v15, %v1118_v2  ;;  %v1850_v42 = vpop.f32.mrf.mxu1  ;;  %v1672_v13 = vadd.f32 %v2642_v12, %v2641_v39  ;;  %v2643_v14 = vld [vmem:[#allocation11_spill] sm:$0xff]  ;;  %v2644_v15 = vld [vmem:[#allocation13_spill] sm:$0xff] }
 0x14d   :  { %1470 = vst [vmem:[%s2621_s4 + $0x38] sm:$0xff] %v1454_v5  ;;  %v1787_v52 = vpop.f32.mrf.mxu0  ;;  %v1736_v24 = vadd.f32 %v2644_v15, %v2643_v14 }
 0x14e   :  { %vm1422_vm8 = vcmp.ge.f32.partialorder %v1405_v25, 0.0  ;;  %v1439_v55 = vmul.f32 %v2483_v53, %v1405_v25  ;;  %v1312_v8 = vadd.f32 %v1849_v40, %v1215_v27  ;;  %v1788_v10 = vadd.f32 %v1787_v52, %v1786_v26  ;;  %v1851_v9 = vpop.f32.mrf.mxu1 }
 0x14f   :  { %v1789_v16 = vpop.f32.mrf.mxu0  ;;  %v1852_v44 = vadd.f32 %v1851_v9, %v1850_v42  ;;  %v2646_v9 = vld [vmem:[#allocation16_spill] sm:$0xff] }
 0x150   :  { %v1455_v18 = vsel %vm1422_vm8, %v1405_v25, %v1439_v55  ;;  %v1406_v11 = vadd.f32 %v2478_v3, %v1312_v8  ;;  %v1220_v28 = vadd.f32 %v1788_v10, %v1123_v7  ;;  %v1853_v46 = vpop.f32.mrf.mxu1  ;;  %v1139_v8 = vadd.f32 %v1736_v24, %v1672_v13  ;;  %v2645_v10 = vld [vmem:[#allocation14_spill] sm:$0xff] }
 0x151   :  { %1471 = vst [vmem:[%s2621_s4 + $0x40] sm:$0xff] %v1455_v18  ;;  %v1790_v31 = vpop.f32.mrf.mxu0  ;;  %v2647_v18 = vld [vmem:[#allocation15_spill] sm:$0xff] }
 0x152   :  { %vm1423_vm9 = vcmp.ge.f32.partialorder %v1406_v11, 0.0  ;;  %v1440_v19 = vmul.f32 %v2483_v53, %v1406_v11  ;;  %v1317_v56 = vadd.f32 %v1852_v44, %v1220_v28  ;;  %v1791_v57 = vadd.f32 %v1790_v31, %v1789_v16  ;;  %v1854_v49 = vpop.f32.mrf.mxu1 }
 0x153   :  { %v1792_v51 = vpop.f32.mrf.mxu0  ;;  %v1855_v48 = vadd.f32 %v1854_v49, %v1853_v46  ;;  %v1675_v16 = vadd.f32 %v2646_v9, %v2645_v10 }
 0x154   :  { %v1456_v58 = vsel %vm1423_vm9, %v1406_v11, %v1440_v19  ;;  %v1407_v59 = vadd.f32 %v2478_v3, %v1317_v56  ;;  %v1223_v60 = vadd.f32 %v1791_v57, %v1126_v30  ;;  %v1856_v50 = vpop.f32.mrf.mxu1  ;;  %v1739_v11 = vadd.f32 %v2465_v54, %v2647_v18 }
 0x155   :  { %1472 = vst [vmem:[%s2621_s4 + $0x48] sm:$0xff] %v1456_v58  ;;  %v1793_v22 = vpop.f32.mrf.mxu0 }
 0x156   :  { %vm1424_vm10 = vcmp.ge.f32.partialorder %v1407_v59, 0.0  ;;  %v1441_v63 = vmul.f32 %v2483_v53, %v1407_v59  ;;  %v1320_v21 = vadd.f32 %v1855_v48, %v1223_v60  ;;  %v1794_v23 = vadd.f32 %v1793_v22, %v1792_v51  ;;  %v1857_v4 = vpop.f32.mrf.mxu1 }
 0x157   :  { %v1795_v0 = vpop.f32.mrf.mxu0  ;;  %v1858_v38 = vadd.f32 %v1857_v4, %v1856_v50  ;;  %v1142_v57 = vadd.f32 %v1739_v11, %v1675_v16 }
 0x158   :  { %v1457_v6 = vsel %vm1424_vm10, %v1407_v59, %v1441_v63  ;;  %v1408_v1 = vadd.f32 %v2478_v3, %v1320_v21  ;;  %v1228_v36 = vadd.f32 %v1794_v23, %v1131_v61  ;;  %v1859_v2 = vpop.f32.mrf.mxu1 }
 0x159   :  { %1473 = vst [vmem:[%s2621_s4 + $0x50] sm:$0xff] %v1457_v6  ;;  %v1796_v26 = vpop.f32.mrf.mxu0 }
 0x15a   :  { %vm1425_vm11 = vcmp.ge.f32.partialorder %v1408_v1, 0.0  ;;  %v1442_v5 = vmul.f32 %v2483_v53, %v1408_v1  ;;  %v1325_v25 = vadd.f32 %v1858_v38, %v1228_v36  ;;  %v1797_v27 = vadd.f32 %v1796_v26, %v1795_v0  ;;  %v1860_v40 = vpop.f32.mrf.mxu1 }
 0x15b   :  { %v1798_v42 = vpop.f32.mrf.mxu0  ;;  %v1861_v52 = vadd.f32 %v1860_v40, %v1859_v2 }
 0x15c   :  { %v1458_v7 = vsel %vm1425_vm11, %v1408_v1, %v1442_v5  ;;  %v1409_v41 = vadd.f32 %v2478_v3, %v1325_v25  ;;  %v1231_v43 = vadd.f32 %v1797_v27, %v1134_v37  ;;  %v1862_v55 = vpop.f32.mrf.mxu1 }
 0x15d   :  { %1474 = vst [vmem:[%s2621_s4 + $0x58] sm:$0xff] %v1458_v7  ;;  %v1799_v28 = vpop.f32.mrf.mxu0 }
 0x15e   :  { %vm1426_vm12 = vcmp.ge.f32.partialorder %v1409_v41, 0.0  ;;  %v1443_v44 = vmul.f32 %v2483_v53, %v1409_v41  ;;  %v1328_v46 = vadd.f32 %v1861_v52, %v1231_v43  ;;  %v1800_v30 = vadd.f32 %v1799_v28, %v1798_v42  ;;  %v1863_v45 = vpop.f32.mrf.mxu1 }
 0x15f   :  { %v1801_v47 = vpop.f32.mrf.mxu0  ;;  %v1864_v19 = vadd.f32 %v1863_v45, %v1862_v55 }
 0x160   :  { %v1459_v17 = vsel %vm1426_vm12, %v1409_v41, %v1443_v44  ;;  %v1410_v29 = vadd.f32 %v2478_v3, %v1328_v46  ;;  %v1236_v31 = vadd.f32 %v1800_v30, %v1139_v8  ;;  %v1865_v56 = vpop.f32.mrf.mxu1 }
 0x161   :  { %1475 = vst [vmem:[%s2621_s4 + $0x60] sm:$0xff] %v1459_v17  ;;  %v1802_v54 = vpop.f32.mrf.mxu0 }
 0x162   :  { %vm1427_vm13 = vcmp.ge.f32.partialorder %v1410_v29, 0.0  ;;  %v1444_v49 = vmul.f32 %v2483_v53, %v1410_v29  ;;  %v1333_v51 = vadd.f32 %v1864_v19, %v1236_v31  ;;  %v1803_v58 = vadd.f32 %v1802_v54, %v1801_v47  ;;  %v1866_v59 = vpop.f32.mrf.mxu1 }
 0x163   :  { %v1867_v61 = vadd.f32 %v1866_v59, %v1865_v56 }
 0x164   :  { %v1460_v60 = vsel %vm1427_vm13, %v1410_v29, %v1444_v49  ;;  %v1411_v48 = vadd.f32 %v2478_v3, %v1333_v51  ;;  %v1239_v50 = vadd.f32 %v1803_v58, %v1142_v57 }
 0x165   :  { %1476 = vst [vmem:[%s2621_s4 + $0x68] sm:$0xff] %v1460_v60 }
 0x166   :  { %vm1428_vm14 = vcmp.ge.f32.partialorder %v1411_v48, 0.0  ;;  %v1445_v32 = vmul.f32 %v2483_v53, %v1411_v48  ;;  %v1336_v34 = vadd.f32 %v1867_v61, %v1239_v50 }
 0x168   :  { %v1461_v62 = vsel %vm1428_vm14, %v1411_v48, %v1445_v32  ;;  %v1412_v33 = vadd.f32 %v2478_v3, %v1336_v34 }
 0x169   :  { %1477 = vst [vmem:[%s2621_s4 + $0x70] sm:$0xff] %v1461_v62 }
 0x16a   :  { %vm1429_vm15 = vcmp.ge.f32.partialorder %v1412_v33, 0.0  ;;  %v1446_v35 = vmul.f32 %v2483_v53, %v1412_v33 }
 0x16c   :  { %v1462_v20 = vsel %vm1429_vm15, %v1412_v33, %v1446_v35 }
 0x16d   :  { %1478 = vst [vmem:[%s2621_s4 + $0x78] sm:$0xff] %v1462_v20 }

// kernel: d_dbpn_forward.33
= control target key start
LH: loop header
LB: loop body
LE: loop exit
PB: predicated region body
PF: predicated region fallthrough
CT: control target
= control target key end

     0   :  { %s684_s2 = inlined_call_operand.vmem [shape: bf16[128,128], index: 2, kind: input, shape index: {}]   ;;  %s685_s1 = inlined_call_operand.vmem [shape: bf16[128,128], index: 1, kind: input, shape index: {}]   ;;  %s686_s3 = inlined_call_operand.vmem [shape: f32[1,128], index: 3, kind: input, shape index: {}]   ;;  %s687_s0 = inlined_call_operand.<no memory space> [shape: f32[1], index: 0, kind: input, shape index: {}]   ;;  %s688_s4 = inlined_call_operand.vmem [shape: f32[128,128], index: 4, kind: output, shape index: {}]  }
   0x1   :  { %v505_v0 = vld [vmem:[%s684_s2 + $0x38] sm:$0xff]   ;;  %v506_v1 = vld [vmem:[%s684_s2 + $0x30] sm:$0xff]   ;;  %v507_v2 = vld [vmem:[%s684_s2 + $0x28] sm:$0xff]   ;;  %v602_v18 = vstv %s687_s0 }
   0x2   :  { %457 = vmatprep.subr.bf16.mxu0 %v505_v0  ;;  %489 = vmatprep.subr.bf16.mxu1 %v505_v0  ;;  %v508_v3 = vld [vmem:[%s684_s2 + $0x20] sm:$0xff]   ;;  %v509_v6 = vld [vmem:[%s684_s2 + $0x18] sm:$0xff]   ;;  %v510_v7 = vld [vmem:[%s684_s2 + $0x10] sm:$0xff]  }
   0x3   :  { %458 = vmatpush3.bf16.msra.mxu0 %v505_v0  ;;  %497 = vmatpush3.bf16.msra.mxu1 %v505_v0  ;;  %v513_v4 = vld [vmem:[%s685_s1] sm:$0xff]   ;;  %v511_v8 = vld [vmem:[%s684_s2 + $0x8] sm:$0xff]   ;;  %v517_v12 = vld [vmem:[%s685_s1 + $0x10] sm:$0xff]  }
   0x4   :  { %459 = vmatprep.subr.bf16.mxu0 %v506_v1  ;;  %490 = vmatprep.subr.bf16.mxu1 %v506_v1  ;;  %v514_v5 = vld [vmem:[%s685_s1 + $0x20] sm:$0xff]   ;;  %v515_v10 = vld [vmem:[%s685_s1 + $0x8] sm:$0xff]   ;;  %v518_v13 = vld [vmem:[%s685_s1 + $0x30] sm:$0xff]  }
   0x5   :  { %473 = vmatprep.mubr.bf16.mxu0 %v513_v4  ;;  %481 = vmatprep.mubr.bf16.mxu1 %v514_v5  ;;  %v512_v9 = vld [vmem:[%s684_s2] sm:$0xff]   ;;  %v516_v11 = vld [vmem:[%s685_s1 + $0x28] sm:$0xff]   ;;  %v519_v14 = vld [vmem:[%s685_s1 + $0x18] sm:$0xff]  }
   0x6   :  { %v520_v15 = vld [vmem:[%s685_s1 + $0x38] sm:$0xff]   ;;  %v597_v16 = vld [vmem:[%s686_s3] ss:$0 sm:$0xff] }
   0x7   :  { %460 = vmatpush3.bf16.msra.mxu0 %v506_v1  ;;  %498 = vmatpush3.bf16.msra.mxu1 %v506_v1 }
   0x8   :  { %461 = vmatprep.subr.bf16.mxu0 %v507_v2  ;;  %491 = vmatprep.subr.bf16.mxu1 %v507_v2 }
   0xb   :  { %462 = vmatpush3.bf16.msra.mxu0 %v507_v2  ;;  %499 = vmatpush3.bf16.msra.mxu1 %v507_v2 }
   0xc   :  { %463 = vmatprep.subr.bf16.mxu0 %v508_v3  ;;  %492 = vmatprep.subr.bf16.mxu1 %v508_v3 }
   0xf   :  { %464 = vmatpush3.bf16.msra.mxu0 %v508_v3  ;;  %500 = vmatpush3.bf16.msra.mxu1 %v508_v3 }
  0x10   :  { %465 = vmatprep.subr.bf16.mxu0 %v509_v6  ;;  %493 = vmatprep.subr.bf16.mxu1 %v509_v6 }
  0x13   :  { %466 = vmatpush3.bf16.msra.mxu0 %v509_v6  ;;  %501 = vmatpush3.bf16.msra.mxu1 %v509_v6 }
  0x14   :  { %467 = vmatprep.subr.bf16.mxu0 %v510_v7  ;;  %494 = vmatprep.subr.bf16.mxu1 %v510_v7 }
  0x17   :  { %468 = vmatpush3.bf16.msra.mxu0 %v510_v7  ;;  %502 = vmatpush3.bf16.msra.mxu1 %v510_v7 }
  0x18   :  { %469 = vmatprep.subr.bf16.mxu0 %v511_v8  ;;  %495 = vmatprep.subr.bf16.mxu1 %v511_v8 }
  0x1b   :  { %470 = vmatpush3.bf16.msra.mxu0 %v511_v8  ;;  %503 = vmatpush3.bf16.msra.mxu1 %v511_v8 }
  0x1c   :  { %471 = vmatprep.subr.bf16.mxu0 %v512_v9  ;;  %496 = vmatprep.subr.bf16.mxu1 %v512_v9 }
  0x1f   :  { %472 = vmatpush3.bf16.msra.mxu0 %v512_v9  ;;  %504 = vmatpush3.bf16.msra.mxu1 %v512_v9 }
  0x22   :  { %474 = vmatmul.mubr.bf16.vlgmr.msra.gmra.mxu0 %v515_v10  ;;  %482 = vmatmul.mubr.bf16.vlgmr.msra.gmra.mxu1 %v516_v11 }
  0x23   :  { %477 = vmatprep.mubr.bf16.mxu0 %v517_v12  ;;  %485 = vmatprep.mubr.bf16.mxu1 %v518_v13 }
  0x2a   :  { %478 = vmatmul.mubr.bf16.gmra.mxu0 %v519_v14  ;;  %486 = vmatmul.mubr.bf16.gmra.mxu1 %v520_v15 }
  0xe2   :  { %v475_v17 = vpop.f32.mrf.mxu0  ;;  %v483_v19 = vpop.f32.mrf.mxu1 }
  0xe3   :  { %v340_v20 = vadd.f32 %v475_v17, %v597_v16  ;;  %v348_v21 = vadd.f32 %v483_v19, %v597_v16 }
  0xe4   :  { %v217_v22 = vpop.f32.mrf.mxu0  ;;  %v249_v23 = vpop.f32.mrf.mxu1 }
  0xe5   :  { %vm357_vm0 = vcmp.ge.f32.partialorder %v340_v20, 0.0  ;;  %v374_v24 = vmul.f32 %v602_v18, %v340_v20  ;;  %vm365_vm1 = vcmp.ge.f32.partialorder %v348_v21, 0.0  ;;  %v382_v25 = vmul.f32 %v602_v18, %v348_v21 }
  0xe6   :  { %v338_v26 = vadd.f32 %v597_v16, %v217_v22  ;;  %v346_v27 = vadd.f32 %v597_v16, %v249_v23  ;;  %v476_v28 = vpop.f32.mrf.mxu0  ;;  %v484_v29 = vpop.f32.mrf.mxu1 }
  0xe7   :  { %v390_v30 = vsel %vm357_vm0, %v340_v20, %v374_v24  ;;  %v398_v31 = vsel %vm365_vm1, %v348_v21, %v382_v25  ;;  %v341_v32 = vadd.f32 %v476_v28, %v597_v16  ;;  %v349_v33 = vadd.f32 %v484_v29, %v597_v16 }
  0xe8   :  { %406 = vst [vmem:[%s688_s4 + $0x10] sm:$0xff] %v390_v30  ;;  %414 = vst [vmem:[%s688_s4 + $0x50] sm:$0xff] %v398_v31  ;;  %vm355_vm2 = vcmp.ge.f32.partialorder %v338_v26, 0.0  ;;  %v372_v34 = vmul.f32 %v602_v18, %v338_v26  ;;  %vm363_vm3 = vcmp.ge.f32.partialorder %v346_v27, 0.0  ;;  %v380_v35 = vmul.f32 %v602_v18, %v346_v27  ;;  %v220_v36 = vpop.f32.mrf.mxu0  ;;  %v252_v37 = vpop.f32.mrf.mxu1 }
  0xe9   :  { %vm358_vm4 = vcmp.ge.f32.partialorder %v341_v32, 0.0  ;;  %v375_v38 = vmul.f32 %v602_v18, %v341_v32  ;;  %vm366_vm5 = vcmp.ge.f32.partialorder %v349_v33, 0.0  ;;  %v383_v39 = vmul.f32 %v602_v18, %v349_v33 }
  0xea   :  { %v388_v40 = vsel %vm355_vm2, %v338_v26, %v372_v34  ;;  %v396_v41 = vsel %vm363_vm3, %v346_v27, %v380_v35  ;;  %v339_v42 = vadd.f32 %v597_v16, %v220_v36  ;;  %v347_v43 = vadd.f32 %v597_v16, %v252_v37  ;;  %v479_v44 = vpop.f32.mrf.mxu0  ;;  %v487_v45 = vpop.f32.mrf.mxu1 }
  0xeb   :  { %404 = vst [vmem:[%s688_s4] sm:$0xff] %v388_v40  ;;  %412 = vst [vmem:[%s688_s4 + $0x40] sm:$0xff] %v396_v41  ;;  %v391_v46 = vsel %vm358_vm4, %v341_v32, %v375_v38  ;;  %v399_v47 = vsel %vm366_vm5, %v349_v33, %v383_v39  ;;  %v344_v48 = vadd.f32 %v479_v44, %v597_v16 }
  0xec   :  { %v352_v49 = vadd.f32 %v487_v45, %v597_v16  ;;  %407 = vst [vmem:[%s688_s4 + $0x18] sm:$0xff] %v391_v46  ;;  %415 = vst [vmem:[%s688_s4 + $0x58] sm:$0xff] %v399_v47  ;;  %vm356_vm6 = vcmp.ge.f32.partialorder %v339_v42, 0.0  ;;  %v373_v50 = vmul.f32 %v602_v18, %v339_v42  ;;  %vm364_vm7 = vcmp.ge.f32.partialorder %v347_v43, 0.0  ;;  %v233_v52 = vpop.f32.mrf.mxu0  ;;  %v265_v53 = vpop.f32.mrf.mxu1 }
  0xed   :  { %v381_v51 = vmul.f32 %v602_v18, %v347_v43  ;;  %vm361_vm8 = vcmp.ge.f32.partialorder %v344_v48, 0.0  ;;  %v378_v54 = vmul.f32 %v602_v18, %v344_v48  ;;  %v342_v58 = vadd.f32 %v597_v16, %v233_v52 }
  0xee   :  { %vm369_vm9 = vcmp.ge.f32.partialorder %v352_v49, 0.0  ;;  %v386_v55 = vmul.f32 %v602_v18, %v352_v49  ;;  %v389_v56 = vsel %vm356_vm6, %v339_v42, %v373_v50  ;;  %v350_v59 = vadd.f32 %v597_v16, %v265_v53  ;;  %v480_v60 = vpop.f32.mrf.mxu0  ;;  %v488_v61 = vpop.f32.mrf.mxu1 }
  0xef   :  { %v397_v57 = vsel %vm364_vm7, %v347_v43, %v381_v51  ;;  %405 = vst [vmem:[%s688_s4 + $0x8] sm:$0xff] %v389_v56  ;;  %v394_v62 = vsel %vm361_vm8, %v344_v48, %v378_v54  ;;  %v345_v0 = vadd.f32 %v480_v60, %v597_v16  ;;  %v353_v1 = vadd.f32 %v488_v61, %v597_v16 }
  0xf0   :  { %413 = vst [vmem:[%s688_s4 + $0x48] sm:$0xff] %v397_v57  ;;  %v402_v63 = vsel %vm369_vm9, %v352_v49, %v386_v55  ;;  %410 = vst [vmem:[%s688_s4 + $0x30] sm:$0xff] %v394_v62  ;;  %vm359_vm10 = vcmp.ge.f32.partialorder %v342_v58, 0.0  ;;  %v376_v2 = vmul.f32 %v602_v18, %v342_v58  ;;  %vm367_vm11 = vcmp.ge.f32.partialorder %v350_v59, 0.0  ;;  %v236_v4 = vpop.f32.mrf.mxu0  ;;  %v268_v5 = vpop.f32.mrf.mxu1 }
  0xf1   :  { %418 = vst [vmem:[%s688_s4 + $0x70] sm:$0xff] %v402_v63  ;;  %v384_v3 = vmul.f32 %v602_v18, %v350_v59  ;;  %vm362_vm12 = vcmp.ge.f32.partialorder %v345_v0, 0.0  ;;  %v379_v6 = vmul.f32 %v602_v18, %v345_v0  ;;  %vm370_vm13 = vcmp.ge.f32.partialorder %v353_v1, 0.0 }
  0xf2   :  { %v387_v7 = vmul.f32 %v602_v18, %v353_v1  ;;  %v392_v8 = vsel %vm359_vm10, %v342_v58, %v376_v2  ;;  %v343_v10 = vadd.f32 %v597_v16, %v236_v4  ;;  %v351_v11 = vadd.f32 %v597_v16, %v268_v5 }
  0xf3   :  { %v400_v9 = vsel %vm367_vm11, %v350_v59, %v384_v3  ;;  %408 = vst [vmem:[%s688_s4 + $0x20] sm:$0xff] %v392_v8  ;;  %v395_v12 = vsel %vm362_vm12, %v345_v0, %v379_v6 }
  0xf4   :  { %416 = vst [vmem:[%s688_s4 + $0x60] sm:$0xff] %v400_v9  ;;  %v403_v13 = vsel %vm370_vm13, %v353_v1, %v387_v7  ;;  %411 = vst [vmem:[%s688_s4 + $0x38] sm:$0xff] %v395_v12  ;;  %vm360_vm14 = vcmp.ge.f32.partialorder %v343_v10, 0.0  ;;  %v377_v14 = vmul.f32 %v602_v18, %v343_v10  ;;  %vm368_vm15 = vcmp.ge.f32.partialorder %v351_v11, 0.0 }
  0xf5   :  { %419 = vst [vmem:[%s688_s4 + $0x78] sm:$0xff] %v403_v13  ;;  %v385_v15 = vmul.f32 %v602_v18, %v351_v11 }
  0xf6   :  { %v393_v16 = vsel %vm360_vm14, %v343_v10, %v377_v14 }
  0xf7   :  { %v401_v17 = vsel %vm368_vm15, %v351_v11, %v385_v15  ;;  %409 = vst [vmem:[%s688_s4 + $0x28] sm:$0xff] %v393_v16 }
  0xf8   :  { %417 = vst [vmem:[%s688_s4 + $0x68] sm:$0xff] %v401_v17 }

// kernel: d_dbpn_forward.37
= control target key start
LH: loop header
LB: loop body
LE: loop exit
PB: predicated region body
PF: predicated region fallthrough
CT: control target
= control target key end

     0   :  { %s2949_s15 = smov 0   ;;  %s2951_s16 = smov 0   ;;  %s3382_s0 = inlined_call_operand.<no memory space> [shape: f32[1], index: 0, kind: input, shape index: {}]   ;;  %s3383_s1 = inlined_call_operand.vmem [shape: bf16[2048,512], index: 1, kind: input, shape index: {}]   ;;  %s3384_s2 = inlined_call_operand.vmem [shape: bf16[512,128], index: 2, kind: input, shape index: {}]   ;;  %s3385_s3 = inlined_call_operand.vmem [shape: f32[1,128], index: 3, kind: input, shape index: {}]   ;;  %s3386_s4 = inlined_call_operand.vmem [shape: f32[2048,128], index: 4, kind: output, shape index: {}]  }
   0x1   :  { %s2953_s17 = smov 0  }
   0x2 LB: > { %s34_s0 = sadd.s32 1, %s2917_s16  ;;  %p2480_p0 = scmp.ge.s32.totalorder %s2921_s17, 1  ;;  %s2921_s17 = sphi %s2953_s17, %s15_s17   ;;  %s2917_s16 = sphi %s2951_s16, %s3388_s16   ;;  %s2913_s15 = sphi %s2949_s15, %s3387_s15  }
   0x3   : > { %p36_p1 = scmp.ge.s32.totalorder %s34_s0, 4  ;;  %p217_p2 = scmp.lt.s32.totalorder %s2921_s17, 5 }
   0x5   : > { %s3390_s0 = smov (%p36_p1, %s34_s0), 0  ;;  %p218_p3 = pnand %p2480_p0, %p217_p2 }
   0x6   : > { %s2481_s12 = sshll.u32 (!%p218_p3), %s2913_s15, 6 }
   0x7   : > { %221 = sbr.rel (%p218_p3) target bundleno = 527 (0x20f), region = 36  ;;  %p264_p4 = scmp.lt.s32.totalorder (!%p218_p3), %s2481_s12, 255 }
   0xc   : > { %v2675_v0 = vld [vmem:[%s3384_s2 + $0x38] sm:$0xff]   ;;  %v2923_v1 = vmov 0   ;;  %v2677_v3 = vld [vmem:[%s3384_s2 + $0x30] sm:$0xff]   ;;  %v2679_v5 = vld [vmem:[%s3384_s2 + $0x28] sm:$0xff]   ;;  %s3392_s12 = smov (!%p264_p4, %s2481_s12), 255 }
   0xd   : > { %1452 = vmatprep.subr.bf16.mxu0 %v2923_v1  ;;  %1741 = vmatprep.subr.bf16.mxu1 %v2923_v1  ;;  %v2676_v2 = vld [vmem:[%s3384_s2 + $0xb8] sm:$0xff]   ;;  %v2678_v4 = vld [vmem:[%s3384_s2 + $0xb0] sm:$0xff]   ;;  %v2680_v6 = vld [vmem:[%s3384_s2 + $0xa8] sm:$0xff]   ;;  %s2649_s27 = sshll.u32 %s3392_s12, 4  ;;  %s2485_s19 = sshll.u32 %s3392_s12, 3 }
   0xe   : > { %1453 = vmatpush1.bf16.msra.mxu0 %v2675_v0  ;;  %1742 = vmatpush1.bf16.msra.mxu1 %v2676_v2  ;;  %v2681_v7 = vld [vmem:[%s3384_s2 + $0x20] sm:$0xff]   ;;  %v2683_v9 = vld [vmem:[%s3384_s2 + $0x18] sm:$0xff]   ;;  %v2685_v11 = vld [vmem:[%s3384_s2 + $0x10] sm:$0xff]   ;;  %s3043_s6 = scalar_lea.vmem %s3383_s1, %s2649_s27  ;;  %s3217_s23 = scalar_lea.vmem %s3386_s4, %s2485_s19 }
   0xf   : > { %1454 = vmatprep.subr.bf16.mxu0 %v2923_v1  ;;  %1743 = vmatprep.subr.bf16.mxu1 %v2923_v1  ;;  %v2682_v8 = vld [vmem:[%s3384_s2 + $0xa0] sm:$0xff]   ;;  %v2684_v10 = vld [vmem:[%s3384_s2 + $0x98] sm:$0xff]   ;;  %v2686_v12 = vld [vmem:[%s3384_s2 + $0x90] sm:$0xff]  }
  0x10   : > { %v2687_v13 = vld [vmem:[%s3384_s2 + $0x8] sm:$0xff]   ;;  %v2689_v15 = vld [vmem:[%s3384_s2] sm:$0xff]   ;;  %v2691_v17 = vld [vmem:[%s3384_s2 + $0x78] sm:$0xff]  }
  0x11   : > { %v2688_v14 = vld [vmem:[%s3384_s2 + $0x88] sm:$0xff]   ;;  %v2690_v16 = vld [vmem:[%s3384_s2 + $0x80] sm:$0xff]   ;;  %v2692_v18 = vld [vmem:[%s3384_s2 + $0xf8] sm:$0xff]  }
  0x12   : > { %1455 = vmatpush1.bf16.msra.mxu0 %v2677_v3  ;;  %1744 = vmatpush1.bf16.msra.mxu1 %v2678_v4  ;;  %v2709_v19 = vld [vmem:[%s3043_s6 + $0x4] ss:$16 sps:$4 sm:$0xff]   ;;  %v2712_v21 = vld [vmem:[%s3043_s6 + $0xc] ss:$16 sps:$4 sm:$0xff]   ;;  %v2707_v35 = vld [vmem:[%s3043_s6] ss:$16 sps:$4 sm:$0xff]  }
  0x13   : > { %1456 = vmatprep.subr.bf16.mxu0 %v2923_v1  ;;  %1745 = vmatprep.subr.bf16.mxu1 %v2923_v1  ;;  %v2693_v20 = vld [vmem:[%s3384_s2 + $0x70] sm:$0xff]   ;;  %v2695_v23 = vld [vmem:[%s3384_s2 + $0x68] sm:$0xff]   ;;  %v2697_v25 = vld [vmem:[%s3384_s2 + $0x60] sm:$0xff]  }
  0x14   : > { %v2694_v22 = vld [vmem:[%s3384_s2 + $0xf0] sm:$0xff]   ;;  %1484 = vmatprep.mubr.bf16.mxu0 %v2709_v19  ;;  %1773 = vmatprep.mubr.bf16.mxu1 %v2712_v21  ;;  %v2696_v24 = vld [vmem:[%s3384_s2 + $0xe8] sm:$0xff]   ;;  %v2698_v26 = vld [vmem:[%s3384_s2 + $0xe0] sm:$0xff]  }
  0x15   : > { %v2699_v27 = vld [vmem:[%s3384_s2 + $0x58] sm:$0xff]   ;;  %v2701_v29 = vld [vmem:[%s3384_s2 + $0x50] sm:$0xff]   ;;  %v2703_v31 = vld [vmem:[%s3384_s2 + $0x48] sm:$0xff]  }
  0x16   : > { %1457 = vmatpush1.bf16.msra.mxu0 %v2679_v5  ;;  %1746 = vmatpush1.bf16.msra.mxu1 %v2680_v6  ;;  %v2700_v28 = vld [vmem:[%s3384_s2 + $0xd8] sm:$0xff]   ;;  %v2702_v30 = vld [vmem:[%s3384_s2 + $0xd0] sm:$0xff]   ;;  %v2704_v32 = vld [vmem:[%s3384_s2 + $0xc8] sm:$0xff]  }
  0x17   : > { %1458 = vmatprep.subr.bf16.mxu0 %v2923_v1  ;;  %1747 = vmatprep.subr.bf16.mxu1 %v2923_v1  ;;  %v2705_v33 = vld [vmem:[%s3384_s2 + $0x40] sm:$0xff]   ;;  %v2710_v36 = vld [vmem:[%s3043_s6 + $0x8] ss:$16 sps:$4 sm:$0xff]   ;;  %v2715_v38 = vld [vmem:[%s3043_s6 + $0x2c] ss:$16 sps:$4 sm:$0xff]  }
  0x18   : > { %v2706_v34 = vld [vmem:[%s3384_s2 + $0xc0] sm:$0xff]   ;;  %v2718_v40 = vld [vmem:[%s3043_s6 + $0x28] ss:$16 sps:$4 sm:$0xff]   ;;  %v2721_v42 = vld [vmem:[%s3043_s6 + $0x4c] ss:$16 sps:$4 sm:$0xff]  }
  0x19   : > { %v2713_v37 = vld [vmem:[%s3043_s6 + $0x24] ss:$16 sps:$4 sm:$0xff]   ;;  %v2717_v39 = vld [vmem:[%s3043_s6 + $0x20] ss:$16 sps:$4 sm:$0xff]   ;;  %v2724_v44 = vld [vmem:[%s3043_s6 + $0x48] ss:$16 sps:$4 sm:$0xff]  }
  0x1a   : > { %1459 = vmatpush1.bf16.msra.mxu0 %v2681_v7  ;;  %1748 = vmatpush1.bf16.msra.mxu1 %v2682_v8  ;;  %v2719_v41 = vld [vmem:[%s3043_s6 + $0x44] ss:$16 sps:$4 sm:$0xff]   ;;  %v2723_v43 = vld [vmem:[%s3043_s6 + $0x40] ss:$16 sps:$4 sm:$0xff]   ;;  %v2727_v46 = vld [vmem:[%s3043_s6 + $0x6c] ss:$16 sps:$4 sm:$0xff]  }
  0x1b   : > { %1460 = vmatprep.subr.bf16.mxu0 %v2923_v1  ;;  %1749 = vmatprep.subr.bf16.mxu1 %v2923_v1  ;;  %v2725_v45 = vld [vmem:[%s3043_s6 + $0x64] ss:$16 sps:$4 sm:$0xff]   ;;  %v2729_v47 = vld [vmem:[%s3043_s6 + $0x60] ss:$16 sps:$4 sm:$0xff]   ;;  %v2730_v48 = vld [vmem:[%s3043_s6 + $0x68] ss:$16 sps:$4 sm:$0xff]  }
  0x1c   : > { %v2731_v49 = vld [vmem:[%s3043_s6 + $0x84] ss:$16 sps:$4 sm:$0xff]   ;;  %v2733_v50 = vld [vmem:[%s3043_s6 + $0x8c] ss:$16 sps:$4 sm:$0xff]   ;;  %v2735_v51 = vld [vmem:[%s3043_s6 + $0x80] ss:$16 sps:$4 sm:$0xff]  }
  0x1d   : > { %v2736_v52 = vld [vmem:[%s3043_s6 + $0x88] ss:$16 sps:$4 sm:$0xff]   ;;  %v2737_v53 = vld [vmem:[%s3043_s6 + $0xa4] ss:$16 sps:$4 sm:$0xff]   ;;  %v2739_v54 = vld [vmem:[%s3043_s6 + $0xac] ss:$16 sps:$4 sm:$0xff]  }
  0x1e   : > { %1461 = vmatpush1.bf16.msra.mxu0 %v2683_v9  ;;  %1750 = vmatpush1.bf16.msra.mxu1 %v2684_v10  ;;  %v2741_v55 = vld [vmem:[%s3043_s6 + $0xa0] ss:$16 sps:$4 sm:$0xff]   ;;  %v2742_v56 = vld [vmem:[%s3043_s6 + $0xa8] ss:$16 sps:$4 sm:$0xff]   ;;  %v2743_v57 = vld [vmem:[%s3043_s6 + $0xc4] ss:$16 sps:$4 sm:$0xff]  }
  0x1f   : > { %1462 = vmatprep.subr.bf16.mxu0 %v2923_v1  ;;  %1751 = vmatprep.subr.bf16.mxu1 %v2923_v1  ;;  %v2745_v58 = vld [vmem:[%s3043_s6 + $0xcc] ss:$16 sps:$4 sm:$0xff]   ;;  %v2747_v59 = vld [vmem:[%s3043_s6 + $0xc0] ss:$16 sps:$4 sm:$0xff]   ;;  %v2748_v60 = vld [vmem:[%s3043_s6 + $0xc8] ss:$16 sps:$4 sm:$0xff]  }
  0x20   : > { %v2749_v61 = vld [vmem:[%s3043_s6 + $0xe4] ss:$16 sps:$4 sm:$0xff]   ;;  %v2751_v62 = vld [vmem:[%s3043_s6 + $0xec] ss:$16 sps:$4 sm:$0xff]   ;;  %v2753_v63 = vld [vmem:[%s3043_s6 + $0xe0] ss:$16 sps:$4 sm:$0xff]  }
  0x21   : > { %v2754_v0 = vld [vmem:[%s3043_s6 + $0xe8] ss:$16 sps:$4 sm:$0xff]   ;;  %v2757_v2 = vld [vmem:[%s3043_s6 + $0x10c] ss:$16 sps:$4 sm:$0xff]   ;;  %v2759_v3 = vld [vmem:[%s3043_s6 + $0x100] ss:$16 sps:$4 sm:$0xff]  }
  0x22   : > { %1463 = vmatpush1.bf16.msra.mxu0 %v2685_v11  ;;  %1752 = vmatpush1.bf16.msra.mxu1 %v2686_v12  ;;  %v2760_v4 = vld [vmem:[%s3043_s6 + $0x108] ss:$16 sps:$4 sm:$0xff]   ;;  %v2761_v5 = vld [vmem:[%s3043_s6 + $0x124] ss:$16 sps:$4 sm:$0xff]   ;;  %v2763_v6 = vld [vmem:[%s3043_s6 + $0x12c] ss:$16 sps:$4 sm:$0xff]  }
  0x23   : > { %1464 = vmatprep.subr.bf16.mxu0 %v2923_v1  ;;  %1753 = vmatprep.subr.bf16.mxu1 %v2923_v1  ;;  %v2765_v7 = vld [vmem:[%s3043_s6 + $0x120] ss:$16 sps:$4 sm:$0xff]   ;;  %v2766_v8 = vld [vmem:[%s3043_s6 + $0x128] ss:$16 sps:$4 sm:$0xff]   ;;  %v2767_v9 = vld [vmem:[%s3043_s6 + $0x144] ss:$16 sps:$4 sm:$0xff]  }
  0x24   : > { %v2769_v10 = vld [vmem:[%s3043_s6 + $0x14c] ss:$16 sps:$4 sm:$0xff]   ;;  %v2771_v11 = vld [vmem:[%s3043_s6 + $0x140] ss:$16 sps:$4 sm:$0xff]   ;;  %v2772_v12 = vld [vmem:[%s3043_s6 + $0x148] ss:$16 sps:$4 sm:$0xff]  }
  0x25   : > { %v2783_v19 = vld [vmem:[%s3043_s6 + $0x180] ss:$16 sps:$4 sm:$0xff]   ;;  %v2785_v21 = vld [vmem:[%s3043_s6 + $0x1a4] ss:$16 sps:$4 sm:$0xff]  }
  0x26   : > { %1465 = vmatpush1.bf16.msra.mxu0 %v2687_v13  ;;  %1754 = vmatpush1.bf16.msra.mxu1 %v2688_v14  ;;  %v2773_v13 = vld [vmem:[%s3043_s6 + $0x164] ss:$16 sps:$4 sm:$0xff]   ;;  %v2775_v14 = vld [vmem:[%s3043_s6 + $0x16c] ss:$16 sps:$4 sm:$0xff]  }
  0x27   : > { %1466 = vmatprep.subr.bf16.mxu0 %v2923_v1  ;;  %1755 = vmatprep.subr.bf16.mxu1 %v2923_v1 }
  0x2a   : > { %1467 = vmatpush1.bf16.msra.mxu0 %v2689_v15  ;;  %1756 = vmatpush1.bf16.msra.mxu1 %v2690_v16  ;;  %v2777_v15 = vld [vmem:[%s3043_s6 + $0x160] ss:$16 sps:$4 sm:$0xff]   ;;  %v2778_v16 = vld [vmem:[%s3043_s6 + $0x168] ss:$16 sps:$4 sm:$0xff]  }
  0x2b   : > { %1468 = vmatprep.subr.bf16.mxu0 %v2923_v1  ;;  %1757 = vmatprep.subr.bf16.mxu1 %v2923_v1 }
  0x2e   : > { %1469 = vmatpush2.bf16.msra.mxu0 %v2691_v17  ;;  %1758 = vmatpush2.bf16.msra.mxu1 %v2692_v18  ;;  %v2779_v17 = vld [vmem:[%s3043_s6 + $0x184] ss:$16 sps:$4 sm:$0xff]   ;;  %v2781_v18 = vld [vmem:[%s3043_s6 + $0x18c] ss:$16 sps:$4 sm:$0xff]  }
  0x2f   : > { %1470 = vmatprep.subr.bf16.mxu0 %v2923_v1  ;;  %1759 = vmatprep.subr.bf16.mxu1 %v2923_v1 }
  0x32   : > { %1471 = vmatpush2.bf16.msra.mxu0 %v2693_v20  ;;  %1760 = vmatpush2.bf16.msra.mxu1 %v2694_v22  ;;  %v2784_v20 = vld [vmem:[%s3043_s6 + $0x188] ss:$16 sps:$4 sm:$0xff]   ;;  %v2787_v22 = vld [vmem:[%s3043_s6 + $0x1ac] ss:$16 sps:$4 sm:$0xff]  }
  0x33   : > { %1472 = vmatprep.subr.bf16.mxu0 %v2923_v1  ;;  %1761 = vmatprep.subr.bf16.mxu1 %v2923_v1 }
  0x36   : > { %1473 = vmatpush2.bf16.msra.mxu0 %v2695_v23  ;;  %1762 = vmatpush2.bf16.msra.mxu1 %v2696_v24  ;;  %v2789_v23 = vld [vmem:[%s3043_s6 + $0x1a0] ss:$16 sps:$4 sm:$0xff]   ;;  %v2790_v24 = vld [vmem:[%s3043_s6 + $0x1a8] ss:$16 sps:$4 sm:$0xff]  }
  0x37   : > { %1474 = vmatprep.subr.bf16.mxu0 %v2923_v1  ;;  %1763 = vmatprep.subr.bf16.mxu1 %v2923_v1 }
  0x3a   : > { %1475 = vmatpush2.bf16.msra.mxu0 %v2697_v25  ;;  %1764 = vmatpush2.bf16.msra.mxu1 %v2698_v26  ;;  %v2791_v25 = vld [vmem:[%s3043_s6 + $0x1c4] ss:$16 sps:$4 sm:$0xff]   ;;  %v2793_v26 = vld [vmem:[%s3043_s6 + $0x1cc] ss:$16 sps:$4 sm:$0xff]  }
  0x3b   : > { %1476 = vmatprep.subr.bf16.mxu0 %v2923_v1  ;;  %1765 = vmatprep.subr.bf16.mxu1 %v2923_v1 }
  0x3e   : > { %1477 = vmatpush2.bf16.msra.mxu0 %v2699_v27  ;;  %1766 = vmatpush2.bf16.msra.mxu1 %v2700_v28  ;;  %v2795_v27 = vld [vmem:[%s3043_s6 + $0x1c0] ss:$16 sps:$4 sm:$0xff]   ;;  %v2796_v28 = vld [vmem:[%s3043_s6 + $0x1c8] ss:$16 sps:$4 sm:$0xff]  }
  0x3f   : > { %1478 = vmatprep.subr.bf16.mxu0 %v2923_v1  ;;  %1767 = vmatprep.subr.bf16.mxu1 %v2923_v1 }
  0x42   : > { %1479 = vmatpush2.bf16.msra.mxu0 %v2701_v29  ;;  %1768 = vmatpush2.bf16.msra.mxu1 %v2702_v30  ;;  %v2797_v29 = vld [vmem:[%s3043_s6 + $0x1e4] ss:$16 sps:$4 sm:$0xff]   ;;  %v2799_v30 = vld [vmem:[%s3043_s6 + $0x1ec] ss:$16 sps:$4 sm:$0xff]  }
  0x43   : > { %1480 = vmatprep.subr.bf16.mxu0 %v2923_v1  ;;  %1769 = vmatprep.subr.bf16.mxu1 %v2923_v1 }
  0x46   : > { %1481 = vmatpush2.bf16.msra.mxu0 %v2703_v31  ;;  %1770 = vmatpush2.bf16.msra.mxu1 %v2704_v32  ;;  %v2801_v31 = vld [vmem:[%s3043_s6 + $0x1e0] ss:$16 sps:$4 sm:$0xff]   ;;  %v2802_v32 = vld [vmem:[%s3043_s6 + $0x1e8] ss:$16 sps:$4 sm:$0xff]  }
  0x47   : > { %1482 = vmatprep.subr.bf16.mxu0 %v2923_v1  ;;  %1771 = vmatprep.subr.bf16.mxu1 %v2923_v1  ;;  %v2755_v1 = vld [vmem:[%s3043_s6 + $0x104] ss:$16 sps:$4 sm:$0xff]  }
  0x4a   : > { %1483 = vmatpush2.bf16.msra.mxu0 %v2705_v33  ;;  %1772 = vmatpush2.bf16.msra.mxu1 %v2706_v34  ;;  %v2803_v33 = vld [vmem:[%s3043_s6 + $0x204] ss:$16 sps:$4 sm:$0xff]   ;;  %v2805_v34 = vld [vmem:[%s3043_s6 + $0x20c] ss:$16 sps:$4 sm:$0xff]  }
  0x4d   : > { %1485 = vmatmul.mubr.bf16.vlgmr.msra.gmra.mxu0 %v2707_v35  ;;  %1774 = vmatmul.mubr.bf16.vlgmr.msra.gmra.mxu1 %v2710_v36  ;;  %v2807_v35 = vld [vmem:[%s3043_s6 + $0x200] ss:$16 sps:$4 sm:$0xff]   ;;  %v2808_v36 = vld [vmem:[%s3043_s6 + $0x208] ss:$16 sps:$4 sm:$0xff]  }
  0x4e   : > { %1492 = vmatprep.mubr.bf16.mxu0 %v2713_v37  ;;  %1781 = vmatprep.mubr.bf16.mxu1 %v2715_v38  ;;  %v2809_v37 = vld [vmem:[%s3043_s6 + $0x224] ss:$16 sps:$4 sm:$0xff]   ;;  %v2811_v38 = vld [vmem:[%s3043_s6 + $0x22c] ss:$16 sps:$4 sm:$0xff]  }
  0x55   : > { %1493 = vmatmul.mubr.bf16.gmra.mxu0 %v2717_v39  ;;  %1782 = vmatmul.mubr.bf16.gmra.mxu1 %v2718_v40  ;;  %v2813_v39 = vld [vmem:[%s3043_s6 + $0x220] ss:$16 sps:$4 sm:$0xff]   ;;  %v2814_v40 = vld [vmem:[%s3043_s6 + $0x228] ss:$16 sps:$4 sm:$0xff]  }
  0x56   : > { %1500 = vmatprep.mubr.bf16.mxu0 %v2719_v41  ;;  %1789 = vmatprep.mubr.bf16.mxu1 %v2721_v42  ;;  %v2815_v41 = vld [vmem:[%s3043_s6 + $0x244] ss:$16 sps:$4 sm:$0xff]   ;;  %v2817_v42 = vld [vmem:[%s3043_s6 + $0x24c] ss:$16 sps:$4 sm:$0xff]  }
  0x5d   : > { %1501 = vmatmul.mubr.bf16.gmra.mxu0 %v2723_v43  ;;  %1790 = vmatmul.mubr.bf16.gmra.mxu1 %v2724_v44  ;;  %v2819_v43 = vld [vmem:[%s3043_s6 + $0x240] ss:$16 sps:$4 sm:$0xff]   ;;  %v2820_v44 = vld [vmem:[%s3043_s6 + $0x248] ss:$16 sps:$4 sm:$0xff]  }
  0x5e   : > { %1508 = vmatprep.mubr.bf16.mxu0 %v2725_v45  ;;  %1797 = vmatprep.mubr.bf16.mxu1 %v2727_v46  ;;  %v2821_v45 = vld [vmem:[%s3043_s6 + $0x264] ss:$16 sps:$4 sm:$0xff]   ;;  %v2823_v46 = vld [vmem:[%s3043_s6 + $0x26c] ss:$16 sps:$4 sm:$0xff]  }
  0x65   : > { %1509 = vmatmul.mubr.bf16.gmra.mxu0 %v2729_v47  ;;  %1798 = vmatmul.mubr.bf16.gmra.mxu1 %v2730_v48  ;;  %v2825_v47 = vld [vmem:[%s3043_s6 + $0x260] ss:$16 sps:$4 sm:$0xff]   ;;  %v2826_v48 = vld [vmem:[%s3043_s6 + $0x268] ss:$16 sps:$4 sm:$0xff]  }
  0x66   : > { %1516 = vmatprep.mubr.bf16.mxu0 %v2731_v49  ;;  %1805 = vmatprep.mubr.bf16.mxu1 %v2733_v50  ;;  %v2827_v49 = vld [vmem:[%s3043_s6 + $0x284] ss:$16 sps:$4 sm:$0xff]   ;;  %v2829_v50 = vld [vmem:[%s3043_s6 + $0x28c] ss:$16 sps:$4 sm:$0xff]  }
  0x6d   : > { %1517 = vmatmul.mubr.bf16.gmra.mxu0 %v2735_v51  ;;  %1806 = vmatmul.mubr.bf16.gmra.mxu1 %v2736_v52  ;;  %v2831_v51 = vld [vmem:[%s3043_s6 + $0x280] ss:$16 sps:$4 sm:$0xff]   ;;  %v2832_v52 = vld [vmem:[%s3043_s6 + $0x288] ss:$16 sps:$4 sm:$0xff]  }
  0x6e   : > { %1524 = vmatprep.mubr.bf16.mxu0 %v2737_v53  ;;  %1813 = vmatprep.mubr.bf16.mxu1 %v2739_v54  ;;  %v2833_v53 = vld [vmem:[%s3043_s6 + $0x2a4] ss:$16 sps:$4 sm:$0xff]   ;;  %v2835_v54 = vld [vmem:[%s3043_s6 + $0x2ac] ss:$16 sps:$4 sm:$0xff]  }
  0x75   : > { %1525 = vmatmul.mubr.bf16.gmra.mxu0 %v2741_v55  ;;  %1814 = vmatmul.mubr.bf16.gmra.mxu1 %v2742_v56  ;;  %v2837_v55 = vld [vmem:[%s3043_s6 + $0x2a0] ss:$16 sps:$4 sm:$0xff]   ;;  %v2838_v56 = vld [vmem:[%s3043_s6 + $0x2a8] ss:$16 sps:$4 sm:$0xff]  }
  0x76   : > { %1532 = vmatprep.mubr.bf16.mxu0 %v2743_v57  ;;  %1821 = vmatprep.mubr.bf16.mxu1 %v2745_v58  ;;  %v2839_v57 = vld [vmem:[%s3043_s6 + $0x2c4] ss:$16 sps:$4 sm:$0xff]   ;;  %v2841_v58 = vld [vmem:[%s3043_s6 + $0x2cc] ss:$16 sps:$4 sm:$0xff]  }
  0x7d   : > { %1533 = vmatmul.mubr.bf16.gmra.mxu0 %v2747_v59  ;;  %1822 = vmatmul.mubr.bf16.gmra.mxu1 %v2748_v60  ;;  %v2843_v59 = vld [vmem:[%s3043_s6 + $0x2c0] ss:$16 sps:$4 sm:$0xff]   ;;  %v2844_v60 = vld [vmem:[%s3043_s6 + $0x2c8] ss:$16 sps:$4 sm:$0xff]  }
  0x7e   : > { %1540 = vmatprep.mubr.bf16.mxu0 %v2749_v61  ;;  %1829 = vmatprep.mubr.bf16.mxu1 %v2751_v62  ;;  %v2845_v61 = vld [vmem:[%s3043_s6 + $0x2e4] ss:$16 sps:$4 sm:$0xff]   ;;  %v2847_v62 = vld [vmem:[%s3043_s6 + $0x2ec] ss:$16 sps:$4 sm:$0xff]  }
  0x85   : > { %1541 = vmatmul.mubr.bf16.gmra.mxu0 %v2753_v63  ;;  %1830 = vmatmul.mubr.bf16.gmra.mxu1 %v2754_v0  ;;  %v2849_v63 = vld [vmem:[%s3043_s6 + $0x2e0] ss:$16 sps:$4 sm:$0xff]   ;;  %v2850_v0 = vld [vmem:[%s3043_s6 + $0x2e8] ss:$16 sps:$4 sm:$0xff]  }
  0x86   : > { %1548 = vmatprep.mubr.bf16.mxu0 %v2755_v1  ;;  %1837 = vmatprep.mubr.bf16.mxu1 %v2757_v2  ;;  %v2851_v1 = vld [vmem:[%s3043_s6 + $0x304] ss:$16 sps:$4 sm:$0xff]   ;;  %v2853_v2 = vld [vmem:[%s3043_s6 + $0x30c] ss:$16 sps:$4 sm:$0xff]  }
  0x8d   : > { %1549 = vmatmul.mubr.bf16.gmra.mxu0 %v2759_v3  ;;  %1838 = vmatmul.mubr.bf16.gmra.mxu1 %v2760_v4  ;;  %v2855_v3 = vld [vmem:[%s3043_s6 + $0x300] ss:$16 sps:$4 sm:$0xff]   ;;  %v2856_v4 = vld [vmem:[%s3043_s6 + $0x308] ss:$16 sps:$4 sm:$0xff]  }
  0x8e   : > { %1556 = vmatprep.mubr.bf16.mxu0 %v2761_v5  ;;  %1845 = vmatprep.mubr.bf16.mxu1 %v2763_v6  ;;  %v2857_v5 = vld [vmem:[%s3043_s6 + $0x324] ss:$16 sps:$4 sm:$0xff]   ;;  %v2859_v6 = vld [vmem:[%s3043_s6 + $0x32c] ss:$16 sps:$4 sm:$0xff]  }
  0x95   : > { %1557 = vmatmul.mubr.bf16.gmra.mxu0 %v2765_v7  ;;  %1846 = vmatmul.mubr.bf16.gmra.mxu1 %v2766_v8 }
  0x96   : > { %1564 = vmatprep.mubr.bf16.mxu0 %v2767_v9  ;;  %1853 = vmatprep.mubr.bf16.mxu1 %v2769_v10  ;;  %v3212_v9 = vld [vmem:[%s3385_s3] ss:$0 sm:$0xff] }
  0x9d   : > { %1565 = vmatmul.mubr.bf16.gmra.mxu0 %v2771_v11  ;;  %1854 = vmatmul.mubr.bf16.gmra.mxu1 %v2772_v12 }
  0x9e   : > { %1572 = vmatprep.mubr.bf16.mxu0 %v2773_v13  ;;  %1861 = vmatprep.mubr.bf16.mxu1 %v2775_v14 }
  0xa5   : > { %1573 = vmatmul.mubr.bf16.gmra.mxu0 %v2777_v15  ;;  %1862 = vmatmul.mubr.bf16.gmra.mxu1 %v2778_v16  ;;  %v2861_v15 = vld [vmem:[%s3043_s6 + $0x320] ss:$16 sps:$4 sm:$0xff]  }
  0xa6   : > { %1580 = vmatprep.mubr.bf16.mxu0 %v2779_v17  ;;  %1869 = vmatprep.mubr.bf16.mxu1 %v2781_v18  ;;  %v2862_v17 = vld [vmem:[%s3043_s6 + $0x328] ss:$16 sps:$4 sm:$0xff]   ;;  %v2863_v18 = vld [vmem:[%s3043_s6 + $0x344] ss:$16 sps:$4 sm:$0xff]  }
  0xad   : > { %1581 = vmatmul.mubr.bf16.gmra.mxu0 %v2783_v19  ;;  %1870 = vmatmul.mubr.bf16.gmra.mxu1 %v2784_v20 }
  0xae   : > { %1588 = vmatprep.mubr.bf16.mxu0 %v2785_v21  ;;  %1877 = vmatprep.mubr.bf16.mxu1 %v2787_v22  ;;  %v2865_v21 = vld [vmem:[%s3043_s6 + $0x34c] ss:$16 sps:$4 sm:$0xff]  }
  0xb5   : > { %1589 = vmatmul.mubr.bf16.gmra.mxu0 %v2789_v23  ;;  %1878 = vmatmul.mubr.bf16.gmra.mxu1 %v2790_v24 }
  0xb6   : > { %1596 = vmatprep.mubr.bf16.mxu0 %v2791_v25  ;;  %1885 = vmatprep.mubr.bf16.mxu1 %v2793_v26 }
  0xbd   : > { %1597 = vmatmul.mubr.bf16.gmra.mxu0 %v2795_v27  ;;  %1886 = vmatmul.mubr.bf16.gmra.mxu1 %v2796_v28 }
  0xbe   : > { %1604 = vmatprep.mubr.bf16.mxu0 %v2797_v29  ;;  %1893 = vmatprep.mubr.bf16.mxu1 %v2799_v30 }
  0xc5   : > { %1605 = vmatmul.mubr.bf16.gmra.mxu0 %v2801_v31  ;;  %1894 = vmatmul.mubr.bf16.gmra.mxu1 %v2802_v32  ;;  %v2867_v31 = vld [vmem:[%s3043_s6 + $0x340] ss:$16 sps:$4 sm:$0xff]  }
  0xc6   : > { %1612 = vmatprep.mubr.bf16.mxu0 %v2803_v33  ;;  %1901 = vmatprep.mubr.bf16.mxu1 %v2805_v34  ;;  %v2868_v33 = vld [vmem:[%s3043_s6 + $0x348] ss:$16 sps:$4 sm:$0xff]   ;;  %v2869_v34 = vld [vmem:[%s3043_s6 + $0x364] ss:$16 sps:$4 sm:$0xff]  }
  0xcd   : > { %1613 = vmatmul.mubr.bf16.gmra.mxu0 %v2807_v35  ;;  %1902 = vmatmul.mubr.bf16.gmra.mxu1 %v2808_v36 }
  0xce   : > { %1620 = vmatprep.mubr.bf16.mxu0 %v2809_v37  ;;  %1909 = vmatprep.mubr.bf16.mxu1 %v2811_v38  ;;  %v2871_v37 = vld [vmem:[%s3043_s6 + $0x36c] ss:$16 sps:$4 sm:$0xff]  }
  0xd5   : > { %1621 = vmatmul.mubr.bf16.gmra.mxu0 %v2813_v39  ;;  %1910 = vmatmul.mubr.bf16.gmra.mxu1 %v2814_v40 }
  0xd6   : > { %1628 = vmatprep.mubr.bf16.mxu0 %v2815_v41  ;;  %1917 = vmatprep.mubr.bf16.mxu1 %v2817_v42 }
  0xdd   : > { %1629 = vmatmul.mubr.bf16.gmra.mxu0 %v2819_v43  ;;  %1918 = vmatmul.mubr.bf16.gmra.mxu1 %v2820_v44 }
  0xde   : > { %1636 = vmatprep.mubr.bf16.mxu0 %v2821_v45  ;;  %1925 = vmatprep.mubr.bf16.mxu1 %v2823_v46 }
  0xe5   : > { %1637 = vmatmul.mubr.bf16.gmra.mxu0 %v2825_v47  ;;  %1926 = vmatmul.mubr.bf16.gmra.mxu1 %v2826_v48  ;;  %v2873_v47 = vld [vmem:[%s3043_s6 + $0x360] ss:$16 sps:$4 sm:$0xff]  }
  0xe6   : > { %1644 = vmatprep.mubr.bf16.mxu0 %v2827_v49  ;;  %1933 = vmatprep.mubr.bf16.mxu1 %v2829_v50  ;;  %v2874_v49 = vld [vmem:[%s3043_s6 + $0x368] ss:$16 sps:$4 sm:$0xff]   ;;  %v2877_v50 = vld [vmem:[%s3043_s6 + $0x384] ss:$16 sps:$4 sm:$0xff]  }
  0xed   : > { %1645 = vmatmul.mubr.bf16.gmra.mxu0 %v2831_v51  ;;  %1934 = vmatmul.mubr.bf16.gmra.mxu1 %v2832_v52 }
  0xee   : > { %1652 = vmatprep.mubr.bf16.mxu0 %v2833_v53  ;;  %1941 = vmatprep.mubr.bf16.mxu1 %v2835_v54  ;;  %v2880_v53 = vld [vmem:[%s3043_s6 + $0x38c] ss:$16 sps:$4 sm:$0xff]  }
  0xf5   : > { %1653 = vmatmul.mubr.bf16.gmra.mxu0 %v2837_v55  ;;  %1942 = vmatmul.mubr.bf16.gmra.mxu1 %v2838_v56 }
  0xf6   : > { %1660 = vmatprep.mubr.bf16.mxu0 %v2839_v57  ;;  %1949 = vmatprep.mubr.bf16.mxu1 %v2841_v58 }
  0xfd   : > { %1661 = vmatmul.mubr.bf16.gmra.mxu0 %v2843_v59  ;;  %1950 = vmatmul.mubr.bf16.gmra.mxu1 %v2844_v60 }
  0xfe   : > { %1668 = vmatprep.mubr.bf16.mxu0 %v2845_v61  ;;  %1957 = vmatprep.mubr.bf16.mxu1 %v2847_v62 }
 0x105   : > { %1669 = vmatmul.mubr.bf16.gmra.mxu0 %v2849_v63  ;;  %1958 = vmatmul.mubr.bf16.gmra.mxu1 %v2850_v0  ;;  %v2875_v63 = vld [vmem:[%s3043_s6 + $0x380] ss:$16 sps:$4 sm:$0xff]  }
 0x106   : > { %1676 = vmatprep.mubr.bf16.mxu0 %v2851_v1  ;;  %1965 = vmatprep.mubr.bf16.mxu1 %v2853_v2  ;;  %v2878_v1 = vld [vmem:[%s3043_s6 + $0x388] ss:$16 sps:$4 sm:$0xff]   ;;  %v2883_v2 = vld [vmem:[%s3043_s6 + $0x3a4] ss:$16 sps:$4 sm:$0xff]  }
 0x10d   : > { %v1486_v7 = vpop.f32.mrf.mxu0  ;;  %1677 = vmatmul.mubr.bf16.gmra.mxu0 %v2855_v3  ;;  %v1775_v8 = vpop.f32.mrf.mxu1  ;;  %1966 = vmatmul.mubr.bf16.gmra.mxu1 %v2856_v4 }
 0x10e   : > { %1684 = vmatprep.mubr.bf16.mxu0 %v2857_v5  ;;  %v1776_v10 = vadd.f32 %v1775_v8, %v1486_v7  ;;  %1973 = vmatprep.mubr.bf16.mxu1 %v2859_v6  ;;  %v2886_v5 = vld [vmem:[%s3043_s6 + $0x3ac] ss:$16 sps:$4 sm:$0xff]  }
 0x10f   : > { %v1488_v11 = vpop.f32.mrf.mxu0  ;;  %v1777_v12 = vpop.f32.mrf.mxu1 }
 0x110   : > { %v2232_v13 = vadd.f32 %v3212_v9, %v1776_v10 }
 0x111   : > { %v1489_v14 = vpop.f32.mrf.mxu0  ;;  %v1778_v16 = vpop.f32.mrf.mxu1 }
 0x112   : > { %2296 = vst [vmem:[%s3217_s23] sm:$0xff] %v2232_v13  ;;  %v1779_v19 = vadd.f32 %v1778_v16, %v1489_v14  ;;  %v2881_v16 = vld [vmem:[%s3043_s6 + $0x3a0] ss:$16 sps:$4 sm:$0xff]  }
 0x113   : > { %v1491_v20 = vpop.f32.mrf.mxu0  ;;  %v1780_v22 = vpop.f32.mrf.mxu1 }
 0x114   : > { %v2233_v23 = vadd.f32 %v3212_v9, %v1779_v19  ;;  %v2889_v19 = vld [vmem:[%s3043_s6 + $0x3c4] ss:$16 sps:$4 sm:$0xff]   ;;  %v2892_v22 = vld [vmem:[%s3043_s6 + $0x3cc] ss:$16 sps:$4 sm:$0xff]  }
 0x115   : > { %v1494_v24 = vpop.f32.mrf.mxu0  ;;  %1685 = vmatmul.mubr.bf16.gmra.mxu0 %v2861_v15  ;;  %v1783_v25 = vpop.f32.mrf.mxu1  ;;  %1974 = vmatmul.mubr.bf16.gmra.mxu1 %v2862_v17 }
 0x116   : > { %1692 = vmatprep.mubr.bf16.mxu0 %v2863_v18  ;;  %2297 = vst [vmem:[%s3217_s23 + $0x8] sm:$0xff] %v2233_v23  ;;  %v1784_v26 = vadd.f32 %v1783_v25, %v1494_v24  ;;  %1981 = vmatprep.mubr.bf16.mxu1 %v2865_v21  ;;  %v2884_v18 = vld [vmem:[%s3043_s6 + $0x3a8] ss:$16 sps:$4 sm:$0xff]  }
 0x117   : > { %v1496_v27 = vpop.f32.mrf.mxu0  ;;  %v1785_v28 = vpop.f32.mrf.mxu1 }
 0x118   : > { %v2234_v29 = vadd.f32 %v3212_v9, %v1784_v26 }
 0x119   : > { %v1497_v30 = vpop.f32.mrf.mxu0  ;;  %v1786_v32 = vpop.f32.mrf.mxu1 }
 0x11a   : > { %2298 = vst [vmem:[%s3217_s23 + $0x10] sm:$0xff] %v2234_v29  ;;  %v1787_v35 = vadd.f32 %v1786_v32, %v1497_v30  ;;  %v2887_v32 = vld [vmem:[%s3043_s6 + $0x3c0] ss:$16 sps:$4 sm:$0xff]  }
 0x11b   : > { %v1499_v36 = vpop.f32.mrf.mxu0  ;;  %v1788_v38 = vpop.f32.mrf.mxu1 }
 0x11c   : > { %v2235_v39 = vadd.f32 %v3212_v9, %v1787_v35  ;;  %v2895_v35 = vld [vmem:[%s3043_s6 + $0x3e4] ss:$16 sps:$4 sm:$0xff]   ;;  %v2898_v38 = vld [vmem:[%s3043_s6 + $0x3ec] ss:$16 sps:$4 sm:$0xff]  }
 0x11d   : > { %v1502_v40 = vpop.f32.mrf.mxu0  ;;  %1693 = vmatmul.mubr.bf16.gmra.mxu0 %v2867_v31  ;;  %v1791_v41 = vpop.f32.mrf.mxu1  ;;  %1982 = vmatmul.mubr.bf16.gmra.mxu1 %v2868_v33 }
 0x11e   : > { %1700 = vmatprep.mubr.bf16.mxu0 %v2869_v34  ;;  %2299 = vst [vmem:[%s3217_s23 + $0x18] sm:$0xff] %v2235_v39  ;;  %v1792_v42 = vadd.f32 %v1791_v41, %v1502_v40  ;;  %1989 = vmatprep.mubr.bf16.mxu1 %v2871_v37  ;;  %v2890_v34 = vld [vmem:[%s3043_s6 + $0x3c8] ss:$16 sps:$4 sm:$0xff]  }
 0x11f   : > { %v1504_v43 = vpop.f32.mrf.mxu0  ;;  %v1793_v44 = vpop.f32.mrf.mxu1 }
 0x120   : > { %v2236_v45 = vadd.f32 %v3212_v9, %v1792_v42 }
 0x121   : > { %v1505_v46 = vpop.f32.mrf.mxu0  ;;  %v1794_v48 = vpop.f32.mrf.mxu1 }
 0x122   : > { %2300 = vst [vmem:[%s3217_s23 + $0x20] sm:$0xff] %v2236_v45  ;;  %v1795_v51 = vadd.f32 %v1794_v48, %v1505_v46  ;;  %v2893_v48 = vld [vmem:[%s3043_s6 + $0x3e0] ss:$16 sps:$4 sm:$0xff]  }
 0x123   : > { %v1507_v52 = vpop.f32.mrf.mxu0  ;;  %v1796_v54 = vpop.f32.mrf.mxu1 }
 0x124   : > { %v2237_v55 = vadd.f32 %v3212_v9, %v1795_v51 }
 0x125   : > { %v1510_v56 = vpop.f32.mrf.mxu0  ;;  %1701 = vmatmul.mubr.bf16.gmra.mxu0 %v2873_v47  ;;  %v1799_v57 = vpop.f32.mrf.mxu1  ;;  %1990 = vmatmul.mubr.bf16.gmra.mxu1 %v2874_v49 }
 0x126   : > { %1708 = vmatprep.mubr.bf16.mxu0 %v2877_v50  ;;  %2301 = vst [vmem:[%s3217_s23 + $0x28] sm:$0xff] %v2237_v55  ;;  %v1800_v58 = vadd.f32 %v1799_v57, %v1510_v56  ;;  %1997 = vmatprep.mubr.bf16.mxu1 %v2880_v53  ;;  %v2896_v50 = vld [vmem:[%s3043_s6 + $0x3e8] ss:$16 sps:$4 sm:$0xff]  }
 0x127   : > { %v1512_v59 = vpop.f32.mrf.mxu0  ;;  %v1801_v60 = vpop.f32.mrf.mxu1 }
 0x128   : > { %v2238_v61 = vadd.f32 %v3212_v9, %v1800_v58 }
 0x129   : > { %v1513_v62 = vpop.f32.mrf.mxu0  ;;  %v1802_v0 = vpop.f32.mrf.mxu1 }
 0x12a   : > { %2302 = vst [vmem:[%s3217_s23 + $0x30] sm:$0xff] %v2238_v61  ;;  %v1803_v3 = vadd.f32 %v1802_v0, %v1513_v62 }
 0x12b   : > { %v1515_v4 = vpop.f32.mrf.mxu0  ;;  %v1804_v6 = vpop.f32.mrf.mxu1 }
 0x12c   : > { %v2239_v7 = vadd.f32 %v3212_v9, %v1803_v3 }
 0x12d   : > { %v1518_v8 = vpop.f32.mrf.mxu0  ;;  %1709 = vmatmul.mubr.bf16.gmra.mxu0 %v2875_v63  ;;  %v1807_v10 = vpop.f32.mrf.mxu1  ;;  %1998 = vmatmul.mubr.bf16.gmra.mxu1 %v2878_v1 }
 0x12e   : > { %1716 = vmatprep.mubr.bf16.mxu0 %v2883_v2  ;;  %2303 = vst [vmem:[%s3217_s23 + $0x38] sm:$0xff] %v2239_v7  ;;  %v1808_v11 = vadd.f32 %v1807_v10, %v1518_v8  ;;  %2005 = vmatprep.mubr.bf16.mxu1 %v2886_v5 }
 0x12f   : > { %v1520_v12 = vpop.f32.mrf.mxu0  ;;  %v1809_v13 = vpop.f32.mrf.mxu1 }
 0x130   : > { %v2240_v14 = vadd.f32 %v3212_v9, %v1808_v11 }
 0x131   : > { %v1521_v15 = vpop.f32.mrf.mxu0  ;;  %v1810_v17 = vpop.f32.mrf.mxu1 }
 0x132   : > { %2304 = vst [vmem:[%s3217_s23 + $0x40] sm:$0xff] %v2240_v14  ;;  %v1811_v20 = vadd.f32 %v1810_v17, %v1521_v15 }
 0x133   : > { %v1523_v21 = vpop.f32.mrf.mxu0  ;;  %v1812_v23 = vpop.f32.mrf.mxu1 }
 0x134   : > { %v2241_v24 = vadd.f32 %v3212_v9, %v1811_v20 }
 0x135   : > { %v1526_v25 = vpop.f32.mrf.mxu0  ;;  %1717 = vmatmul.mubr.bf16.gmra.mxu0 %v2881_v16  ;;  %v1815_v26 = vpop.f32.mrf.mxu1  ;;  %2006 = vmatmul.mubr.bf16.gmra.mxu1 %v2884_v18 }
 0x136   : > { %1724 = vmatprep.mubr.bf16.mxu0 %v2889_v19  ;;  %2305 = vst [vmem:[%s3217_s23 + $0x48] sm:$0xff] %v2241_v24  ;;  %v1816_v27 = vadd.f32 %v1815_v26, %v1526_v25  ;;  %2013 = vmatprep.mubr.bf16.mxu1 %v2892_v22 }
 0x137   : > { %v1528_v28 = vpop.f32.mrf.mxu0  ;;  %v1817_v29 = vpop.f32.mrf.mxu1 }
 0x138   : > { %v2242_v30 = vadd.f32 %v3212_v9, %v1816_v27 }
 0x139   : > { %v1529_v31 = vpop.f32.mrf.mxu0  ;;  %v1818_v33 = vpop.f32.mrf.mxu1 }
 0x13a   : > { %2306 = vst [vmem:[%s3217_s23 + $0x50] sm:$0xff] %v2242_v30  ;;  %v1819_v36 = vadd.f32 %v1818_v33, %v1529_v31 }
 0x13b   : > { %v1531_v37 = vpop.f32.mrf.mxu0  ;;  %v1820_v39 = vpop.f32.mrf.mxu1 }
 0x13c   : > { %v2243_v40 = vadd.f32 %v3212_v9, %v1819_v36 }
 0x13d   : > { %v1534_v41 = vpop.f32.mrf.mxu0  ;;  %1725 = vmatmul.mubr.bf16.gmra.mxu0 %v2887_v32  ;;  %v1823_v42 = vpop.f32.mrf.mxu1  ;;  %2014 = vmatmul.mubr.bf16.gmra.mxu1 %v2890_v34 }
 0x13e   : > { %1732 = vmatprep.mubr.bf16.mxu0 %v2895_v35  ;;  %2307 = vst [vmem:[%s3217_s23 + $0x58] sm:$0xff] %v2243_v40  ;;  %v1824_v43 = vadd.f32 %v1823_v42, %v1534_v41  ;;  %2021 = vmatprep.mubr.bf16.mxu1 %v2898_v38 }
 0x13f   : > { %v1536_v44 = vpop.f32.mrf.mxu0  ;;  %v1825_v45 = vpop.f32.mrf.mxu1 }
 0x140   : > { %v2244_v46 = vadd.f32 %v3212_v9, %v1824_v43 }
 0x141   : > { %v1537_v47 = vpop.f32.mrf.mxu0  ;;  %v1826_v49 = vpop.f32.mrf.mxu1 }
 0x142   : > { %2308 = vst [vmem:[%s3217_s23 + $0x60] sm:$0xff] %v2244_v46  ;;  %v1827_v51 = vadd.f32 %v1826_v49, %v1537_v47 }
 0x143   : > { %v1539_v52 = vpop.f32.mrf.mxu0  ;;  %v1828_v53 = vpop.f32.mrf.mxu1 }
 0x144   : > { %v2245_v54 = vadd.f32 %v3212_v9, %v1827_v51 }
 0x145   : > { %v1542_v55 = vpop.f32.mrf.mxu0  ;;  %1733 = vmatmul.mubr.bf16.gmra.mxu0 %v2893_v48  ;;  %v1831_v56 = vpop.f32.mrf.mxu1  ;;  %2022 = vmatmul.mubr.bf16.gmra.mxu1 %v2896_v50 }
 0x146   : > { %2309 = vst [vmem:[%s3217_s23 + $0x68] sm:$0xff] %v2245_v54  ;;  %v1832_v57 = vadd.f32 %v1831_v56, %v1542_v55 }
 0x147   : > { %v1544_v58 = vpop.f32.mrf.mxu0  ;;  %v1833_v59 = vpop.f32.mrf.mxu1 }
 0x148   : > { %v2246_v60 = vadd.f32 %v3212_v9, %v1832_v57 }
 0x149   : > { %v1545_v61 = vpop.f32.mrf.mxu0  ;;  %v1834_v62 = vpop.f32.mrf.mxu1 }
 0x14a   : > { %2310 = vst [vmem:[%s3217_s23 + $0x70] sm:$0xff] %v2246_v60  ;;  %v1835_v63 = vadd.f32 %v1834_v62, %v1545_v61 }
 0x14b   : > { %v1547_v0 = vpop.f32.mrf.mxu0  ;;  %v1836_v1 = vpop.f32.mrf.mxu1 }
 0x14c   : > { %v2247_v2 = vadd.f32 %v3212_v9, %v1835_v63 }
 0x14d   : > { %v1550_v3 = vpop.f32.mrf.mxu0  ;;  %v1839_v4 = vpop.f32.mrf.mxu1 }
 0x14e   : > { %2311 = vst [vmem:[%s3217_s23 + $0x78] sm:$0xff] %v2247_v2  ;;  %v1840_v5 = vadd.f32 %v1839_v4, %v1550_v3 }
 0x14f   : > { %v1552_v6 = vpop.f32.mrf.mxu0  ;;  %v1841_v7 = vpop.f32.mrf.mxu1 }
 0x150   : > { %v2248_v8 = vadd.f32 %v3212_v9, %v1840_v5 }
 0x151   : > { %v1553_v10 = vpop.f32.mrf.mxu0  ;;  %v1842_v11 = vpop.f32.mrf.mxu1 }
 0x152   : > { %2312 = vst [vmem:[%s3217_s23 + $0x80] sm:$0xff] %v2248_v8  ;;  %v1843_v12 = vadd.f32 %v1842_v11, %v1553_v10 }
 0x153   : > { %v1555_v13 = vpop.f32.mrf.mxu0  ;;  %v1844_v14 = vpop.f32.mrf.mxu1 }
 0x154   : > { %v2249_v15 = vadd.f32 %v3212_v9, %v1843_v12 }
 0x155   : > { %v1558_v16 = vpop.f32.mrf.mxu0  ;;  %v1847_v17 = vpop.f32.mrf.mxu1 }
 0x156   : > { %2313 = vst [vmem:[%s3217_s23 + $0x88] sm:$0xff] %v2249_v15  ;;  %v1848_v18 = vadd.f32 %v1847_v17, %v1558_v16 }
 0x157   : > { %v1560_v19 = vpop.f32.mrf.mxu0  ;;  %v1849_v20 = vpop.f32.mrf.mxu1 }
 0x158   : > { %v2250_v21 = vadd.f32 %v3212_v9, %v1848_v18 }
 0x159   : > { %v1561_v22 = vpop.f32.mrf.mxu0  ;;  %v1850_v23 = vpop.f32.mrf.mxu1 }
 0x15a   : > { %2314 = vst [vmem:[%s3217_s23 + $0x90] sm:$0xff] %v2250_v21  ;;  %v1851_v24 = vadd.f32 %v1850_v23, %v1561_v22 }
 0x15b   : > { %v1563_v25 = vpop.f32.mrf.mxu0  ;;  %v1852_v26 = vpop.f32.mrf.mxu1 }
 0x15c   : > { %v2251_v27 = vadd.f32 %v3212_v9, %v1851_v24 }
 0x15d   : > { %v1566_v28 = vpop.f32.mrf.mxu0  ;;  %v1855_v29 = vpop.f32.mrf.mxu1 }
 0x15e   : > { %2315 = vst [vmem:[%s3217_s23 + $0x98] sm:$0xff] %v2251_v27  ;;  %v1856_v30 = vadd.f32 %v1855_v29, %v1566_v28 }
 0x15f   : > { %v1568_v31 = vpop.f32.mrf.mxu0  ;;  %v1857_v32 = vpop.f32.mrf.mxu1 }
 0x160   : > { %v2252_v33 = vadd.f32 %v3212_v9, %v1856_v30 }
 0x161   : > { %v1569_v34 = vpop.f32.mrf.mxu0  ;;  %v1858_v35 = vpop.f32.mrf.mxu1 }
 0x162   : > { %2316 = vst [vmem:[%s3217_s23 + $0xa0] sm:$0xff] %v2252_v33  ;;  %v1859_v36 = vadd.f32 %v1858_v35, %v1569_v34 }
 0x163   : > { %v1571_v37 = vpop.f32.mrf.mxu0  ;;  %v1860_v38 = vpop.f32.mrf.mxu1 }
 0x164   : > { %v2253_v39 = vadd.f32 %v3212_v9, %v1859_v36 }
 0x165   : > { %v1574_v40 = vpop.f32.mrf.mxu0  ;;  %v1863_v41 = vpop.f32.mrf.mxu1 }
 0x166   : > { %2317 = vst [vmem:[%s3217_s23 + $0xa8] sm:$0xff] %v2253_v39  ;;  %v1864_v42 = vadd.f32 %v1863_v41, %v1574_v40 }
 0x167   : > { %v1576_v43 = vpop.f32.mrf.mxu0  ;;  %v1865_v44 = vpop.f32.mrf.mxu1 }
 0x168   : > { %v2254_v45 = vadd.f32 %v3212_v9, %v1864_v42 }
 0x169   : > { %v1577_v46 = vpop.f32.mrf.mxu0  ;;  %v1866_v47 = vpop.f32.mrf.mxu1 }
 0x16a   : > { %2318 = vst [vmem:[%s3217_s23 + $0xb0] sm:$0xff] %v2254_v45  ;;  %v1867_v48 = vadd.f32 %v1866_v47, %v1577_v46 }
 0x16b   : > { %v1579_v49 = vpop.f32.mrf.mxu0  ;;  %v1868_v50 = vpop.f32.mrf.mxu1 }
 0x16c   : > { %v2255_v51 = vadd.f32 %v3212_v9, %v1867_v48 }
 0x16d   : > { %v1582_v52 = vpop.f32.mrf.mxu0  ;;  %v1871_v53 = vpop.f32.mrf.mxu1 }
 0x16e   : > { %2319 = vst [vmem:[%s3217_s23 + $0xb8] sm:$0xff] %v2255_v51  ;;  %v1872_v54 = vadd.f32 %v1871_v53, %v1582_v52 }
 0x16f   : > { %v1584_v55 = vpop.f32.mrf.mxu0  ;;  %v1873_v56 = vpop.f32.mrf.mxu1 }
 0x170   : > { %v2256_v57 = vadd.f32 %v3212_v9, %v1872_v54 }
 0x171   : > { %v1585_v58 = vpop.f32.mrf.mxu0  ;;  %v1874_v59 = vpop.f32.mrf.mxu1 }
 0x172   : > { %2320 = vst [vmem:[%s3217_s23 + $0xc0] sm:$0xff] %v2256_v57  ;;  %v1875_v60 = vadd.f32 %v1874_v59, %v1585_v58 }
 0x173   : > { %v1587_v61 = vpop.f32.mrf.mxu0  ;;  %v1876_v62 = vpop.f32.mrf.mxu1 }
 0x174   : > { %v2257_v63 = vadd.f32 %v3212_v9, %v1875_v60 }
 0x175   : > { %v1590_v0 = vpop.f32.mrf.mxu0  ;;  %v1879_v1 = vpop.f32.mrf.mxu1 }
 0x176   : > { %2321 = vst [vmem:[%s3217_s23 + $0xc8] sm:$0xff] %v2257_v63  ;;  %v1880_v2 = vadd.f32 %v1879_v1, %v1590_v0 }
 0x177   : > { %v1592_v3 = vpop.f32.mrf.mxu0  ;;  %v1881_v4 = vpop.f32.mrf.mxu1 }
 0x178   : > { %v2258_v5 = vadd.f32 %v3212_v9, %v1880_v2 }
 0x179   : > { %v1593_v6 = vpop.f32.mrf.mxu0  ;;  %v1882_v7 = vpop.f32.mrf.mxu1 }
 0x17a   : > { %2322 = vst [vmem:[%s3217_s23 + $0xd0] sm:$0xff] %v2258_v5  ;;  %v1883_v8 = vadd.f32 %v1882_v7, %v1593_v6 }
 0x17b   : > { %v1595_v10 = vpop.f32.mrf.mxu0  ;;  %v1884_v11 = vpop.f32.mrf.mxu1 }
 0x17c   : > { %v2259_v12 = vadd.f32 %v3212_v9, %v1883_v8 }
 0x17d   : > { %v1598_v13 = vpop.f32.mrf.mxu0  ;;  %v1887_v14 = vpop.f32.mrf.mxu1 }
 0x17e   : > { %2323 = vst [vmem:[%s3217_s23 + $0xd8] sm:$0xff] %v2259_v12  ;;  %v1888_v15 = vadd.f32 %v1887_v14, %v1598_v13 }
 0x17f   : > { %v1600_v16 = vpop.f32.mrf.mxu0  ;;  %v1889_v17 = vpop.f32.mrf.mxu1 }
 0x180   : > { %v2260_v18 = vadd.f32 %v3212_v9, %v1888_v15 }
 0x181   : > { %v1601_v19 = vpop.f32.mrf.mxu0  ;;  %v1890_v20 = vpop.f32.mrf.mxu1 }
 0x182   : > { %2324 = vst [vmem:[%s3217_s23 + $0xe0] sm:$0xff] %v2260_v18  ;;  %v1891_v21 = vadd.f32 %v1890_v20, %v1601_v19 }
 0x183   : > { %v1603_v22 = vpop.f32.mrf.mxu0  ;;  %v1892_v23 = vpop.f32.mrf.mxu1 }
 0x184   : > { %v2261_v24 = vadd.f32 %v3212_v9, %v1891_v21 }
 0x185   : > { %v1606_v25 = vpop.f32.mrf.mxu0  ;;  %v1895_v26 = vpop.f32.mrf.mxu1 }
 0x186   : > { %2325 = vst [vmem:[%s3217_s23 + $0xe8] sm:$0xff] %v2261_v24  ;;  %v1896_v27 = vadd.f32 %v1895_v26, %v1606_v25 }
 0x187   : > { %v1608_v28 = vpop.f32.mrf.mxu0  ;;  %v1897_v29 = vpop.f32.mrf.mxu1 }
 0x188   : > { %v2262_v30 = vadd.f32 %v3212_v9, %v1896_v27 }
 0x189   : > { %v1609_v31 = vpop.f32.mrf.mxu0  ;;  %v1898_v32 = vpop.f32.mrf.mxu1 }
 0x18a   : > { %2326 = vst [vmem:[%s3217_s23 + $0xf0] sm:$0xff] %v2262_v30  ;;  %v1899_v33 = vadd.f32 %v1898_v32, %v1609_v31 }
 0x18b   : > { %v1611_v34 = vpop.f32.mrf.mxu0  ;;  %v1900_v35 = vpop.f32.mrf.mxu1 }
 0x18c   : > { %v2263_v36 = vadd.f32 %v3212_v9, %v1899_v33 }
 0x18d   : > { %v1614_v37 = vpop.f32.mrf.mxu0  ;;  %v1903_v38 = vpop.f32.mrf.mxu1 }
 0x18e   : > { %2327 = vst [vmem:[%s3217_s23 + $0xf8] sm:$0xff] %v2263_v36  ;;  %v1904_v39 = vadd.f32 %v1903_v38, %v1614_v37 }
 0x18f   : > { %v1616_v40 = vpop.f32.mrf.mxu0  ;;  %v1905_v41 = vpop.f32.mrf.mxu1 }
 0x190   : > { %v2264_v42 = vadd.f32 %v3212_v9, %v1904_v39 }
 0x191   : > { %v1617_v43 = vpop.f32.mrf.mxu0  ;;  %v1906_v44 = vpop.f32.mrf.mxu1 }
 0x192   : > { %2328 = vst [vmem:[%s3217_s23 + $0x100] sm:$0xff] %v2264_v42  ;;  %v1907_v45 = vadd.f32 %v1906_v44, %v1617_v43 }
 0x193   : > { %v1619_v46 = vpop.f32.mrf.mxu0  ;;  %v1908_v47 = vpop.f32.mrf.mxu1 }
 0x194   : > { %v2265_v48 = vadd.f32 %v3212_v9, %v1907_v45 }
 0x195   : > { %v1622_v49 = vpop.f32.mrf.mxu0  ;;  %v1911_v50 = vpop.f32.mrf.mxu1 }
 0x196   : > { %2329 = vst [vmem:[%s3217_s23 + $0x108] sm:$0xff] %v2265_v48  ;;  %v1912_v51 = vadd.f32 %v1911_v50, %v1622_v49 }
 0x197   : > { %v1624_v52 = vpop.f32.mrf.mxu0  ;;  %v1913_v53 = vpop.f32.mrf.mxu1 }
 0x198   : > { %v2266_v54 = vadd.f32 %v3212_v9, %v1912_v51 }
 0x199   : > { %v1625_v55 = vpop.f32.mrf.mxu0  ;;  %v1914_v56 = vpop.f32.mrf.mxu1 }
 0x19a   : > { %2330 = vst [vmem:[%s3217_s23 + $0x110] sm:$0xff] %v2266_v54  ;;  %v1915_v57 = vadd.f32 %v1914_v56, %v1625_v55 }
 0x19b   : > { %v1627_v58 = vpop.f32.mrf.mxu0  ;;  %v1916_v59 = vpop.f32.mrf.mxu1 }
 0x19c   : > { %v2267_v60 = vadd.f32 %v3212_v9, %v1915_v57 }
 0x19d   : > { %v1630_v61 = vpop.f32.mrf.mxu0  ;;  %v1919_v62 = vpop.f32.mrf.mxu1 }
 0x19e   : > { %2331 = vst [vmem:[%s3217_s23 + $0x118] sm:$0xff] %v2267_v60  ;;  %v1920_v63 = vadd.f32 %v1919_v62, %v1630_v61 }
 0x19f   : > { %v1632_v0 = vpop.f32.mrf.mxu0  ;;  %v1921_v1 = vpop.f32.mrf.mxu1 }
 0x1a0   : > { %v2268_v2 = vadd.f32 %v3212_v9, %v1920_v63 }
 0x1a1   : > { %v1633_v3 = vpop.f32.mrf.mxu0  ;;  %v1922_v4 = vpop.f32.mrf.mxu1 }
 0x1a2   : > { %2332 = vst [vmem:[%s3217_s23 + $0x120] sm:$0xff] %v2268_v2  ;;  %v1923_v5 = vadd.f32 %v1922_v4, %v1633_v3 }
 0x1a3   : > { %v1635_v6 = vpop.f32.mrf.mxu0  ;;  %v1924_v7 = vpop.f32.mrf.mxu1 }
 0x1a4   : > { %v2269_v8 = vadd.f32 %v3212_v9, %v1923_v5 }
 0x1a5   : > { %v1638_v10 = vpop.f32.mrf.mxu0  ;;  %v1927_v11 = vpop.f32.mrf.mxu1 }
 0x1a6   : > { %2333 = vst [vmem:[%s3217_s23 + $0x128] sm:$0xff] %v2269_v8  ;;  %v1928_v12 = vadd.f32 %v1927_v11, %v1638_v10 }
 0x1a7   : > { %v1640_v13 = vpop.f32.mrf.mxu0  ;;  %v1929_v14 = vpop.f32.mrf.mxu1 }
 0x1a8   : > { %v2270_v15 = vadd.f32 %v3212_v9, %v1928_v12 }
 0x1a9   : > { %v1641_v16 = vpop.f32.mrf.mxu0  ;;  %v1930_v17 = vpop.f32.mrf.mxu1 }
 0x1aa   : > { %2334 = vst [vmem:[%s3217_s23 + $0x130] sm:$0xff] %v2270_v15  ;;  %v1931_v18 = vadd.f32 %v1930_v17, %v1641_v16 }
 0x1ab   : > { %v1643_v19 = vpop.f32.mrf.mxu0  ;;  %v1932_v20 = vpop.f32.mrf.mxu1 }
 0x1ac   : > { %v2271_v21 = vadd.f32 %v3212_v9, %v1931_v18 }
 0x1ad   : > { %v1646_v22 = vpop.f32.mrf.mxu0  ;;  %v1935_v23 = vpop.f32.mrf.mxu1 }
 0x1ae   : > { %2335 = vst [vmem:[%s3217_s23 + $0x138] sm:$0xff] %v2271_v21  ;;  %v1936_v24 = vadd.f32 %v1935_v23, %v1646_v22 }
 0x1af   : > { %v1648_v25 = vpop.f32.mrf.mxu0  ;;  %v1937_v26 = vpop.f32.mrf.mxu1 }
 0x1b0   : > { %v2272_v27 = vadd.f32 %v3212_v9, %v1936_v24 }
 0x1b1   : > { %v1649_v28 = vpop.f32.mrf.mxu0  ;;  %v1938_v29 = vpop.f32.mrf.mxu1 }
 0x1b2   : > { %2336 = vst [vmem:[%s3217_s23 + $0x140] sm:$0xff] %v2272_v27  ;;  %v1939_v30 = vadd.f32 %v1938_v29, %v1649_v28 }
 0x1b3   : > { %v1651_v31 = vpop.f32.mrf.mxu0  ;;  %v1940_v32 = vpop.f32.mrf.mxu1 }
 0x1b4   : > { %v2273_v33 = vadd.f32 %v3212_v9, %v1939_v30 }
 0x1b5   : > { %v1654_v34 = vpop.f32.mrf.mxu0  ;;  %v1943_v35 = vpop.f32.mrf.mxu1 }
 0x1b6   : > { %2337 = vst [vmem:[%s3217_s23 + $0x148] sm:$0xff] %v2273_v33  ;;  %v1944_v36 = vadd.f32 %v1943_v35, %v1654_v34 }
 0x1b7   : > { %v1656_v37 = vpop.f32.mrf.mxu0  ;;  %v1945_v38 = vpop.f32.mrf.mxu1 }
 0x1b8   : > { %v2274_v39 = vadd.f32 %v3212_v9, %v1944_v36 }
 0x1b9   : > { %v1657_v40 = vpop.f32.mrf.mxu0  ;;  %v1946_v41 = vpop.f32.mrf.mxu1 }
 0x1ba   : > { %2338 = vst [vmem:[%s3217_s23 + $0x150] sm:$0xff] %v2274_v39  ;;  %v1947_v42 = vadd.f32 %v1946_v41, %v1657_v40 }
 0x1bb   : > { %v1659_v43 = vpop.f32.mrf.mxu0  ;;  %v1948_v44 = vpop.f32.mrf.mxu1 }
 0x1bc   : > { %v2275_v45 = vadd.f32 %v3212_v9, %v1947_v42 }
 0x1bd   : > { %v1662_v46 = vpop.f32.mrf.mxu0  ;;  %v1951_v47 = vpop.f32.mrf.mxu1 }
 0x1be   : > { %2339 = vst [vmem:[%s3217_s23 + $0x158] sm:$0xff] %v2275_v45  ;;  %v1952_v48 = vadd.f32 %v1951_v47, %v1662_v46 }
 0x1bf   : > { %v1664_v49 = vpop.f32.mrf.mxu0  ;;  %v1953_v50 = vpop.f32.mrf.mxu1 }
 0x1c0   : > { %v2276_v51 = vadd.f32 %v3212_v9, %v1952_v48 }
 0x1c1   : > { %v1665_v52 = vpop.f32.mrf.mxu0  ;;  %v1954_v53 = vpop.f32.mrf.mxu1 }
 0x1c2   : > { %2340 = vst [vmem:[%s3217_s23 + $0x160] sm:$0xff] %v2276_v51  ;;  %v1955_v54 = vadd.f32 %v1954_v53, %v1665_v52 }
 0x1c3   : > { %v1667_v55 = vpop.f32.mrf.mxu0  ;;  %v1956_v56 = vpop.f32.mrf.mxu1 }
 0x1c4   : > { %v2277_v57 = vadd.f32 %v3212_v9, %v1955_v54 }
 0x1c5   : > { %v1670_v58 = vpop.f32.mrf.mxu0  ;;  %v1959_v59 = vpop.f32.mrf.mxu1 }
 0x1c6   : > { %2341 = vst [vmem:[%s3217_s23 + $0x168] sm:$0xff] %v2277_v57  ;;  %v1960_v60 = vadd.f32 %v1959_v59, %v1670_v58 }
 0x1c7   : > { %v1672_v61 = vpop.f32.mrf.mxu0  ;;  %v1961_v62 = vpop.f32.mrf.mxu1 }
 0x1c8   : > { %v2278_v63 = vadd.f32 %v3212_v9, %v1960_v60 }
 0x1c9   : > { %v1673_v0 = vpop.f32.mrf.mxu0  ;;  %v1962_v1 = vpop.f32.mrf.mxu1 }
 0x1ca   : > { %2342 = vst [vmem:[%s3217_s23 + $0x170] sm:$0xff] %v2278_v63  ;;  %v1963_v2 = vadd.f32 %v1962_v1, %v1673_v0 }
 0x1cb   : > { %v1675_v3 = vpop.f32.mrf.mxu0  ;;  %v1964_v4 = vpop.f32.mrf.mxu1 }
 0x1cc   : > { %v2279_v5 = vadd.f32 %v3212_v9, %v1963_v2 }
 0x1cd   : > { %v1678_v6 = vpop.f32.mrf.mxu0  ;;  %v1967_v7 = vpop.f32.mrf.mxu1 }
 0x1ce   : > { %2343 = vst [vmem:[%s3217_s23 + $0x178] sm:$0xff] %v2279_v5  ;;  %v1968_v8 = vadd.f32 %v1967_v7, %v1678_v6 }
 0x1cf   : > { %v1680_v10 = vpop.f32.mrf.mxu0  ;;  %v1969_v11 = vpop.f32.mrf.mxu1 }
 0x1d0   : > { %v2280_v12 = vadd.f32 %v3212_v9, %v1968_v8 }
 0x1d1   : > { %v1681_v13 = vpop.f32.mrf.mxu0  ;;  %v1970_v14 = vpop.f32.mrf.mxu1 }
 0x1d2   : > { %2344 = vst [vmem:[%s3217_s23 + $0x180] sm:$0xff] %v2280_v12  ;;  %v1971_v15 = vadd.f32 %v1970_v14, %v1681_v13 }
 0x1d3   : > { %v1683_v16 = vpop.f32.mrf.mxu0  ;;  %v1972_v17 = vpop.f32.mrf.mxu1 }
 0x1d4   : > { %v2281_v18 = vadd.f32 %v3212_v9, %v1971_v15 }
 0x1d5   : > { %v1686_v19 = vpop.f32.mrf.mxu0  ;;  %v1975_v20 = vpop.f32.mrf.mxu1 }
 0x1d6   : > { %2345 = vst [vmem:[%s3217_s23 + $0x188] sm:$0xff] %v2281_v18  ;;  %v1976_v21 = vadd.f32 %v1975_v20, %v1686_v19 }
 0x1d7   : > { %v1688_v22 = vpop.f32.mrf.mxu0  ;;  %v1977_v23 = vpop.f32.mrf.mxu1 }
 0x1d8   : > { %v2282_v24 = vadd.f32 %v3212_v9, %v1976_v21 }
 0x1d9   : > { %v1689_v25 = vpop.f32.mrf.mxu0  ;;  %v1978_v26 = vpop.f32.mrf.mxu1 }
 0x1da   : > { %2346 = vst [vmem:[%s3217_s23 + $0x190] sm:$0xff] %v2282_v24  ;;  %v1979_v27 = vadd.f32 %v1978_v26, %v1689_v25 }
 0x1db   : > { %v1691_v28 = vpop.f32.mrf.mxu0  ;;  %v1980_v29 = vpop.f32.mrf.mxu1 }
 0x1dc   : > { %v2283_v30 = vadd.f32 %v3212_v9, %v1979_v27 }
 0x1dd   : > { %v1694_v31 = vpop.f32.mrf.mxu0  ;;  %v1983_v32 = vpop.f32.mrf.mxu1 }
 0x1de   : > { %2347 = vst [vmem:[%s3217_s23 + $0x198] sm:$0xff] %v2283_v30  ;;  %v1984_v33 = vadd.f32 %v1983_v32, %v1694_v31 }
 0x1df   : > { %v1696_v34 = vpop.f32.mrf.mxu0  ;;  %v1985_v35 = vpop.f32.mrf.mxu1 }
 0x1e0   : > { %v2284_v36 = vadd.f32 %v3212_v9, %v1984_v33 }
 0x1e1   : > { %v1697_v37 = vpop.f32.mrf.mxu0  ;;  %v1986_v38 = vpop.f32.mrf.mxu1 }
 0x1e2   : > { %2348 = vst [vmem:[%s3217_s23 + $0x1a0] sm:$0xff] %v2284_v36  ;;  %v1987_v39 = vadd.f32 %v1986_v38, %v1697_v37 }
 0x1e3   : > { %v1699_v40 = vpop.f32.mrf.mxu0  ;;  %v1988_v41 = vpop.f32.mrf.mxu1 }
 0x1e4   : > { %v2285_v42 = vadd.f32 %v3212_v9, %v1987_v39 }
 0x1e5   : > { %v1702_v43 = vpop.f32.mrf.mxu0  ;;  %v1991_v44 = vpop.f32.mrf.mxu1 }
 0x1e6   : > { %2349 = vst [vmem:[%s3217_s23 + $0x1a8] sm:$0xff] %v2285_v42  ;;  %v1992_v45 = vadd.f32 %v1991_v44, %v1702_v43 }
 0x1e7   : > { %v1704_v46 = vpop.f32.mrf.mxu0  ;;  %v1993_v47 = vpop.f32.mrf.mxu1 }
 0x1e8   : > { %v2286_v48 = vadd.f32 %v3212_v9, %v1992_v45 }
 0x1e9   : > { %v1705_v49 = vpop.f32.mrf.mxu0  ;;  %v1994_v50 = vpop.f32.mrf.mxu1 }
 0x1ea   : > { %2350 = vst [vmem:[%s3217_s23 + $0x1b0] sm:$0xff] %v2286_v48  ;;  %v1995_v51 = vadd.f32 %v1994_v50, %v1705_v49 }
 0x1eb   : > { %v1707_v52 = vpop.f32.mrf.mxu0  ;;  %v1996_v53 = vpop.f32.mrf.mxu1 }
 0x1ec   : > { %v2287_v54 = vadd.f32 %v3212_v9, %v1995_v51 }
 0x1ed   : > { %v1710_v55 = vpop.f32.mrf.mxu0  ;;  %v1999_v56 = vpop.f32.mrf.mxu1 }
 0x1ee   : > { %2351 = vst [vmem:[%s3217_s23 + $0x1b8] sm:$0xff] %v2287_v54  ;;  %v2000_v57 = vadd.f32 %v1999_v56, %v1710_v55 }
 0x1ef   : > { %v1712_v58 = vpop.f32.mrf.mxu0  ;;  %v2001_v59 = vpop.f32.mrf.mxu1 }
 0x1f0   : > { %v2288_v60 = vadd.f32 %v3212_v9, %v2000_v57 }
 0x1f1   : > { %v1713_v61 = vpop.f32.mrf.mxu0  ;;  %v2002_v62 = vpop.f32.mrf.mxu1 }
 0x1f2   : > { %2352 = vst [vmem:[%s3217_s23 + $0x1c0] sm:$0xff] %v2288_v60  ;;  %v2003_v63 = vadd.f32 %v2002_v62, %v1713_v61 }
 0x1f3   : > { %v1715_v0 = vpop.f32.mrf.mxu0  ;;  %v2004_v1 = vpop.f32.mrf.mxu1 }
 0x1f4   : > { %v2289_v2 = vadd.f32 %v3212_v9, %v2003_v63 }
 0x1f5   : > { %v1718_v3 = vpop.f32.mrf.mxu0  ;;  %v2007_v4 = vpop.f32.mrf.mxu1 }
 0x1f6   : > { %2353 = vst [vmem:[%s3217_s23 + $0x1c8] sm:$0xff] %v2289_v2  ;;  %v2008_v5 = vadd.f32 %v2007_v4, %v1718_v3 }
 0x1f7   : > { %v1720_v6 = vpop.f32.mrf.mxu0  ;;  %v2009_v7 = vpop.f32.mrf.mxu1 }
 0x1f8   : > { %v2290_v8 = vadd.f32 %v3212_v9, %v2008_v5 }
 0x1f9   : > { %v1721_v10 = vpop.f32.mrf.mxu0  ;;  %v2010_v11 = vpop.f32.mrf.mxu1 }
 0x1fa   : > { %2354 = vst [vmem:[%s3217_s23 + $0x1d0] sm:$0xff] %v2290_v8  ;;  %v2011_v12 = vadd.f32 %v2010_v11, %v1721_v10 }
 0x1fb   : > { %v1723_v13 = vpop.f32.mrf.mxu0  ;;  %v2012_v14 = vpop.f32.mrf.mxu1 }
 0x1fc   : > { %v2291_v15 = vadd.f32 %v3212_v9, %v2011_v12 }
 0x1fd   : > { %v1726_v16 = vpop.f32.mrf.mxu0  ;;  %v2015_v17 = vpop.f32.mrf.mxu1 }
 0x1fe   : > { %2355 = vst [vmem:[%s3217_s23 + $0x1d8] sm:$0xff] %v2291_v15  ;;  %v2016_v18 = vadd.f32 %v2015_v17, %v1726_v16 }
 0x1ff   : > { %v1728_v19 = vpop.f32.mrf.mxu0  ;;  %v2017_v20 = vpop.f32.mrf.mxu1 }
 0x200   : > { %v2292_v21 = vadd.f32 %v3212_v9, %v2016_v18 }
 0x201   : > { %v1729_v22 = vpop.f32.mrf.mxu0  ;;  %v2018_v23 = vpop.f32.mrf.mxu1 }
 0x202   : > { %2356 = vst [vmem:[%s3217_s23 + $0x1e0] sm:$0xff] %v2292_v21  ;;  %v2019_v24 = vadd.f32 %v2018_v23, %v1729_v22 }
 0x203   : > { %v1731_v25 = vpop.f32.mrf.mxu0  ;;  %v2020_v26 = vpop.f32.mrf.mxu1 }
 0x204   : > { %v2293_v27 = vadd.f32 %v3212_v9, %v2019_v24 }
 0x205   : > { %v1734_v28 = vpop.f32.mrf.mxu0  ;;  %v2023_v29 = vpop.f32.mrf.mxu1 }
 0x206   : > { %2357 = vst [vmem:[%s3217_s23 + $0x1e8] sm:$0xff] %v2293_v27  ;;  %v2024_v30 = vadd.f32 %v2023_v29, %v1734_v28 }
 0x207   : > { %v1736_v31 = vpop.f32.mrf.mxu0  ;;  %v2025_v32 = vpop.f32.mrf.mxu1 }
 0x208   : > { %v2294_v33 = vadd.f32 %v3212_v9, %v2024_v30 }
 0x209   : > { %v1737_v34 = vpop.f32.mrf.mxu0  ;;  %v2026_v35 = vpop.f32.mrf.mxu1 }
 0x20a   : > { %2358 = vst [vmem:[%s3217_s23 + $0x1f0] sm:$0xff] %v2294_v33  ;;  %v2027_v36 = vadd.f32 %v2026_v35, %v1737_v34 }
 0x20b   : > { %v1739_v37 = vpop.f32.mrf.mxu0  ;;  %v2028_v38 = vpop.f32.mrf.mxu1 }
 0x20c   : > { %v2295_v39 = vadd.f32 %v3212_v9, %v2027_v36 }
 0x20e   : > { %2359 = vst [vmem:[%s3217_s23 + $0x1f8] sm:$0xff] %v2295_v39 }
 0x20f PF: > { %s15_s17 = sadd.s32 1, %s2921_s17   ;;  %s3387_s15 = smov %s2917_s16 }
 0x210   : > { %p12_p5 = scmp.ge.s32.totalorder %s15_s17, 6   ;;  %s3388_s16 = smov %s3390_s0 }
 0x212   :  { %14 = sbr.rel (!%p12_p5) target bundleno = 2 (0x2), region = 80 }

</bundles_post_ra>
